<compile_context>
chip_gen: v7x
topology: tpu7x:2x2x1
jax: 0.10.0
libtpu: 0.0.40
codegen_flags: <defaults>
</compile_context>

<pallas_src>
import math
import functools
import numpy as np
import jax
import jax.numpy as jnp
from jax.experimental import pallas as pl
from jax.experimental.pallas import tpu as pltpu

_VMEM_LIMIT = 32 * 1024 * 1024   # safe on v5e/v6e (128 MiB) and v7x (64 MiB)


# ----------------------------- Pallas kernels ------------------------------

def _transformer_layer_kernel(x_ref, y_ref,
                              kw_ref, kb_ref, vw_ref, vb_ref, ow_ref, ob_ref,
                              ln1g_ref, ln1b_ref,
                              f1w_ref, f1b_ref, f2w_ref, f2b_ref,
                              ln2g_ref, ln2b_ref,
                              o_ref, *, n_heads, eps):
    """Whole TransformerLayer (kq_same=True, mask=0 -> strictly-causal,
    zero_pad=True, eval-mode dropout) fused for one batch element."""
    x = x_ref[0].astype(jnp.float32)              # (S, D) query == key
    y = y_ref[0].astype(jnp.float32)              # (S, D) values
    s, d = x.shape
    dk = d // n_heads
    scale = 1.0 / math.sqrt(dk)

    row = jax.lax.broadcasted_iota(jnp.int32, (s, s), 0)
    col = jax.lax.broadcasted_iota(jnp.int32, (s, s), 1)
    allowed = col < row                           # np.triu(k=0) == 0 mask

    q2 = jnp.zeros((s, d), jnp.float32)
    for h in range(n_heads):                      # static, unrolled
        kh = jnp.dot(x, kw_ref[h], preferred_element_type=jnp.float32) + kb_ref[h]
        vh = jnp.dot(y, vw_ref[h], preferred_element_type=jnp.float32) + vb_ref[h]
        qh = kh * scale                           # kq_same & query==key -> q == k
        sc = jnp.dot(qh, kh.T, preferred_element_type=jnp.float32)
        sc = jnp.where(allowed, sc, -1e32)
        sc = sc - jnp.max(sc, axis=-1, keepdims=True)
        e = jnp.exp(sc)
        p = e * pl.reciprocal(jnp.sum(e, axis=-1, keepdims=True), approx=True)
        p = jnp.where(row == 0, 0.0, p)           # zero_pad: first query row -> 0
        oh = jnp.dot(p, vh, preferred_element_type=jnp.float32)
        # accumulate directly through the out-projection in concat layout
        q2 = q2 + jnp.dot(oh, ow_ref[h], preferred_element_type=jnp.float32)
    q2 = q2 + ob_ref[...]

    x1 = x + q2                                   # dropout1 -> identity (eval)
    mu = jnp.mean(x1, axis=-1, keepdims=True)
    var = jnp.mean((x1 - mu) ** 2, axis=-1, keepdims=True)
    x1 = (x1 - mu) * jax.lax.rsqrt(var + eps) * ln1g_ref[...] + ln1b_ref[...]

    h1 = jnp.dot(x1, f1w_ref[...], preferred_element_type=jnp.float32) + f1b_ref[...]
    h1 = jnp.maximum(h1, 0.0)
    ffn = jnp.dot(h1, f2w_ref[...], preferred_element_type=jnp.float32) + f2b_ref[...]

    x2 = x1 + ffn                                 # dropout2 -> identity (eval)
    mu = jnp.mean(x2, axis=-1, keepdims=True)
    var = jnp.mean((x2 - mu) ** 2, axis=-1, keepdims=True)
    x2 = (x2 - mu) * jax.lax.rsqrt(var + eps) * ln2g_ref[...] + ln2b_ref[...]

    o_ref[0] = x2.astype(o_ref.dtype)


def _out_mlp_kernel(x_ref, w1_ref, b1_ref, w2_ref, b2_ref, o_ref):
    """Fused Linear -> ReLU -> Linear -> Sigmoid (lane-padded output)."""
    x = x_ref[...].astype(jnp.float32)
    h = jnp.dot(x, w1_ref[...], preferred_element_type=jnp.float32) + b1_ref[...]
    h = jnp.maximum(h, 0.0)
    y = jnp.dot(h, w2_ref[...], preferred_element_type=jnp.float32) + b2_ref[...]
    o_ref[...] = jax.nn.sigmoid(y).astype(o_ref.dtype)


# ------------------------------ Pallas wrappers ----------------------------

def pallas_transformer_layer(blk, x, y, n_heads, *, eps=1e-5):
    b, s, d = x.shape
    dk = d // n_heads
    d_ff = blk['ff1_w'].shape[1]
    # head-major weight layouts (tiny one-time reshapes on weights only)
    kw = jnp.transpose(blk['k_w'].reshape(d, n_heads, dk), (1, 0, 2))   # (H, D, dk)
    kb = blk['k_b'].reshape(n_heads, 1, dk)
    vw = jnp.transpose(blk['v_w'].reshape(d, n_heads, dk), (1, 0, 2))
    vb = blk['v_b'].reshape(n_heads, 1, dk)
    ow = blk['o_w'].reshape(n_heads, dk, d)                             # (H, dk, D)
    ob = blk['o_b'].reshape(1, d)

    const2 = lambda i: (0, 0)
    const3 = lambda i: (0, 0, 0)
    return pl.pallas_call(
        functools.partial(_transformer_layer_kernel, n_heads=n_heads, eps=eps),
        out_shape=jax.ShapeDtypeStruct((b, s, d), jnp.float32),
        grid=(b,),
        in_specs=[
            pl.BlockSpec((1, s, d), lambda i: (i, 0, 0)),        # query (== key)
            pl.BlockSpec((1, s, d), lambda i: (i, 0, 0)),        # values
            pl.BlockSpec((n_heads, d, dk), const3),              # k/q proj W
            pl.BlockSpec((n_heads, 1, dk), const3),              # k/q proj b
            pl.BlockSpec((n_heads, d, dk), const3),              # v proj W
            pl.BlockSpec((n_heads, 1, dk), const3),              # v proj b
            pl.BlockSpec((n_heads, dk, d), const3),              # out proj W
            pl.BlockSpec((1, d), const2),                        # out proj b
            pl.BlockSpec((1, d), const2),                        # ln1 gamma
            pl.BlockSpec((1, d), const2),                        # ln1 beta
            pl.BlockSpec((d, d_ff), const2),                     # ff1 W
            pl.BlockSpec((1, d_ff), const2),                     # ff1 b
            pl.BlockSpec((d_ff, d), const2),                     # ff2 W
            pl.BlockSpec((1, d), const2),                        # ff2 b
            pl.BlockSpec((1, d), const2),                        # ln2 gamma
            pl.BlockSpec((1, d), const2),                        # ln2 beta
        ],
        out_specs=pl.BlockSpec((1, s, d), lambda i: (i, 0, 0)),
        compiler_params=pltpu.CompilerParams(
            dimension_semantics=("parallel",),
            vmem_limit_bytes=_VMEM_LIMIT),
    )(x.astype(jnp.float32), y.astype(jnp.float32),
      kw, kb, vw, vb, ow, ob,
      blk['ln1_g'].reshape(1, d), blk['ln1_b'].reshape(1, d),
      blk['ff1_w'], blk['ff1_b'].reshape(1, d_ff),
      blk['ff2_w'], blk['ff2_b'].reshape(1, d),
      blk['ln2_g'].reshape(1, d), blk['ln2_b'].reshape(1, d))


def _round_up(x, m):
    return ((x + m - 1) // m) * m


def pallas_out_layer(x, w1, b1, w2, b2, *, row_tile=512):
    """Fused out_layer: Linear(2d->fc) -> ReLU -> Linear(fc->nq) -> Sigmoid.
    Output lane-padded to a multiple of 128 (lane-dense stores), rows tiled."""
    n, d_in = x.shape
    d_hid = w1.shape[1]
    d_out = w2.shape[1]
    d_out_p = _round_up(max(d_out, 128), 128)
    w2p = jnp.zeros((d_hid, d_out_p), jnp.float32).at[:, :d_out].set(w2)
    b2p = jnp.zeros((1, d_out_p), jnp.float32).at[0, :d_out].set(b2)

    n8 = _round_up(n, 8)
    tr = min(row_tile, n8)
    n_pad = _round_up(n8, tr)
    xp = x.astype(jnp.float32)
    if n_pad != n:
        xp = jnp.zeros((n_pad, d_in), jnp.float32).at[:n].set(xp)

    out = pl.pallas_call(
        _out_mlp_kernel,
        out_shape=jax.ShapeDtypeStruct((n_pad, d_out_p), jnp.float32),
        grid=(n_pad // tr,),
        in_specs=[pl.BlockSpec((tr, d_in), lambda i: (i, 0)),
                  pl.BlockSpec((d_in, d_hid), lambda i: (0, 0)),
                  pl.BlockSpec((1, d_hid), lambda i: (0, 0)),
                  pl.BlockSpec((d_hid, d_out_p), lambda i: (0, 0)),
                  pl.BlockSpec((1, d_out_p), lambda i: (0, 0))],
        out_specs=pl.BlockSpec((tr, d_out_p), lambda i: (i, 0)),
        compiler_params=pltpu.CompilerParams(
            dimension_semantics=("parallel",),
            vmem_limit_bytes=_VMEM_LIMIT),
    )(xp, w1, b1.reshape(1, d_hid), w2p, b2p)
    return out[:n, :d_out]


# ------------------------------ parameter init -----------------------------

def _xavier(key, shape):
    fan_in, fan_out = shape
    a = math.sqrt(6.0 / (fan_in + fan_out))
    return jax.random.uniform(key, shape, jnp.float32, -a, a)


def _cosine_pos_emb(max_len, d_model):
    # d_model is even -> sin/cos slices fully overwrite the random init,
    # so pe is deterministic (matches CosinePositionalEmbedding).
    position = np.arange(max_len, dtype=np.float32)[:, None]
    div_term = np.exp(np.arange(0, d_model, 2, dtype=np.float32)
                      * -(math.log(10000.0) / d_model))
    pe = np.zeros((max_len, d_model), dtype=np.float32)
    pe[:, 0::2] = np.sin(position * div_term)
    pe[:, 1::2] = np.cos(position * div_term)
    return jnp.asarray(pe)


def init_params(key, cfg):
    ks = iter(jax.random.split(key, 64))
    d = cfg['d_model']
    p = {}
    p['ques_embed'] = jax.random.normal(next(ks), (cfg['n_question'] + 1, d), jnp.float32)
    p['cpts_embed'] = jax.random.normal(next(ks), (cfg['n_concept'] + 1, d), jnp.float32)
    p['resp_embed'] = jax.random.normal(next(ks), (2, d), jnp.float32)
    p['resp_lin_w'] = _xavier(next(ks), (1, d))
    p['resp_lin_b'] = jnp.zeros((d,), jnp.float32)
    # TODO(synk): AttentionModule class body is not provided in the source file;
    # these parameters drive a stand-in attention pooling over the student axis.
    p['att_w'] = _xavier(next(ks), (d, d))
    p['att_v'] = jax.random.normal(next(ks), (d,), jnp.float32) * 0.1
    p['pos_emb'] = _cosine_pos_emb(cfg['seq_len'], d)
    blocks = []
    for _ in range(cfg['n_blocks']):
        blocks.append({
            'k_w': _xavier(next(ks), (d, d)), 'k_b': jnp.zeros((d,), jnp.float32),
            'v_w': _xavier(next(ks), (d, d)), 'v_b': jnp.zeros((d,), jnp.float32),
            'o_w': _xavier(next(ks), (d, d)), 'o_b': jnp.zeros((d,), jnp.float32),
            'ln1_g': jnp.ones((d,), jnp.float32), 'ln1_b': jnp.zeros((d,), jnp.float32),
            'ff1_w': _xavier(next(ks), (d, cfg['d_ff'])),
            'ff1_b': jnp.zeros((cfg['d_ff'],), jnp.float32),
            'ff2_w': _xavier(next(ks), (cfg['d_ff'], d)),
            'ff2_b': jnp.zeros((d,), jnp.float32),
            'ln2_g': jnp.ones((d,), jnp.float32), 'ln2_b': jnp.zeros((d,), jnp.float32),
        })
    p['blocks'] = blocks
    p['g1_w'] = _xavier(next(ks), (2 * d, 128))
    p['g1_b'] = jnp.zeros((128,), jnp.float32)
    p['g2_w'] = _xavier(next(ks), (128, 2 * d))
    p['g2_b'] = jnp.zeros((2 * d,), jnp.float32)
    p['out1_w'] = _xavier(next(ks), (2 * d, cfg['final_fc_dim']))
    p['out1_b'] = jnp.zeros((cfg['final_fc_dim'],), jnp.float32)
    p['out2_w'] = _xavier(next(ks), (cfg['final_fc_dim'], cfg['n_question']))
    p['out2_b'] = jnp.zeros((cfg['n_question'],), jnp.float32)
    p['q_matrix'] = jax.random.uniform(
        next(ks), (cfg['n_question'] + 1, cfg['n_concept'] + 1), jnp.float32)
    return p


# ------------------------------ model pieces -------------------------------

def base_emb(p, ques, resp, mode):
    ques_embed = p['ques_embed'][ques]
    cpts = jnp.argmax(p['q_matrix'][ques], axis=-1)
    cpts_embed = p['cpts_embed'][cpts]
    q_embed = ques_embed + cpts_embed
    if mode == 'stu':
        qa_embed = p['resp_embed'][resp] + ques_embed
    else:  # 'grp': nn.Linear(1, d_model) on the scalar response
        qa_embed = resp[..., None] * p['resp_lin_w'][0] + p['resp_lin_b'] + ques_embed
    return q_embed, qa_embed


def attention_module(p, x_stu):
    # TODO(synk): AttentionModule definition is missing from the reference
    # source; implemented as learned attention pooling over the student axis.
    scores = jnp.tanh(x_stu @ p['att_w']) @ p['att_v']       # (num_stu, T)
    alpha = jax.nn.softmax(scores, axis=0)
    pooled = jnp.einsum('st,std->td', alpha, x_stu)
    return pooled[None]                                      # (1, T, d)


def architecture_forward(p, q_embed_data, qa_embed_data, n_heads):
    s = q_embed_data.shape[1]
    pe = p['pos_emb'][:s][None]
    x = q_embed_data + pe
    y = qa_embed_data + pe
    for blk in p['blocks']:
        x = pallas_transformer_layer(blk, x, y, n_heads)
    return x


def build_adj_norm_batched(stu_embed_T, top_num):
    """Device-side, batched over T: cosine-sim top-k graph + GCN normalization."""
    T, ns, _ = stu_embed_T.shape
    n = ns + 1
    nrm = stu_embed_T / (jnp.linalg.norm(stu_embed_T, axis=-1, keepdims=True) + 1e-12)
    sim = jnp.einsum('tid,tjd->tij', nrm, nrm)
    sim = jnp.where(jnp.eye(ns, dtype=bool)[None], -jnp.inf, sim)
    k = min(top_num, max(ns - 1, 0))
    adj = jnp.zeros((T, n, n), jnp.float32)
    adj = adj.at[:, 0, 1:].set(1.0)                      # group node -> every student
    if k > 0:
        _, idx = jax.lax.top_k(sim, k)                   # (T, ns, k)
        sel = jax.nn.one_hot(idx, ns, dtype=jnp.float32).sum(axis=2)
        sel = jnp.minimum(sel, 1.0)
        adj = adj.at[:, 1:, 1:].set(sel)
    adj = jnp.maximum(adj, jnp.swapaxes(adj, 1, 2))      # to_undirected
    a_hat = adj + jnp.eye(n, dtype=jnp.float32)[None]    # GCN self loops
    dinv = jax.lax.rsqrt(a_hat.sum(axis=-1))
    return a_hat * dinv[:, :, None] * dinv[:, None, :]


def gcn_forward_batched(p, x_nodes_T, adj_T):
    h = jnp.einsum('tij,tjk->tik', adj_T, x_nodes_T @ p['g1_w']) + p['g1_b']
    h = jax.nn.relu(h)                                   # F.dropout -> identity (eval)
    h = jnp.einsum('tij,tjk->tik', adj_T, h @ p['g2_w']) + p['g2_b']
    return h


@functools.partial(jax.jit, static_argnames=('n_heads', 'top_num'))
def _rigl_device(p, qids_grp, resp_grp, mask_grp, qids_stu, resp_stu, mask_stu,
                 *, n_heads, top_num):
    d = p['ques_embed'].shape[1]
    n_grp, T = qids_grp.shape[0], qids_grp.shape[1]
    assert n_grp == 1  # original graph code assumes a single group node (id 0)

    q_embed_stu, qa_embed_stu = base_emb(p, qids_stu, resp_stu, 'stu')
    q_embed_stu_ori = (q_embed_stu * mask_stu[..., None]).mean(axis=2)
    qa_embed_stu_ori = (qa_embed_stu * mask_stu[..., None]).mean(axis=2)

    q_embed_grp, qa_embed_grp = base_emb(p, qids_grp, resp_grp, 'grp')
    q_embed_grp_ori = (q_embed_grp * mask_grp[..., None]).mean(axis=2)
    qa_embed_grp_ori = (qa_embed_grp * mask_grp[..., None]).mean(axis=2)

    q_embed_grp2 = q_embed_grp_ori + attention_module(p, q_embed_stu_ori)
    qa_embed_grp2 = qa_embed_grp_ori + attention_module(p, qa_embed_stu_ori)
    q_embed_stu2 = q_embed_stu_ori + q_embed_grp_ori
    qa_embed_stu2 = qa_embed_stu_ori + qa_embed_grp_ori

    # ---- device-side graph construction + GCN, batched over timeframes ----
    grp_nodes = jnp.concatenate([q_embed_grp2, qa_embed_grp2], axis=-1)   # (1, T, 2d)
    stu_nodes = jnp.concatenate([q_embed_stu2, qa_embed_stu2], axis=-1)   # (S, T, 2d)
    grp_T = jnp.transpose(grp_nodes, (1, 0, 2))                           # (T, 1, 2d)
    stu_T = jnp.transpose(stu_nodes, (1, 0, 2))                           # (T, S, 2d)
    adj_T = build_adj_norm_batched(stu_T, top_num)                        # (T, S+1, S+1)
    x_nodes_T = jnp.concatenate([grp_T, stu_T], axis=1)                   # (T, S+1, 2d)
    gout = gcn_forward_batched(p, x_nodes_T, adj_T)                       # (T, S+1, 2d)

    embed_grp_graph = jnp.broadcast_to(gout[:, 0][None], (n_grp, T, 2 * d))
    embed_stu_graph = jnp.transpose(gout[:, 1:], (1, 0, 2))               # (S, T, 2d)

    q_embed_grp_graph = embed_grp_graph[:, :, :d]
    qa_embed_grp_graph = embed_grp_graph[:, :, d:]
    q_embed_stu_graph = embed_stu_graph[:, :, :d]
    qa_embed_stu_graph = embed_stu_graph[:, :, d:]

    output_stu = architecture_forward(p, q_embed_stu_graph, qa_embed_stu_graph, n_heads)
    output_grp = architecture_forward(p, q_embed_grp_graph, qa_embed_grp_graph, n_heads)

    concat_stu = jnp.concatenate([output_stu, q_embed_stu_graph], axis=-1)
    concat_grp = jnp.concatenate([output_grp, q_embed_grp_graph], axis=-1)

    def out_layer(x3):
        b_, s_, dd = x3.shape
        y = pallas_out_layer(x3.reshape(-1, dd), p['out1_w'], p['out1_b'],
                             p['out2_w'], p['out2_b'])
        return y.reshape(b_, s_, -1)

    return out_layer(concat_grp), out_layer(concat_stu)


def rigl_forward(p, cfg, qids_grp, resp_grp, mask_grp,
                 qids_stu_ori, resp_stu_ori, mask_stu_ori, top_num=3):
    # num_stu is a static shape -> computed once on host (as in the reference).
    num_stu = int(np.count_nonzero(np.asarray(mask_stu_ori).any(axis=(1, 2))))
    qids_stu = qids_stu_ori[:num_stu]
    resp_stu = resp_stu_ori[:num_stu]
    mask_stu = mask_stu_ori[:num_stu]
    # TODO(synk): flip_response / CL branch not exercised (host-side
    # random.sample mutation; CL=False here).
    return _rigl_device(p, qids_grp, resp_grp, mask_grp,
                        qids_stu, resp_stu, mask_stu,
                        n_heads=cfg['n_heads'], top_num=top_num)


# ----------------------------------- main -----------------------------------

if __name__ == "__main__":
    cfg = dict(n_question=10, n_concept=5, d_model=32, n_blocks=1, n_heads=4,
               d_ff=64, final_fc_dim=64, seq_len=16)
    key = jax.random.PRNGKey(0)
    pkey, dkey = jax.random.split(key)
    params = init_params(pkey, cfg)

    n_grp, n_stu_total, n_timeframe, n_seq = 1, 4, 8, 8
    k1, k2, k3, k4 = jax.random.split(dkey, 4)
    qids_grp = jax.random.randint(k1, (n_grp, n_timeframe, n_seq), 1, cfg['n_question'] + 1)
    resp_grp = jax.random.uniform(k2, (n_grp, n_timeframe, n_seq), jnp.float32)
    mask_grp = jnp.ones((n_grp, n_timeframe, n_seq), jnp.float32)
    qids_stu = jax.random.randint(k3, (n_stu_total, n_timeframe, n_seq), 1, cfg['n_question'] + 1)
    resp_stu = jax.random.randint(k4, (n_stu_total, n_timeframe, n_seq), 0, 2)
    # last student has an all-zero mask -> exercises the num_stu selection path
    mask_stu = jnp.concatenate(
        [jnp.ones((n_stu_total - 1, n_timeframe, n_seq), jnp.float32),
         jnp.zeros((1, n_timeframe, n_seq), jnp.float32)], axis=0)

    out_grp, out_stu = rigl_forward(params, cfg, qids_grp, resp_grp, mask_grp,
                                    qids_stu, resp_stu, mask_stu)
    jax.block_until_ready((out_grp, out_stu))
    assert out_grp.shape == (n_grp, n_timeframe, cfg['n_question'])
    assert out_stu.shape == (n_stu_total - 1, n_timeframe, cfg['n_question'])
    assert bool(jnp.all(jnp.isfinite(out_grp))) and bool(jnp.all(jnp.isfinite(out_stu)))
    print("KERNEL_OK")
</pallas_src>

<mosaic_0001>
module attributes {stable_mosaic.version = 11 : i64} {
  func.func @_out_mlp_kernel(%arg0: i32, %arg1: memref<24x64xf32, #tpu.memory_space<vmem>>, %arg2: memref<64x64xf32, #tpu.memory_space<vmem>>, %arg3: memref<1x64xf32, #tpu.memory_space<vmem>>, %arg4: memref<64x128xf32, #tpu.memory_space<vmem>>, %arg5: memref<1x128xf32, #tpu.memory_space<vmem>>, %arg6: memref<24x128xf32, #tpu.memory_space<vmem>>) attributes {dimension_semantics = [#tpu.dimension_semantics<parallel>], iteration_bounds = array<i64: 1>, scalar_prefetch = 0 : i64, scratch_operands = 0 : i64, tpu.core_type = #tpu.core_type<tc>, window_params = [{transform_indices = @transform_0, window_bounds = array<i64: 24, 64>}, {pipeline_mode = #tpu.pipeline_mode<synchronous>, transform_indices = @transform_1, window_bounds = array<i64: 64, 64>}, {pipeline_mode = #tpu.pipeline_mode<synchronous>, transform_indices = @transform_2, window_bounds = array<i64: 1, 64>}, {pipeline_mode = #tpu.pipeline_mode<synchronous>, transform_indices = @transform_3, window_bounds = array<i64: 64, 128>}, {pipeline_mode = #tpu.pipeline_mode<synchronous>, transform_indices = @transform_4, window_bounds = array<i64: 1, 128>}, {transform_indices = @transform_5, window_bounds = array<i64: 24, 128>}]} {
    %c0 = arith.constant 0 : index
    %c0_0 = arith.constant 0 : index
    %0 = vector.load %arg1[%c0, %c0_0] : memref<24x64xf32, #tpu.memory_space<vmem>>, vector<24x64xf32>
    %c0_1 = arith.constant 0 : index
    %c0_2 = arith.constant 0 : index
    %1 = vector.load %arg2[%c0_1, %c0_2] : memref<64x64xf32, #tpu.memory_space<vmem>>, vector<64x64xf32>
    %cst = arith.constant dense<0.000000e+00> : vector<24x64xf32>
    %2 = tpu.matmul %0, %1, %cst {dimension_numbers = #tpu.dot_dimension_numbers<[1], [0], [0], [1], [0, 0, 1, 1], [], []>} : vector<24x64xf32>, vector<64x64xf32>, vector<24x64xf32> -> vector<24x64xf32>
    %c0_3 = arith.constant 0 : index
    %c0_4 = arith.constant 0 : index
    %3 = vector.load %arg3[%c0_3, %c0_4] : memref<1x64xf32, #tpu.memory_space<vmem>>, vector<1x64xf32>
    %4 = vector.broadcast %3 : vector<1x64xf32> to vector<24x64xf32>
    %5 = arith.addf %2, %4 : vector<24x64xf32>
    %cst_5 = arith.constant 0.000000e+00 : f32
    %6 = vector.broadcast %cst_5 : f32 to vector<24x64xf32>
    %7 = arith.maximumf %5, %6 : vector<24x64xf32>
    %c0_6 = arith.constant 0 : index
    %c0_7 = arith.constant 0 : index
    %8 = vector.load %arg4[%c0_6, %c0_7] : memref<64x128xf32, #tpu.memory_space<vmem>>, vector<64x128xf32>
    %cst_8 = arith.constant dense<0.000000e+00> : vector<24x128xf32>
    %9 = tpu.matmul %7, %8, %cst_8 {dimension_numbers = #tpu.dot_dimension_numbers<[1], [0], [0], [1], [0, 0, 1, 1], [], []>} : vector<24x64xf32>, vector<64x128xf32>, vector<24x128xf32> -> vector<24x128xf32>
    %c0_9 = arith.constant 0 : index
    %c0_10 = arith.constant 0 : index
    %10 = vector.load %arg5[%c0_9, %c0_10] : memref<1x128xf32, #tpu.memory_space<vmem>>, vector<1x128xf32>
    %11 = vector.broadcast %10 : vector<1x128xf32> to vector<24x128xf32>
    %12 = arith.addf %9, %11 : vector<24x128xf32>
    %13 = arith.negf %12 : vector<24x128xf32>
    %14 = math.exp %13 : vector<24x128xf32>
    %cst_11 = arith.constant 1.000000e+00 : f32
    %15 = vector.broadcast %cst_11 : f32 to vector<24x128xf32>
    %16 = arith.addf %15, %14 : vector<24x128xf32>
    %17 = arith.divf %15, %16 : vector<24x128xf32>
    %c0_12 = arith.constant 0 : index
    %c0_13 = arith.constant 0 : index
    %18 = vector.load %arg6[%c0_12, %c0_13] : memref<24x128xf32, #tpu.memory_space<vmem>>, vector<24x128xf32>
    tpu.vector_store %arg6[%c0_12, %c0_13], %17 {strides = array<i32>} : memref<24x128xf32, #tpu.memory_space<vmem>>, vector<24x128xf32>,
    return
  }
  func.func @transform_0(%arg0: i32) -> (i32, i32) {
    %c0_i32 = arith.constant 0 : i32
    %c0_i32_0 = arith.constant 0 : i32
    return %arg0, %c0_i32 : i32, i32
  }
  func.func @transform_1(%arg0: i32) -> (i32, i32) {
    %c0_i32 = arith.constant 0 : i32
    %c0_i32_0 = arith.constant 0 : i32
    %c0_i32_1 = arith.constant 0 : i32
    return %c0_i32, %c0_i32_0 : i32, i32
  }
  func.func @transform_2(%arg0: i32) -> (i32, i32) {
    %c0_i32 = arith.constant 0 : i32
    %c0_i32_0 = arith.constant 0 : i32
    %c0_i32_1 = arith.constant 0 : i32
    return %c0_i32, %c0_i32_0 : i32, i32
  }
  func.func @transform_3(%arg0: i32) -> (i32, i32) {
    %c0_i32 = arith.constant 0 : i32
    %c0_i32_0 = arith.constant 0 : i32
    %c0_i32_1 = arith.constant 0 : i32
    return %c0_i32, %c0_i32_0 : i32, i32
  }
  func.func @transform_4(%arg0: i32) -> (i32, i32) {
    %c0_i32 = arith.constant 0 : i32
    %c0_i32_0 = arith.constant 0 : i32
    %c0_i32_1 = arith.constant 0 : i32
    return %c0_i32, %c0_i32_0 : i32, i32
  }
  func.func @transform_5(%arg0: i32) -> (i32, i32) {
    %c0_i32 = arith.constant 0 : i32
    %c0_i32_0 = arith.constant 0 : i32
    return %arg0, %c0_i32 : i32, i32
  }
}

module attributes {stable_mosaic.version = 11 : i64} {
  func.func @_transformer_layer_kernel(%arg0: i32, %arg1: memref<1x8x32xf32, #tpu.memory_space<vmem>>, %arg2: memref<1x8x32xf32, #tpu.memory_space<vmem>>, %arg3: memref<4x32x8xf32, #tpu.memory_space<vmem>>, %arg4: memref<4x1x8xf32, #tpu.memory_space<vmem>>, %arg5: memref<4x32x8xf32, #tpu.memory_space<vmem>>, %arg6: memref<4x1x8xf32, #tpu.memory_space<vmem>>, %arg7: memref<4x8x32xf32, #tpu.memory_space<vmem>>, %arg8: memref<1x32xf32, #tpu.memory_space<vmem>>, %arg9: memref<1x32xf32, #tpu.memory_space<vmem>>, %arg10: memref<1x32xf32, #tpu.memory_space<vmem>>, %arg11: memref<32x64xf32, #tpu.memory_space<vmem>>, %arg12: memref<1x64xf32, #tpu.memory_space<vmem>>, %arg13: memref<64x32xf32, #tpu.memory_space<vmem>>, %arg14: memref<1x32xf32, #tpu.memory_space<vmem>>, %arg15: memref<1x32xf32, #tpu.memory_space<vmem>>, %arg16: memref<1x32xf32, #tpu.memory_space<vmem>>, %arg17: memref<1x8x32xf32, #tpu.memory_space<vmem>>) attributes {dimension_semantics = [#tpu.dimension_semantics<parallel>], iteration_bounds = array<i64: 3>, scalar_prefetch = 0 : i64, scratch_operands = 0 : i64, tpu.core_type = #tpu.core_type<tc>, window_params = [{transform_indices = @transform_0, window_bounds = array<i64: 1, 8, 32>}, {transform_indices = @transform_1, window_bounds = array<i64: 1, 8, 32>}, {pipeline_mode = #tpu.pipeline_mode<synchronous>, transform_indices = @transform_2, window_bounds = array<i64: 4, 32, 8>}, {pipeline_mode = #tpu.pipeline_mode<synchronous>, transform_indices = @transform_3, window_bounds = array<i64: 4, 1, 8>}, {pipeline_mode = #tpu.pipeline_mode<synchronous>, transform_indices = @transform_4, window_bounds = array<i64: 4, 32, 8>}, {pipeline_mode = #tpu.pipeline_mode<synchronous>, transform_indices = @transform_5, window_bounds = array<i64: 4, 1, 8>}, {pipeline_mode = #tpu.pipeline_mode<synchronous>, transform_indices = @transform_6, window_bounds = array<i64: 4, 8, 32>}, {pipeline_mode = #tpu.pipeline_mode<synchronous>, transform_indices = @transform_7, window_bounds = array<i64: 1, 32>}, {pipeline_mode = #tpu.pipeline_mode<synchronous>, transform_indices = @transform_8, window_bounds = array<i64: 1, 32>}, {pipeline_mode = #tpu.pipeline_mode<synchronous>, transform_indices = @transform_9, window_bounds = array<i64: 1, 32>}, {pipeline_mode = #tpu.pipeline_mode<synchronous>, transform_indices = @transform_10, window_bounds = array<i64: 32, 64>}, {pipeline_mode = #tpu.pipeline_mode<synchronous>, transform_indices = @transform_11, window_bounds = array<i64: 1, 64>}, {pipeline_mode = #tpu.pipeline_mode<synchronous>, transform_indices = @transform_12, window_bounds = array<i64: 64, 32>}, {pipeline_mode = #tpu.pipeline_mode<synchronous>, transform_indices = @transform_13, window_bounds = array<i64: 1, 32>}, {pipeline_mode = #tpu.pipeline_mode<synchronous>, transform_indices = @transform_14, window_bounds = array<i64: 1, 32>}, {pipeline_mode = #tpu.pipeline_mode<synchronous>, transform_indices = @transform_15, window_bounds = array<i64: 1, 32>}, {transform_indices = @transform_16, window_bounds = array<i64: 1, 8, 32>}]} {
    %c0 = arith.constant 0 : index
    %c0_0 = arith.constant 0 : index
    %c0_1 = arith.constant 0 : index
    %0 = vector.load %arg1[%c0, %c0_0, %c0_1] : memref<1x8x32xf32, #tpu.memory_space<vmem>>, vector<1x8x32xf32>
    %1 = vector.shape_cast %0 : vector<1x8x32xf32> to vector<8x32xf32>
    %c0_2 = arith.constant 0 : index
    %c0_3 = arith.constant 0 : index
    %c0_4 = arith.constant 0 : index
    %2 = vector.load %arg2[%c0_2, %c0_3, %c0_4] : memref<1x8x32xf32, #tpu.memory_space<vmem>>, vector<1x8x32xf32>
    %3 = vector.shape_cast %2 : vector<1x8x32xf32> to vector<8x32xf32>
    %4 = tpu.iota {dimensions = array<i32: 0>} : vector<8x8xi32>
    %5 = tpu.iota {dimensions = array<i32: 1>} : vector<8x8xi32>
    %6 = arith.cmpi slt, %5, %4 : vector<8x8xi32>
    %cst = arith.constant 0.000000e+00 : f32
    %7 = vector.broadcast %cst : f32 to vector<8x32xf32>
    %c0_5 = arith.constant 0 : index
    %c0_6 = arith.constant 0 : index
    %c0_7 = arith.constant 0 : index
    %8 = vector.load %arg3[%c0_5, %c0_6, %c0_7] : memref<4x32x8xf32, #tpu.memory_space<vmem>>, vector<1x32x8xf32>
    %9 = vector.shape_cast %8 : vector<1x32x8xf32> to vector<32x8xf32>
    %cst_8 = arith.constant dense<0.000000e+00> : vector<8x8xf32>
    %10 = tpu.matmul %1, %9, %cst_8 {dimension_numbers = #tpu.dot_dimension_numbers<[1], [0], [0], [1], [0, 0, 1, 1], [], []>} : vector<8x32xf32>, vector<32x8xf32>, vector<8x8xf32> -> vector<8x8xf32>
    %c0_9 = arith.constant 0 : index
    %c0_10 = arith.constant 0 : index
    %c0_11 = arith.constant 0 : index
    %11 = vector.load %arg4[%c0_9, %c0_10, %c0_11] : memref<4x1x8xf32, #tpu.memory_space<vmem>>, vector<1x1x8xf32>
    %12 = vector.shape_cast %11 : vector<1x1x8xf32> to vector<1x8xf32>
    %13 = vector.broadcast %12 : vector<1x8xf32> to vector<8x8xf32>
    %14 = arith.addf %10, %13 : vector<8x8xf32>
    %c0_12 = arith.constant 0 : index
    %c0_13 = arith.constant 0 : index
    %c0_14 = arith.constant 0 : index
    %15 = vector.load %arg5[%c0_12, %c0_13, %c0_14] : memref<4x32x8xf32, #tpu.memory_space<vmem>>, vector<1x32x8xf32>
    %16 = vector.shape_cast %15 : vector<1x32x8xf32> to vector<32x8xf32>
    %cst_15 = arith.constant dense<0.000000e+00> : vector<8x8xf32>
    %17 = tpu.matmul %3, %16, %cst_15 {dimension_numbers = #tpu.dot_dimension_numbers<[1], [0], [0], [1], [0, 0, 1, 1], [], []>} : vector<8x32xf32>, vector<32x8xf32>, vector<8x8xf32> -> vector<8x8xf32>
    %c0_16 = arith.constant 0 : index
    %c0_17 = arith.constant 0 : index
    %c0_18 = arith.constant 0 : index
    %18 = vector.load %arg6[%c0_16, %c0_17, %c0_18] : memref<4x1x8xf32, #tpu.memory_space<vmem>>, vector<1x1x8xf32>
    %19 = vector.shape_cast %18 : vector<1x1x8xf32> to vector<1x8xf32>
    %20 = vector.broadcast %19 : vector<1x8xf32> to vector<8x8xf32>
    %21 = arith.addf %17, %20 : vector<8x8xf32>
    %cst_19 = arith.constant 0.353553385 : f32
    %22 = vector.broadcast %cst_19 : f32 to vector<8x8xf32>
    %23 = arith.mulf %14, %22 : vector<8x8xf32>
    %24 = tpu.transpose %14, [1, 0] : vector<8x8xf32> -> vector<8x8xf32>
    %cst_20 = arith.constant dense<0.000000e+00> : vector<8x8xf32>
    %25 = tpu.matmul %23, %24, %cst_20 {dimension_numbers = #tpu.dot_dimension_numbers<[1], [0], [0], [1], [0, 0, 1, 1], [], []>} : vector<8x8xf32>, vector<8x8xf32>, vector<8x8xf32> -> vector<8x8xf32>
    %cst_21 = arith.constant -1.000000e+32 : f32
    %26 = vector.broadcast %cst_21 : f32 to vector<8x8xf32>
    %27 = arith.select %6, %25, %26 : vector<8x8xi1>, vector<8x8xf32>
    %cst_22 = arith.constant dense<0xFF800000> : vector<8xf32>
    %28 = vector.multi_reduction <maximumf>, %27, %cst_22 [1] : vector<8x8xf32> to vector<8xf32>
    %29 = vector.shape_cast %28 : vector<8xf32> to vector<8x1xf32>
    %30 = vector.broadcast %29 : vector<8x1xf32> to vector<8x8xf32>
    %31 = arith.subf %27, %30 : vector<8x8xf32>
    %32 = math.exp %31 : vector<8x8xf32>
    %cst_23 = arith.constant dense<0.000000e+00> : vector<8xf32>
    %33 = vector.multi_reduction <add>, %32, %cst_23 [1] : vector<8x8xf32> to vector<8xf32>
    %34 = vector.shape_cast %33 : vector<8xf32> to vector<8x1xf32>
    %35 = tpu.reciprocal %34 {approx = true} : vector<8x1xf32> -> vector<8x1xf32>
    %36 = vector.broadcast %35 : vector<8x1xf32> to vector<8x8xf32>
    %37 = arith.mulf %32, %36 : vector<8x8xf32>
    %c0_i32 = arith.constant 0 : i32
    %38 = vector.broadcast %c0_i32 : i32 to vector<8x8xi32>
    %39 = arith.cmpi eq, %4, %38 : vector<8x8xi32>
    %cst_24 = arith.constant 0.000000e+00 : f32
    %40 = vector.broadcast %cst_24 : f32 to vector<8x8xf32>
    %41 = arith.select %39, %40, %37 : vector<8x8xi1>, vector<8x8xf32>
    %cst_25 = arith.constant dense<0.000000e+00> : vector<8x8xf32>
    %42 = tpu.matmul %41, %21, %cst_25 {dimension_numbers = #tpu.dot_dimension_numbers<[1], [0], [0], [1], [0, 0, 1, 1], [], []>} : vector<8x8xf32>, vector<8x8xf32>, vector<8x8xf32> -> vector<8x8xf32>
    %c0_26 = arith.constant 0 : index
    %c0_27 = arith.constant 0 : index
    %c0_28 = arith.constant 0 : index
    %43 = vector.load %arg7[%c0_26, %c0_27, %c0_28] : memref<4x8x32xf32, #tpu.memory_space<vmem>>, vector<1x8x32xf32>
    %44 = vector.shape_cast %43 : vector<1x8x32xf32> to vector<8x32xf32>
    %cst_29 = arith.constant dense<0.000000e+00> : vector<8x32xf32>
    %45 = tpu.matmul %42, %44, %cst_29 {dimension_numbers = #tpu.dot_dimension_numbers<[1], [0], [0], [1], [0, 0, 1, 1], [], []>} : vector<8x8xf32>, vector<8x32xf32>, vector<8x32xf32> -> vector<8x32xf32>
    %46 = arith.addf %7, %45 : vector<8x32xf32>
    %c1 = arith.constant 1 : index
    %c0_30 = arith.constant 0 : index
    %c0_31 = arith.constant 0 : index
    %47 = vector.load %arg3[%c1, %c0_30, %c0_31] : memref<4x32x8xf32, #tpu.memory_space<vmem>>, vector<1x32x8xf32>
    %48 = vector.shape_cast %47 : vector<1x32x8xf32> to vector<32x8xf32>
    %cst_32 = arith.constant dense<0.000000e+00> : vector<8x8xf32>
    %49 = tpu.matmul %1, %48, %cst_32 {dimension_numbers = #tpu.dot_dimension_numbers<[1], [0], [0], [1], [0, 0, 1, 1], [], []>} : vector<8x32xf32>, vector<32x8xf32>, vector<8x8xf32> -> vector<8x8xf32>
    %c1_33 = arith.constant 1 : index
    %c0_34 = arith.constant 0 : index
    %c0_35 = arith.constant 0 : index
    %50 = vector.load %arg4[%c1_33, %c0_34, %c0_35] : memref<4x1x8xf32, #tpu.memory_space<vmem>>, vector<1x1x8xf32>
    %51 = vector.shape_cast %50 : vector<1x1x8xf32> to vector<1x8xf32>
    %52 = vector.broadcast %51 : vector<1x8xf32> to vector<8x8xf32>
    %53 = arith.addf %49, %52 : vector<8x8xf32>
    %c1_36 = arith.constant 1 : index
    %c0_37 = arith.constant 0 : index
    %c0_38 = arith.constant 0 : index
    %54 = vector.load %arg5[%c1_36, %c0_37, %c0_38] : memref<4x32x8xf32, #tpu.memory_space<vmem>>, vector<1x32x8xf32>
    %55 = vector.shape_cast %54 : vector<1x32x8xf32> to vector<32x8xf32>
    %cst_39 = arith.constant dense<0.000000e+00> : vector<8x8xf32>
    %56 = tpu.matmul %3, %55, %cst_39 {dimension_numbers = #tpu.dot_dimension_numbers<[1], [0], [0], [1], [0, 0, 1, 1], [], []>} : vector<8x32xf32>, vector<32x8xf32>, vector<8x8xf32> -> vector<8x8xf32>
    %c1_40 = arith.constant 1 : index
    %c0_41 = arith.constant 0 : index
    %c0_42 = arith.constant 0 : index
    %57 = vector.load %arg6[%c1_40, %c0_41, %c0_42] : memref<4x1x8xf32, #tpu.memory_space<vmem>>, vector<1x1x8xf32>
    %58 = vector.shape_cast %57 : vector<1x1x8xf32> to vector<1x8xf32>
    %59 = vector.broadcast %58 : vector<1x8xf32> to vector<8x8xf32>
    %60 = arith.addf %56, %59 : vector<8x8xf32>
    %cst_43 = arith.constant 0.353553385 : f32
    %61 = vector.broadcast %cst_43 : f32 to vector<8x8xf32>
    %62 = arith.mulf %53, %61 : vector<8x8xf32>
    %63 = tpu.transpose %53, [1, 0] : vector<8x8xf32> -> vector<8x8xf32>
    %cst_44 = arith.constant dense<0.000000e+00> : vector<8x8xf32>
    %64 = tpu.matmul %62, %63, %cst_44 {dimension_numbers = #tpu.dot_dimension_numbers<[1], [0], [0], [1], [0, 0, 1, 1], [], []>} : vector<8x8xf32>, vector<8x8xf32>, vector<8x8xf32> -> vector<8x8xf32>
    %cst_45 = arith.constant -1.000000e+32 : f32
    %65 = vector.broadcast %cst_45 : f32 to vector<8x8xf32>
    %66 = arith.select %6, %64, %65 : vector<8x8xi1>, vector<8x8xf32>
    %cst_46 = arith.constant dense<0xFF800000> : vector<8xf32>
    %67 = vector.multi_reduction <maximumf>, %66, %cst_46 [1] : vector<8x8xf32> to vector<8xf32>
    %68 = vector.shape_cast %67 : vector<8xf32> to vector<8x1xf32>
    %69 = vector.broadcast %68 : vector<8x1xf32> to vector<8x8xf32>
    %70 = arith.subf %66, %69 : vector<8x8xf32>
    %71 = math.exp %70 : vector<8x8xf32>
    %cst_47 = arith.constant dense<0.000000e+00> : vector<8xf32>
    %72 = vector.multi_reduction <add>, %71, %cst_47 [1] : vector<8x8xf32> to vector<8xf32>
    %73 = vector.shape_cast %72 : vector<8xf32> to vector<8x1xf32>
    %74 = tpu.reciprocal %73 {approx = true} : vector<8x1xf32> -> vector<8x1xf32>
    %75 = vector.broadcast %74 : vector<8x1xf32> to vector<8x8xf32>
    %76 = arith.mulf %71, %75 : vector<8x8xf32>
    %c0_i32_48 = arith.constant 0 : i32
    %77 = vector.broadcast %c0_i32_48 : i32 to vector<8x8xi32>
    %78 = arith.cmpi eq, %4, %77 : vector<8x8xi32>
    %cst_49 = arith.constant 0.000000e+00 : f32
    %79 = vector.broadcast %cst_49 : f32 to vector<8x8xf32>
    %80 = arith.select %78, %79, %76 : vector<8x8xi1>, vector<8x8xf32>
    %cst_50 = arith.constant dense<0.000000e+00> : vector<8x8xf32>
    %81 = tpu.matmul %80, %60, %cst_50 {dimension_numbers = #tpu.dot_dimension_numbers<[1], [0], [0], [1], [0, 0, 1, 1], [], []>} : vector<8x8xf32>, vector<8x8xf32>, vector<8x8xf32> -> vector<8x8xf32>
    %c1_51 = arith.constant 1 : index
    %c0_52 = arith.constant 0 : index
    %c0_53 = arith.constant 0 : index
    %82 = vector.load %arg7[%c1_51, %c0_52, %c0_53] : memref<4x8x32xf32, #tpu.memory_space<vmem>>, vector<1x8x32xf32>
    %83 = vector.shape_cast %82 : vector<1x8x32xf32> to vector<8x32xf32>
    %cst_54 = arith.constant dense<0.000000e+00> : vector<8x32xf32>
    %84 = tpu.matmul %81, %83, %cst_54 {dimension_numbers = #tpu.dot_dimension_numbers<[1], [0], [0], [1], [0, 0, 1, 1], [], []>} : vector<8x8xf32>, vector<8x32xf32>, vector<8x32xf32> -> vector<8x32xf32>
    %85 = arith.addf %46, %84 : vector<8x32xf32>
    %c2 = arith.constant 2 : index
    %c0_55 = arith.constant 0 : index
    %c0_56 = arith.constant 0 : index
    %86 = vector.load %arg3[%c2, %c0_55, %c0_56] : memref<4x32x8xf32, #tpu.memory_space<vmem>>, vector<1x32x8xf32>
    %87 = vector.shape_cast %86 : vector<1x32x8xf32> to vector<32x8xf32>
    %cst_57 = arith.constant dense<0.000000e+00> : vector<8x8xf32>
    %88 = tpu.matmul %1, %87, %cst_57 {dimension_numbers = #tpu.dot_dimension_numbers<[1], [0], [0], [1], [0, 0, 1, 1], [], []>} : vector<8x32xf32>, vector<32x8xf32>, vector<8x8xf32> -> vector<8x8xf32>
    %c2_58 = arith.constant 2 : index
    %c0_59 = arith.constant 0 : index
    %c0_60 = arith.constant 0 : index
    %89 = vector.load %arg4[%c2_58, %c0_59, %c0_60] : memref<4x1x8xf32, #tpu.memory_space<vmem>>, vector<1x1x8xf32>
    %90 = vector.shape_cast %89 : vector<1x1x8xf32> to vector<1x8xf32>
    %91 = vector.broadcast %90 : vector<1x8xf32> to vector<8x8xf32>
    %92 = arith.addf %88, %91 : vector<8x8xf32>
    %c2_61 = arith.constant 2 : index
    %c0_62 = arith.constant 0 : index
    %c0_63 = arith.constant 0 : index
    %93 = vector.load %arg5[%c2_61, %c0_62, %c0_63] : memref<4x32x8xf32, #tpu.memory_space<vmem>>, vector<1x32x8xf32>
    %94 = vector.shape_cast %93 : vector<1x32x8xf32> to vector<32x8xf32>
    %cst_64 = arith.constant dense<0.000000e+00> : vector<8x8xf32>
    %95 = tpu.matmul %3, %94, %cst_64 {dimension_numbers = #tpu.dot_dimension_numbers<[1], [0], [0], [1], [0, 0, 1, 1], [], []>} : vector<8x32xf32>, vector<32x8xf32>, vector<8x8xf32> -> vector<8x8xf32>
    %c2_65 = arith.constant 2 : index
    %c0_66 = arith.constant 0 : index
    %c0_67 = arith.constant 0 : index
    %96 = vector.load %arg6[%c2_65, %c0_66, %c0_67] : memref<4x1x8xf32, #tpu.memory_space<vmem>>, vector<1x1x8xf32>
    %97 = vector.shape_cast %96 : vector<1x1x8xf32> to vector<1x8xf32>
    %98 = vector.broadcast %97 : vector<1x8xf32> to vector<8x8xf32>
    %99 = arith.addf %95, %98 : vector<8x8xf32>
    %cst_68 = arith.constant 0.353553385 : f32
    %100 = vector.broadcast %cst_68 : f32 to vector<8x8xf32>
    %101 = arith.mulf %92, %100 : vector<8x8xf32>
    %102 = tpu.transpose %92, [1, 0] : vector<8x8xf32> -> vector<8x8xf32>
    %cst_69 = arith.constant dense<0.000000e+00> : vector<8x8xf32>
    %103 = tpu.matmul %101, %102, %cst_69 {dimension_numbers = #tpu.dot_dimension_numbers<[1], [0], [0], [1], [0, 0, 1, 1], [], []>} : vector<8x8xf32>, vector<8x8xf32>, vector<8x8xf32> -> vector<8x8xf32>
    %cst_70 = arith.constant -1.000000e+32 : f32
    %104 = vector.broadcast %cst_70 : f32 to vector<8x8xf32>
    %105 = arith.select %6, %103, %104 : vector<8x8xi1>, vector<8x8xf32>
    %cst_71 = arith.constant dense<0xFF800000> : vector<8xf32>
    %106 = vector.multi_reduction <maximumf>, %105, %cst_71 [1] : vector<8x8xf32> to vector<8xf32>
    %107 = vector.shape_cast %106 : vector<8xf32> to vector<8x1xf32>
    %108 = vector.broadcast %107 : vector<8x1xf32> to vector<8x8xf32>
    %109 = arith.subf %105, %108 : vector<8x8xf32>
    %110 = math.exp %109 : vector<8x8xf32>
    %cst_72 = arith.constant dense<0.000000e+00> : vector<8xf32>
    %111 = vector.multi_reduction <add>, %110, %cst_72 [1] : vector<8x8xf32> to vector<8xf32>
    %112 = vector.shape_cast %111 : vector<8xf32> to vector<8x1xf32>
    %113 = tpu.reciprocal %112 {approx = true} : vector<8x1xf32> -> vector<8x1xf32>
    %114 = vector.broadcast %113 : vector<8x1xf32> to vector<8x8xf32>
    %115 = arith.mulf %110, %114 : vector<8x8xf32>
    %c0_i32_73 = arith.constant 0 : i32
    %116 = vector.broadcast %c0_i32_73 : i32 to vector<8x8xi32>
    %117 = arith.cmpi eq, %4, %116 : vector<8x8xi32>
    %cst_74 = arith.constant 0.000000e+00 : f32
    %118 = vector.broadcast %cst_74 : f32 to vector<8x8xf32>
    %119 = arith.select %117, %118, %115 : vector<8x8xi1>, vector<8x8xf32>
    %cst_75 = arith.constant dense<0.000000e+00> : vector<8x8xf32>
    %120 = tpu.matmul %119, %99, %cst_75 {dimension_numbers = #tpu.dot_dimension_numbers<[1], [0], [0], [1], [0, 0, 1, 1], [], []>} : vector<8x8xf32>, vector<8x8xf32>, vector<8x8xf32> -> vector<8x8xf32>
    %c2_76 = arith.constant 2 : index
    %c0_77 = arith.constant 0 : index
    %c0_78 = arith.constant 0 : index
    %121 = vector.load %arg7[%c2_76, %c0_77, %c0_78] : memref<4x8x32xf32, #tpu.memory_space<vmem>>, vector<1x8x32xf32>
    %122 = vector.shape_cast %121 : vector<1x8x32xf32> to vector<8x32xf32>
    %cst_79 = arith.constant dense<0.000000e+00> : vector<8x32xf32>
    %123 = tpu.matmul %120, %122, %cst_79 {dimension_numbers = #tpu.dot_dimension_numbers<[1], [0], [0], [1], [0, 0, 1, 1], [], []>} : vector<8x8xf32>, vector<8x32xf32>, vector<8x32xf32> -> vector<8x32xf32>
    %124 = arith.addf %85, %123 : vector<8x32xf32>
    %c3 = arith.constant 3 : index
    %c0_80 = arith.constant 0 : index
    %c0_81 = arith.constant 0 : index
    %125 = vector.load %arg3[%c3, %c0_80, %c0_81] : memref<4x32x8xf32, #tpu.memory_space<vmem>>, vector<1x32x8xf32>
    %126 = vector.shape_cast %125 : vector<1x32x8xf32> to vector<32x8xf32>
    %cst_82 = arith.constant dense<0.000000e+00> : vector<8x8xf32>
    %127 = tpu.matmul %1, %126, %cst_82 {dimension_numbers = #tpu.dot_dimension_numbers<[1], [0], [0], [1], [0, 0, 1, 1], [], []>} : vector<8x32xf32>, vector<32x8xf32>, vector<8x8xf32> -> vector<8x8xf32>
    %c3_83 = arith.constant 3 : index
    %c0_84 = arith.constant 0 : index
    %c0_85 = arith.constant 0 : index
    %128 = vector.load %arg4[%c3_83, %c0_84, %c0_85] : memref<4x1x8xf32, #tpu.memory_space<vmem>>, vector<1x1x8xf32>
    %129 = vector.shape_cast %128 : vector<1x1x8xf32> to vector<1x8xf32>
    %130 = vector.broadcast %129 : vector<1x8xf32> to vector<8x8xf32>
    %131 = arith.addf %127, %130 : vector<8x8xf32>
    %c3_86 = arith.constant 3 : index
    %c0_87 = arith.constant 0 : index
    %c0_88 = arith.constant 0 : index
    %132 = vector.load %arg5[%c3_86, %c0_87, %c0_88] : memref<4x32x8xf32, #tpu.memory_space<vmem>>, vector<1x32x8xf32>
    %133 = vector.shape_cast %132 : vector<1x32x8xf32> to vector<32x8xf32>
    %cst_89 = arith.constant dense<0.000000e+00> : vector<8x8xf32>
    %134 = tpu.matmul %3, %133, %cst_89 {dimension_numbers = #tpu.dot_dimension_numbers<[1], [0], [0], [1], [0, 0, 1, 1], [], []>} : vector<8x32xf32>, vector<32x8xf32>, vector<8x8xf32> -> vector<8x8xf32>
    %c3_90 = arith.constant 3 : index
    %c0_91 = arith.constant 0 : index
    %c0_92 = arith.constant 0 : index
    %135 = vector.load %arg6[%c3_90, %c0_91, %c0_92] : memref<4x1x8xf32, #tpu.memory_space<vmem>>, vector<1x1x8xf32>
    %136 = vector.shape_cast %135 : vector<1x1x8xf32> to vector<1x8xf32>
    %137 = vector.broadcast %136 : vector<1x8xf32> to vector<8x8xf32>
    %138 = arith.addf %134, %137 : vector<8x8xf32>
    %cst_93 = arith.constant 0.353553385 : f32
    %139 = vector.broadcast %cst_93 : f32 to vector<8x8xf32>
    %140 = arith.mulf %131, %139 : vector<8x8xf32>
    %141 = tpu.transpose %131, [1, 0] : vector<8x8xf32> -> vector<8x8xf32>
    %cst_94 = arith.constant dense<0.000000e+00> : vector<8x8xf32>
    %142 = tpu.matmul %140, %141, %cst_94 {dimension_numbers = #tpu.dot_dimension_numbers<[1], [0], [0], [1], [0, 0, 1, 1], [], []>} : vector<8x8xf32>, vector<8x8xf32>, vector<8x8xf32> -> vector<8x8xf32>
    %cst_95 = arith.constant -1.000000e+32 : f32
    %143 = vector.broadcast %cst_95 : f32 to vector<8x8xf32>
    %144 = arith.select %6, %142, %143 : vector<8x8xi1>, vector<8x8xf32>
    %cst_96 = arith.constant dense<0xFF800000> : vector<8xf32>
    %145 = vector.multi_reduction <maximumf>, %144, %cst_96 [1] : vector<8x8xf32> to vector<8xf32>
    %146 = vector.shape_cast %145 : vector<8xf32> to vector<8x1xf32>
    %147 = vector.broadcast %146 : vector<8x1xf32> to vector<8x8xf32>
    %148 = arith.subf %144, %147 : vector<8x8xf32>
    %149 = math.exp %148 : vector<8x8xf32>
    %cst_97 = arith.constant dense<0.000000e+00> : vector<8xf32>
    %150 = vector.multi_reduction <add>, %149, %cst_97 [1] : vector<8x8xf32> to vector<8xf32>
    %151 = vector.shape_cast %150 : vector<8xf32> to vector<8x1xf32>
    %152 = tpu.reciprocal %151 {approx = true} : vector<8x1xf32> -> vector<8x1xf32>
    %153 = vector.broadcast %152 : vector<8x1xf32> to vector<8x8xf32>
    %154 = arith.mulf %149, %153 : vector<8x8xf32>
    %c0_i32_98 = arith.constant 0 : i32
    %155 = vector.broadcast %c0_i32_98 : i32 to vector<8x8xi32>
    %156 = arith.cmpi eq, %4, %155 : vector<8x8xi32>
    %cst_99 = arith.constant 0.000000e+00 : f32
    %157 = vector.broadcast %cst_99 : f32 to vector<8x8xf32>
    %158 = arith.select %156, %157, %154 : vector<8x8xi1>, vector<8x8xf32>
    %cst_100 = arith.constant dense<0.000000e+00> : vector<8x8xf32>
    %159 = tpu.matmul %158, %138, %cst_100 {dimension_numbers = #tpu.dot_dimension_numbers<[1], [0], [0], [1], [0, 0, 1, 1], [], []>} : vector<8x8xf32>, vector<8x8xf32>, vector<8x8xf32> -> vector<8x8xf32>
    %c3_101 = arith.constant 3 : index
    %c0_102 = arith.constant 0 : index
    %c0_103 = arith.constant 0 : index
    %160 = vector.load %arg7[%c3_101, %c0_102, %c0_103] : memref<4x8x32xf32, #tpu.memory_space<vmem>>, vector<1x8x32xf32>
    %161 = vector.shape_cast %160 : vector<1x8x32xf32> to vector<8x32xf32>
    %cst_104 = arith.constant dense<0.000000e+00> : vector<8x32xf32>
    %162 = tpu.matmul %159, %161, %cst_104 {dimension_numbers = #tpu.dot_dimension_numbers<[1], [0], [0], [1], [0, 0, 1, 1], [], []>} : vector<8x8xf32>, vector<8x32xf32>, vector<8x32xf32> -> vector<8x32xf32>
    %163 = arith.addf %124, %162 : vector<8x32xf32>
    %c0_105 = arith.constant 0 : index
    %c0_106 = arith.constant 0 : index
    %164 = vector.load %arg8[%c0_105, %c0_106] : memref<1x32xf32, #tpu.memory_space<vmem>>, vector<1x32xf32>
    %165 = vector.broadcast %164 : vector<1x32xf32> to vector<8x32xf32>
    %166 = arith.addf %163, %165 : vector<8x32xf32>
    %167 = arith.addf %1, %166 : vector<8x32xf32>
    %cst_107 = arith.constant dense<0.000000e+00> : vector<8xf32>
    %168 = vector.multi_reduction <add>, %167, %cst_107 [1] : vector<8x32xf32> to vector<8xf32>
    %169 = vector.shape_cast %168 : vector<8xf32> to vector<8x1xf32>
    %cst_108 = arith.constant 3.200000e+01 : f32
    %170 = vector.broadcast %cst_108 : f32 to vector<8x1xf32>
    %171 = arith.divf %169, %170 : vector<8x1xf32>
    %172 = vector.broadcast %171 : vector<8x1xf32> to vector<8x32xf32>
    %173 = arith.subf %167, %172 : vector<8x32xf32>
    %174 = arith.mulf %173, %173 : vector<8x32xf32>
    %cst_109 = arith.constant dense<0.000000e+00> : vector<8xf32>
    %175 = vector.multi_reduction <add>, %174, %cst_109 [1] : vector<8x32xf32> to vector<8xf32>
    %176 = vector.shape_cast %175 : vector<8xf32> to vector<8x1xf32>
    %cst_110 = arith.constant 3.200000e+01 : f32
    %177 = vector.broadcast %cst_110 : f32 to vector<8x1xf32>
    %178 = arith.divf %176, %177 : vector<8x1xf32>
    %179 = vector.broadcast %171 : vector<8x1xf32> to vector<8x32xf32>
    %180 = arith.subf %167, %179 : vector<8x32xf32>
    %cst_111 = arith.constant 9.99999974E-6 : f32
    %181 = vector.broadcast %cst_111 : f32 to vector<8x1xf32>
    %182 = arith.addf %178, %181 : vector<8x1xf32>
    %183 = math.rsqrt %182 : vector<8x1xf32>
    %184 = vector.broadcast %183 : vector<8x1xf32> to vector<8x32xf32>
    %185 = arith.mulf %180, %184 : vector<8x32xf32>
    %c0_112 = arith.constant 0 : index
    %c0_113 = arith.constant 0 : index
    %186 = vector.load %arg9[%c0_112, %c0_113] : memref<1x32xf32, #tpu.memory_space<vmem>>, vector<1x32xf32>
    %187 = vector.broadcast %186 : vector<1x32xf32> to vector<8x32xf32>
    %188 = arith.mulf %185, %187 : vector<8x32xf32>
    %c0_114 = arith.constant 0 : index
    %c0_115 = arith.constant 0 : index
    %189 = vector.load %arg10[%c0_114, %c0_115] : memref<1x32xf32, #tpu.memory_space<vmem>>, vector<1x32xf32>
    %190 = vector.broadcast %189 : vector<1x32xf32> to vector<8x32xf32>
    %191 = arith.addf %188, %190 : vector<8x32xf32>
    %c0_116 = arith.constant 0 : index
    %c0_117 = arith.constant 0 : index
    %192 = vector.load %arg11[%c0_116, %c0_117] : memref<32x64xf32, #tpu.memory_space<vmem>>, vector<32x64xf32>
    %cst_118 = arith.constant dense<0.000000e+00> : vector<8x64xf32>
    %193 = tpu.matmul %191, %192, %cst_118 {dimension_numbers = #tpu.dot_dimension_numbers<[1], [0], [0], [1], [0, 0, 1, 1], [], []>} : vector<8x32xf32>, vector<32x64xf32>, vector<8x64xf32> -> vector<8x64xf32>
    %c0_119 = arith.constant 0 : index
    %c0_120 = arith.constant 0 : index
    %194 = vector.load %arg12[%c0_119, %c0_120] : memref<1x64xf32, #tpu.memory_space<vmem>>, vector<1x64xf32>
    %195 = vector.broadcast %194 : vector<1x64xf32> to vector<8x64xf32>
    %196 = arith.addf %193, %195 : vector<8x64xf32>
    %cst_121 = arith.constant 0.000000e+00 : f32
    %197 = vector.broadcast %cst_121 : f32 to vector<8x64xf32>
    %198 = arith.maximumf %196, %197 : vector<8x64xf32>
    %c0_122 = arith.constant 0 : index
    %c0_123 = arith.constant 0 : index
    %199 = vector.load %arg13[%c0_122, %c0_123] : memref<64x32xf32, #tpu.memory_space<vmem>>, vector<64x32xf32>
    %cst_124 = arith.constant dense<0.000000e+00> : vector<8x32xf32>
    %200 = tpu.matmul %198, %199, %cst_124 {dimension_numbers = #tpu.dot_dimension_numbers<[1], [0], [0], [1], [0, 0, 1, 1], [], []>} : vector<8x64xf32>, vector<64x32xf32>, vector<8x32xf32> -> vector<8x32xf32>
    %c0_125 = arith.constant 0 : index
    %c0_126 = arith.constant 0 : index
    %201 = vector.load %arg14[%c0_125, %c0_126] : memref<1x32xf32, #tpu.memory_space<vmem>>, vector<1x32xf32>
    %202 = vector.broadcast %201 : vector<1x32xf32> to vector<8x32xf32>
    %203 = arith.addf %200, %202 : vector<8x32xf32>
    %204 = arith.addf %191, %203 : vector<8x32xf32>
    %cst_127 = arith.constant dense<0.000000e+00> : vector<8xf32>
    %205 = vector.multi_reduction <add>, %204, %cst_127 [1] : vector<8x32xf32> to vector<8xf32>
    %206 = vector.shape_cast %205 : vector<8xf32> to vector<8x1xf32>
    %cst_128 = arith.constant 3.200000e+01 : f32
    %207 = vector.broadcast %cst_128 : f32 to vector<8x1xf32>
    %208 = arith.divf %206, %207 : vector<8x1xf32>
    %209 = vector.broadcast %208 : vector<8x1xf32> to vector<8x32xf32>
    %210 = arith.subf %204, %209 : vector<8x32xf32>
    %211 = arith.mulf %210, %210 : vector<8x32xf32>
    %cst_129 = arith.constant dense<0.000000e+00> : vector<8xf32>
    %212 = vector.multi_reduction <add>, %211, %cst_129 [1] : vector<8x32xf32> to vector<8xf32>
    %213 = vector.shape_cast %212 : vector<8xf32> to vector<8x1xf32>
    %cst_130 = arith.constant 3.200000e+01 : f32
    %214 = vector.broadcast %cst_130 : f32 to vector<8x1xf32>
    %215 = arith.divf %213, %214 : vector<8x1xf32>
    %216 = vector.broadcast %208 : vector<8x1xf32> to vector<8x32xf32>
    %217 = arith.subf %204, %216 : vector<8x32xf32>
    %cst_131 = arith.constant 9.99999974E-6 : f32
    %218 = vector.broadcast %cst_131 : f32 to vector<8x1xf32>
    %219 = arith.addf %215, %218 : vector<8x1xf32>
    %220 = math.rsqrt %219 : vector<8x1xf32>
    %221 = vector.broadcast %220 : vector<8x1xf32> to vector<8x32xf32>
    %222 = arith.mulf %217, %221 : vector<8x32xf32>
    %c0_132 = arith.constant 0 : index
    %c0_133 = arith.constant 0 : index
    %223 = vector.load %arg15[%c0_132, %c0_133] : memref<1x32xf32, #tpu.memory_space<vmem>>, vector<1x32xf32>
    %224 = vector.broadcast %223 : vector<1x32xf32> to vector<8x32xf32>
    %225 = arith.mulf %222, %224 : vector<8x32xf32>
    %c0_134 = arith.constant 0 : index
    %c0_135 = arith.constant 0 : index
    %226 = vector.load %arg16[%c0_134, %c0_135] : memref<1x32xf32, #tpu.memory_space<vmem>>, vector<1x32xf32>
    %227 = vector.broadcast %226 : vector<1x32xf32> to vector<8x32xf32>
    %228 = arith.addf %225, %227 : vector<8x32xf32>
    %c0_136 = arith.constant 0 : index
    %c0_137 = arith.constant 0 : index
    %c0_138 = arith.constant 0 : index
    %229 = vector.load %arg17[%c0_136, %c0_137, %c0_138] : memref<1x8x32xf32, #tpu.memory_space<vmem>>, vector<1x8x32xf32>
    %230 = vector.shape_cast %229 : vector<1x8x32xf32> to vector<8x32xf32>
    %231 = vector.shape_cast %228 : vector<8x32xf32> to vector<1x8x32xf32>
    tpu.vector_store %arg17[%c0_136, %c0_137, %c0_138], %231 {strides = array<i32>} : memref<1x8x32xf32, #tpu.memory_space<vmem>>, vector<1x8x32xf32>,
    return
  }
  func.func @transform_0(%arg0: i32) -> (i32, i32, i32) {
    %c0_i32 = arith.constant 0 : i32
    %c0_i32_0 = arith.constant 0 : i32
    %c0_i32_1 = arith.constant 0 : i32
    return %arg0, %c0_i32, %c0_i32_0 : i32, i32, i32
  }
  func.func @transform_1(%arg0: i32) -> (i32, i32, i32) {
    %c0_i32 = arith.constant 0 : i32
    %c0_i32_0 = arith.constant 0 : i32
    %c0_i32_1 = arith.constant 0 : i32
    return %arg0, %c0_i32, %c0_i32_0 : i32, i32, i32
  }
  func.func @transform_2(%arg0: i32) -> (i32, i32, i32) {
    %c0_i32 = arith.constant 0 : i32
    %c0_i32_0 = arith.constant 0 : i32
    %c0_i32_1 = arith.constant 0 : i32
    %c0_i32_2 = arith.constant 0 : i32
    return %c0_i32, %c0_i32_0, %c0_i32_1 : i32, i32, i32
  }
  func.func @transform_3(%arg0: i32) -> (i32, i32, i32) {
    %c0_i32 = arith.constant 0 : i32
    %c0_i32_0 = arith.constant 0 : i32
    %c0_i32_1 = arith.constant 0 : i32
    %c0_i32_2 = arith.constant 0 : i32
    return %c0_i32, %c0_i32_0, %c0_i32_1 : i32, i32, i32
  }
  func.func @transform_4(%arg0: i32) -> (i32, i32, i32) {
    %c0_i32 = arith.constant 0 : i32
    %c0_i32_0 = arith.constant 0 : i32
    %c0_i32_1 = arith.constant 0 : i32
    %c0_i32_2 = arith.constant 0 : i32
    return %c0_i32, %c0_i32_0, %c0_i32_1 : i32, i32, i32
  }
  func.func @transform_5(%arg0: i32) -> (i32, i32, i32) {
    %c0_i32 = arith.constant 0 : i32
    %c0_i32_0 = arith.constant 0 : i32
    %c0_i32_1 = arith.constant 0 : i32
    %c0_i32_2 = arith.constant 0 : i32
    return %c0_i32, %c0_i32_0, %c0_i32_1 : i32, i32, i32
  }
  func.func @transform_6(%arg0: i32) -> (i32, i32, i32) {
    %c0_i32 = arith.constant 0 : i32
    %c0_i32_0 = arith.constant 0 : i32
    %c0_i32_1 = arith.constant 0 : i32
    %c0_i32_2 = arith.constant 0 : i32
    return %c0_i32, %c0_i32_0, %c0_i32_1 : i32, i32, i32
  }
  func.func @transform_7(%arg0: i32) -> (i32, i32) {
    %c0_i32 = arith.constant 0 : i32
    %c0_i32_0 = arith.constant 0 : i32
    %c0_i32_1 = arith.constant 0 : i32
    return %c0_i32, %c0_i32_0 : i32, i32
  }
  func.func @transform_8(%arg0: i32) -> (i32, i32) {
    %c0_i32 = arith.constant 0 : i32
    %c0_i32_0 = arith.constant 0 : i32
    %c0_i32_1 = arith.constant 0 : i32
    return %c0_i32, %c0_i32_0 : i32, i32
  }
  func.func @transform_9(%arg0: i32) -> (i32, i32) {
    %c0_i32 = arith.constant 0 : i32
    %c0_i32_0 = arith.constant 0 : i32
    %c0_i32_1 = arith.constant 0 : i32
    return %c0_i32, %c0_i32_0 : i32, i32
  }
  func.func @transform_10(%arg0: i32) -> (i32, i32) {
    %c0_i32 = arith.constant 0 : i32
    %c0_i32_0 = arith.constant 0 : i32
    %c0_i32_1 = arith.constant 0 : i32
    return %c0_i32, %c0_i32_0 : i32, i32
  }
  func.func @transform_11(%arg0: i32) -> (i32, i32) {
    %c0_i32 = arith.constant 0 : i32
    %c0_i32_0 = arith.constant 0 : i32
    %c0_i32_1 = arith.constant 0 : i32
    return %c0_i32, %c0_i32_0 : i32, i32
  }
  func.func @transform_12(%arg0: i32) -> (i32, i32) {
    %c0_i32 = arith.constant 0 : i32
    %c0_i32_0 = arith.constant 0 : i32
    %c0_i32_1 = arith.constant 0 : i32
    return %c0_i32, %c0_i32_0 : i32, i32
  }
  func.func @transform_13(%arg0: i32) -> (i32, i32) {
    %c0_i32 = arith.constant 0 : i32
    %c0_i32_0 = arith.constant 0 : i32
    %c0_i32_1 = arith.constant 0 : i32
    return %c0_i32, %c0_i32_0 : i32, i32
  }
  func.func @transform_14(%arg0: i32) -> (i32, i32) {
    %c0_i32 = arith.constant 0 : i32
    %c0_i32_0 = arith.constant 0 : i32
    %c0_i32_1 = arith.constant 0 : i32
    return %c0_i32, %c0_i32_0 : i32, i32
  }
  func.func @transform_15(%arg0: i32) -> (i32, i32) {
    %c0_i32 = arith.constant 0 : i32
    %c0_i32_0 = arith.constant 0 : i32
    %c0_i32_1 = arith.constant 0 : i32
    return %c0_i32, %c0_i32_0 : i32, i32
  }
  func.func @transform_16(%arg0: i32) -> (i32, i32, i32) {
    %c0_i32 = arith.constant 0 : i32
    %c0_i32_0 = arith.constant 0 : i32
    %c0_i32_1 = arith.constant 0 : i32
    return %arg0, %c0_i32, %c0_i32_0 : i32, i32, i32
  }
}

module attributes {stable_mosaic.version = 11 : i64} {
  func.func @_transformer_layer_kernel(%arg0: i32, %arg1: memref<1x8x32xf32, #tpu.memory_space<vmem>>, %arg2: memref<1x8x32xf32, #tpu.memory_space<vmem>>, %arg3: memref<4x32x8xf32, #tpu.memory_space<vmem>>, %arg4: memref<4x1x8xf32, #tpu.memory_space<vmem>>, %arg5: memref<4x32x8xf32, #tpu.memory_space<vmem>>, %arg6: memref<4x1x8xf32, #tpu.memory_space<vmem>>, %arg7: memref<4x8x32xf32, #tpu.memory_space<vmem>>, %arg8: memref<1x32xf32, #tpu.memory_space<vmem>>, %arg9: memref<1x32xf32, #tpu.memory_space<vmem>>, %arg10: memref<1x32xf32, #tpu.memory_space<vmem>>, %arg11: memref<32x64xf32, #tpu.memory_space<vmem>>, %arg12: memref<1x64xf32, #tpu.memory_space<vmem>>, %arg13: memref<64x32xf32, #tpu.memory_space<vmem>>, %arg14: memref<1x32xf32, #tpu.memory_space<vmem>>, %arg15: memref<1x32xf32, #tpu.memory_space<vmem>>, %arg16: memref<1x32xf32, #tpu.memory_space<vmem>>, %arg17: memref<1x8x32xf32, #tpu.memory_space<vmem>>) attributes {dimension_semantics = [#tpu.dimension_semantics<parallel>], iteration_bounds = array<i64: 1>, scalar_prefetch = 0 : i64, scratch_operands = 0 : i64, tpu.core_type = #tpu.core_type<tc>, window_params = [{transform_indices = @transform_0, window_bounds = array<i64: 1, 8, 32>}, {transform_indices = @transform_1, window_bounds = array<i64: 1, 8, 32>}, {pipeline_mode = #tpu.pipeline_mode<synchronous>, transform_indices = @transform_2, window_bounds = array<i64: 4, 32, 8>}, {pipeline_mode = #tpu.pipeline_mode<synchronous>, transform_indices = @transform_3, window_bounds = array<i64: 4, 1, 8>}, {pipeline_mode = #tpu.pipeline_mode<synchronous>, transform_indices = @transform_4, window_bounds = array<i64: 4, 32, 8>}, {pipeline_mode = #tpu.pipeline_mode<synchronous>, transform_indices = @transform_5, window_bounds = array<i64: 4, 1, 8>}, {pipeline_mode = #tpu.pipeline_mode<synchronous>, transform_indices = @transform_6, window_bounds = array<i64: 4, 8, 32>}, {pipeline_mode = #tpu.pipeline_mode<synchronous>, transform_indices = @transform_7, window_bounds = array<i64: 1, 32>}, {pipeline_mode = #tpu.pipeline_mode<synchronous>, transform_indices = @transform_8, window_bounds = array<i64: 1, 32>}, {pipeline_mode = #tpu.pipeline_mode<synchronous>, transform_indices = @transform_9, window_bounds = array<i64: 1, 32>}, {pipeline_mode = #tpu.pipeline_mode<synchronous>, transform_indices = @transform_10, window_bounds = array<i64: 32, 64>}, {pipeline_mode = #tpu.pipeline_mode<synchronous>, transform_indices = @transform_11, window_bounds = array<i64: 1, 64>}, {pipeline_mode = #tpu.pipeline_mode<synchronous>, transform_indices = @transform_12, window_bounds = array<i64: 64, 32>}, {pipeline_mode = #tpu.pipeline_mode<synchronous>, transform_indices = @transform_13, window_bounds = array<i64: 1, 32>}, {pipeline_mode = #tpu.pipeline_mode<synchronous>, transform_indices = @transform_14, window_bounds = array<i64: 1, 32>}, {pipeline_mode = #tpu.pipeline_mode<synchronous>, transform_indices = @transform_15, window_bounds = array<i64: 1, 32>}, {transform_indices = @transform_16, window_bounds = array<i64: 1, 8, 32>}]} {
    %c0 = arith.constant 0 : index
    %c0_0 = arith.constant 0 : index
    %c0_1 = arith.constant 0 : index
    %0 = vector.load %arg1[%c0, %c0_0, %c0_1] : memref<1x8x32xf32, #tpu.memory_space<vmem>>, vector<1x8x32xf32>
    %1 = vector.shape_cast %0 : vector<1x8x32xf32> to vector<8x32xf32>
    %c0_2 = arith.constant 0 : index
    %c0_3 = arith.constant 0 : index
    %c0_4 = arith.constant 0 : index
    %2 = vector.load %arg2[%c0_2, %c0_3, %c0_4] : memref<1x8x32xf32, #tpu.memory_space<vmem>>, vector<1x8x32xf32>
    %3 = vector.shape_cast %2 : vector<1x8x32xf32> to vector<8x32xf32>
    %4 = tpu.iota {dimensions = array<i32: 0>} : vector<8x8xi32>
    %5 = tpu.iota {dimensions = array<i32: 1>} : vector<8x8xi32>
    %6 = arith.cmpi slt, %5, %4 : vector<8x8xi32>
    %cst = arith.constant 0.000000e+00 : f32
    %7 = vector.broadcast %cst : f32 to vector<8x32xf32>
    %c0_5 = arith.constant 0 : index
    %c0_6 = arith.constant 0 : index
    %c0_7 = arith.constant 0 : index
    %8 = vector.load %arg3[%c0_5, %c0_6, %c0_7] : memref<4x32x8xf32, #tpu.memory_space<vmem>>, vector<1x32x8xf32>
    %9 = vector.shape_cast %8 : vector<1x32x8xf32> to vector<32x8xf32>
    %cst_8 = arith.constant dense<0.000000e+00> : vector<8x8xf32>
    %10 = tpu.matmul %1, %9, %cst_8 {dimension_numbers = #tpu.dot_dimension_numbers<[1], [0], [0], [1], [0, 0, 1, 1], [], []>} : vector<8x32xf32>, vector<32x8xf32>, vector<8x8xf32> -> vector<8x8xf32>
    %c0_9 = arith.constant 0 : index
    %c0_10 = arith.constant 0 : index
    %c0_11 = arith.constant 0 : index
    %11 = vector.load %arg4[%c0_9, %c0_10, %c0_11] : memref<4x1x8xf32, #tpu.memory_space<vmem>>, vector<1x1x8xf32>
    %12 = vector.shape_cast %11 : vector<1x1x8xf32> to vector<1x8xf32>
    %13 = vector.broadcast %12 : vector<1x8xf32> to vector<8x8xf32>
    %14 = arith.addf %10, %13 : vector<8x8xf32>
    %c0_12 = arith.constant 0 : index
    %c0_13 = arith.constant 0 : index
    %c0_14 = arith.constant 0 : index
    %15 = vector.load %arg5[%c0_12, %c0_13, %c0_14] : memref<4x32x8xf32, #tpu.memory_space<vmem>>, vector<1x32x8xf32>
    %16 = vector.shape_cast %15 : vector<1x32x8xf32> to vector<32x8xf32>
    %cst_15 = arith.constant dense<0.000000e+00> : vector<8x8xf32>
    %17 = tpu.matmul %3, %16, %cst_15 {dimension_numbers = #tpu.dot_dimension_numbers<[1], [0], [0], [1], [0, 0, 1, 1], [], []>} : vector<8x32xf32>, vector<32x8xf32>, vector<8x8xf32> -> vector<8x8xf32>
    %c0_16 = arith.constant 0 : index
    %c0_17 = arith.constant 0 : index
    %c0_18 = arith.constant 0 : index
    %18 = vector.load %arg6[%c0_16, %c0_17, %c0_18] : memref<4x1x8xf32, #tpu.memory_space<vmem>>, vector<1x1x8xf32>
    %19 = vector.shape_cast %18 : vector<1x1x8xf32> to vector<1x8xf32>
    %20 = vector.broadcast %19 : vector<1x8xf32> to vector<8x8xf32>
    %21 = arith.addf %17, %20 : vector<8x8xf32>
    %cst_19 = arith.constant 0.353553385 : f32
    %22 = vector.broadcast %cst_19 : f32 to vector<8x8xf32>
    %23 = arith.mulf %14, %22 : vector<8x8xf32>
    %24 = tpu.transpose %14, [1, 0] : vector<8x8xf32> -> vector<8x8xf32>
    %cst_20 = arith.constant dense<0.000000e+00> : vector<8x8xf32>
    %25 = tpu.matmul %23, %24, %cst_20 {dimension_numbers = #tpu.dot_dimension_numbers<[1], [0], [0], [1], [0, 0, 1, 1], [], []>} : vector<8x8xf32>, vector<8x8xf32>, vector<8x8xf32> -> vector<8x8xf32>
    %cst_21 = arith.constant -1.000000e+32 : f32
    %26 = vector.broadcast %cst_21 : f32 to vector<8x8xf32>
    %27 = arith.select %6, %25, %26 : vector<8x8xi1>, vector<8x8xf32>
    %cst_22 = arith.constant dense<0xFF800000> : vector<8xf32>
    %28 = vector.multi_reduction <maximumf>, %27, %cst_22 [1] : vector<8x8xf32> to vector<8xf32>
    %29 = vector.shape_cast %28 : vector<8xf32> to vector<8x1xf32>
    %30 = vector.broadcast %29 : vector<8x1xf32> to vector<8x8xf32>
    %31 = arith.subf %27, %30 : vector<8x8xf32>
    %32 = math.exp %31 : vector<8x8xf32>
    %cst_23 = arith.constant dense<0.000000e+00> : vector<8xf32>
    %33 = vector.multi_reduction <add>, %32, %cst_23 [1] : vector<8x8xf32> to vector<8xf32>
    %34 = vector.shape_cast %33 : vector<8xf32> to vector<8x1xf32>
    %35 = tpu.reciprocal %34 {approx = true} : vector<8x1xf32> -> vector<8x1xf32>
    %36 = vector.broadcast %35 : vector<8x1xf32> to vector<8x8xf32>
    %37 = arith.mulf %32, %36 : vector<8x8xf32>
    %c0_i32 = arith.constant 0 : i32
    %38 = vector.broadcast %c0_i32 : i32 to vector<8x8xi32>
    %39 = arith.cmpi eq, %4, %38 : vector<8x8xi32>
    %cst_24 = arith.constant 0.000000e+00 : f32
    %40 = vector.broadcast %cst_24 : f32 to vector<8x8xf32>
    %41 = arith.select %39, %40, %37 : vector<8x8xi1>, vector<8x8xf32>
    %cst_25 = arith.constant dense<0.000000e+00> : vector<8x8xf32>
    %42 = tpu.matmul %41, %21, %cst_25 {dimension_numbers = #tpu.dot_dimension_numbers<[1], [0], [0], [1], [0, 0, 1, 1], [], []>} : vector<8x8xf32>, vector<8x8xf32>, vector<8x8xf32> -> vector<8x8xf32>
    %c0_26 = arith.constant 0 : index
    %c0_27 = arith.constant 0 : index
    %c0_28 = arith.constant 0 : index
    %43 = vector.load %arg7[%c0_26, %c0_27, %c0_28] : memref<4x8x32xf32, #tpu.memory_space<vmem>>, vector<1x8x32xf32>
    %44 = vector.shape_cast %43 : vector<1x8x32xf32> to vector<8x32xf32>
    %cst_29 = arith.constant dense<0.000000e+00> : vector<8x32xf32>
    %45 = tpu.matmul %42, %44, %cst_29 {dimension_numbers = #tpu.dot_dimension_numbers<[1], [0], [0], [1], [0, 0, 1, 1], [], []>} : vector<8x8xf32>, vector<8x32xf32>, vector<8x32xf32> -> vector<8x32xf32>
    %46 = arith.addf %7, %45 : vector<8x32xf32>
    %c1 = arith.constant 1 : index
    %c0_30 = arith.constant 0 : index
    %c0_31 = arith.constant 0 : index
    %47 = vector.load %arg3[%c1, %c0_30, %c0_31] : memref<4x32x8xf32, #tpu.memory_space<vmem>>, vector<1x32x8xf32>
    %48 = vector.shape_cast %47 : vector<1x32x8xf32> to vector<32x8xf32>
    %cst_32 = arith.constant dense<0.000000e+00> : vector<8x8xf32>
    %49 = tpu.matmul %1, %48, %cst_32 {dimension_numbers = #tpu.dot_dimension_numbers<[1], [0], [0], [1], [0, 0, 1, 1], [], []>} : vector<8x32xf32>, vector<32x8xf32>, vector<8x8xf32> -> vector<8x8xf32>
    %c1_33 = arith.constant 1 : index
    %c0_34 = arith.constant 0 : index
    %c0_35 = arith.constant 0 : index
    %50 = vector.load %arg4[%c1_33, %c0_34, %c0_35] : memref<4x1x8xf32, #tpu.memory_space<vmem>>, vector<1x1x8xf32>
    %51 = vector.shape_cast %50 : vector<1x1x8xf32> to vector<1x8xf32>
    %52 = vector.broadcast %51 : vector<1x8xf32> to vector<8x8xf32>
    %53 = arith.addf %49, %52 : vector<8x8xf32>
    %c1_36 = arith.constant 1 : index
    %c0_37 = arith.constant 0 : index
    %c0_38 = arith.constant 0 : index
    %54 = vector.load %arg5[%c1_36, %c0_37, %c0_38] : memref<4x32x8xf32, #tpu.memory_space<vmem>>, vector<1x32x8xf32>
    %55 = vector.shape_cast %54 : vector<1x32x8xf32> to vector<32x8xf32>
    %cst_39 = arith.constant dense<0.000000e+00> : vector<8x8xf32>
    %56 = tpu.matmul %3, %55, %cst_39 {dimension_numbers = #tpu.dot_dimension_numbers<[1], [0], [0], [1], [0, 0, 1, 1], [], []>} : vector<8x32xf32>, vector<32x8xf32>, vector<8x8xf32> -> vector<8x8xf32>
    %c1_40 = arith.constant 1 : index
    %c0_41 = arith.constant 0 : index
    %c0_42 = arith.constant 0 : index
    %57 = vector.load %arg6[%c1_40, %c0_41, %c0_42] : memref<4x1x8xf32, #tpu.memory_space<vmem>>, vector<1x1x8xf32>
    %58 = vector.shape_cast %57 : vector<1x1x8xf32> to vector<1x8xf32>
    %59 = vector.broadcast %58 : vector<1x8xf32> to vector<8x8xf32>
    %60 = arith.addf %56, %59 : vector<8x8xf32>
    %cst_43 = arith.constant 0.353553385 : f32
    %61 = vector.broadcast %cst_43 : f32 to vector<8x8xf32>
    %62 = arith.mulf %53, %61 : vector<8x8xf32>
    %63 = tpu.transpose %53, [1, 0] : vector<8x8xf32> -> vector<8x8xf32>
    %cst_44 = arith.constant dense<0.000000e+00> : vector<8x8xf32>
    %64 = tpu.matmul %62, %63, %cst_44 {dimension_numbers = #tpu.dot_dimension_numbers<[1], [0], [0], [1], [0, 0, 1, 1], [], []>} : vector<8x8xf32>, vector<8x8xf32>, vector<8x8xf32> -> vector<8x8xf32>
    %cst_45 = arith.constant -1.000000e+32 : f32
    %65 = vector.broadcast %cst_45 : f32 to vector<8x8xf32>
    %66 = arith.select %6, %64, %65 : vector<8x8xi1>, vector<8x8xf32>
    %cst_46 = arith.constant dense<0xFF800000> : vector<8xf32>
    %67 = vector.multi_reduction <maximumf>, %66, %cst_46 [1] : vector<8x8xf32> to vector<8xf32>
    %68 = vector.shape_cast %67 : vector<8xf32> to vector<8x1xf32>
    %69 = vector.broadcast %68 : vector<8x1xf32> to vector<8x8xf32>
    %70 = arith.subf %66, %69 : vector<8x8xf32>
    %71 = math.exp %70 : vector<8x8xf32>
    %cst_47 = arith.constant dense<0.000000e+00> : vector<8xf32>
    %72 = vector.multi_reduction <add>, %71, %cst_47 [1] : vector<8x8xf32> to vector<8xf32>
    %73 = vector.shape_cast %72 : vector<8xf32> to vector<8x1xf32>
    %74 = tpu.reciprocal %73 {approx = true} : vector<8x1xf32> -> vector<8x1xf32>
    %75 = vector.broadcast %74 : vector<8x1xf32> to vector<8x8xf32>
    %76 = arith.mulf %71, %75 : vector<8x8xf32>
    %c0_i32_48 = arith.constant 0 : i32
    %77 = vector.broadcast %c0_i32_48 : i32 to vector<8x8xi32>
    %78 = arith.cmpi eq, %4, %77 : vector<8x8xi32>
    %cst_49 = arith.constant 0.000000e+00 : f32
    %79 = vector.broadcast %cst_49 : f32 to vector<8x8xf32>
    %80 = arith.select %78, %79, %76 : vector<8x8xi1>, vector<8x8xf32>
    %cst_50 = arith.constant dense<0.000000e+00> : vector<8x8xf32>
    %81 = tpu.matmul %80, %60, %cst_50 {dimension_numbers = #tpu.dot_dimension_numbers<[1], [0], [0], [1], [0, 0, 1, 1], [], []>} : vector<8x8xf32>, vector<8x8xf32>, vector<8x8xf32> -> vector<8x8xf32>
    %c1_51 = arith.constant 1 : index
    %c0_52 = arith.constant 0 : index
    %c0_53 = arith.constant 0 : index
    %82 = vector.load %arg7[%c1_51, %c0_52, %c0_53] : memref<4x8x32xf32, #tpu.memory_space<vmem>>, vector<1x8x32xf32>
    %83 = vector.shape_cast %82 : vector<1x8x32xf32> to vector<8x32xf32>
    %cst_54 = arith.constant dense<0.000000e+00> : vector<8x32xf32>
    %84 = tpu.matmul %81, %83, %cst_54 {dimension_numbers = #tpu.dot_dimension_numbers<[1], [0], [0], [1], [0, 0, 1, 1], [], []>} : vector<8x8xf32>, vector<8x32xf32>, vector<8x32xf32> -> vector<8x32xf32>
    %85 = arith.addf %46, %84 : vector<8x32xf32>
    %c2 = arith.constant 2 : index
    %c0_55 = arith.constant 0 : index
    %c0_56 = arith.constant 0 : index
    %86 = vector.load %arg3[%c2, %c0_55, %c0_56] : memref<4x32x8xf32, #tpu.memory_space<vmem>>, vector<1x32x8xf32>
    %87 = vector.shape_cast %86 : vector<1x32x8xf32> to vector<32x8xf32>
    %cst_57 = arith.constant dense<0.000000e+00> : vector<8x8xf32>
    %88 = tpu.matmul %1, %87, %cst_57 {dimension_numbers = #tpu.dot_dimension_numbers<[1], [0], [0], [1], [0, 0, 1, 1], [], []>} : vector<8x32xf32>, vector<32x8xf32>, vector<8x8xf32> -> vector<8x8xf32>
    %c2_58 = arith.constant 2 : index
    %c0_59 = arith.constant 0 : index
    %c0_60 = arith.constant 0 : index
    %89 = vector.load %arg4[%c2_58, %c0_59, %c0_60] : memref<4x1x8xf32, #tpu.memory_space<vmem>>, vector<1x1x8xf32>
    %90 = vector.shape_cast %89 : vector<1x1x8xf32> to vector<1x8xf32>
    %91 = vector.broadcast %90 : vector<1x8xf32> to vector<8x8xf32>
    %92 = arith.addf %88, %91 : vector<8x8xf32>
    %c2_61 = arith.constant 2 : index
    %c0_62 = arith.constant 0 : index
    %c0_63 = arith.constant 0 : index
    %93 = vector.load %arg5[%c2_61, %c0_62, %c0_63] : memref<4x32x8xf32, #tpu.memory_space<vmem>>, vector<1x32x8xf32>
    %94 = vector.shape_cast %93 : vector<1x32x8xf32> to vector<32x8xf32>
    %cst_64 = arith.constant dense<0.000000e+00> : vector<8x8xf32>
    %95 = tpu.matmul %3, %94, %cst_64 {dimension_numbers = #tpu.dot_dimension_numbers<[1], [0], [0], [1], [0, 0, 1, 1], [], []>} : vector<8x32xf32>, vector<32x8xf32>, vector<8x8xf32> -> vector<8x8xf32>
    %c2_65 = arith.constant 2 : index
    %c0_66 = arith.constant 0 : index
    %c0_67 = arith.constant 0 : index
    %96 = vector.load %arg6[%c2_65, %c0_66, %c0_67] : memref<4x1x8xf32, #tpu.memory_space<vmem>>, vector<1x1x8xf32>
    %97 = vector.shape_cast %96 : vector<1x1x8xf32> to vector<1x8xf32>
    %98 = vector.broadcast %97 : vector<1x8xf32> to vector<8x8xf32>
    %99 = arith.addf %95, %98 : vector<8x8xf32>
    %cst_68 = arith.constant 0.353553385 : f32
    %100 = vector.broadcast %cst_68 : f32 to vector<8x8xf32>
    %101 = arith.mulf %92, %100 : vector<8x8xf32>
    %102 = tpu.transpose %92, [1, 0] : vector<8x8xf32> -> vector<8x8xf32>
    %cst_69 = arith.constant dense<0.000000e+00> : vector<8x8xf32>
    %103 = tpu.matmul %101, %102, %cst_69 {dimension_numbers = #tpu.dot_dimension_numbers<[1], [0], [0], [1], [0, 0, 1, 1], [], []>} : vector<8x8xf32>, vector<8x8xf32>, vector<8x8xf32> -> vector<8x8xf32>
    %cst_70 = arith.constant -1.000000e+32 : f32
    %104 = vector.broadcast %cst_70 : f32 to vector<8x8xf32>
    %105 = arith.select %6, %103, %104 : vector<8x8xi1>, vector<8x8xf32>
    %cst_71 = arith.constant dense<0xFF800000> : vector<8xf32>
    %106 = vector.multi_reduction <maximumf>, %105, %cst_71 [1] : vector<8x8xf32> to vector<8xf32>
    %107 = vector.shape_cast %106 : vector<8xf32> to vector<8x1xf32>
    %108 = vector.broadcast %107 : vector<8x1xf32> to vector<8x8xf32>
    %109 = arith.subf %105, %108 : vector<8x8xf32>
    %110 = math.exp %109 : vector<8x8xf32>
    %cst_72 = arith.constant dense<0.000000e+00> : vector<8xf32>
    %111 = vector.multi_reduction <add>, %110, %cst_72 [1] : vector<8x8xf32> to vector<8xf32>
    %112 = vector.shape_cast %111 : vector<8xf32> to vector<8x1xf32>
    %113 = tpu.reciprocal %112 {approx = true} : vector<8x1xf32> -> vector<8x1xf32>
    %114 = vector.broadcast %113 : vector<8x1xf32> to vector<8x8xf32>
    %115 = arith.mulf %110, %114 : vector<8x8xf32>
    %c0_i32_73 = arith.constant 0 : i32
    %116 = vector.broadcast %c0_i32_73 : i32 to vector<8x8xi32>
    %117 = arith.cmpi eq, %4, %116 : vector<8x8xi32>
    %cst_74 = arith.constant 0.000000e+00 : f32
    %118 = vector.broadcast %cst_74 : f32 to vector<8x8xf32>
    %119 = arith.select %117, %118, %115 : vector<8x8xi1>, vector<8x8xf32>
    %cst_75 = arith.constant dense<0.000000e+00> : vector<8x8xf32>
    %120 = tpu.matmul %119, %99, %cst_75 {dimension_numbers = #tpu.dot_dimension_numbers<[1], [0], [0], [1], [0, 0, 1, 1], [], []>} : vector<8x8xf32>, vector<8x8xf32>, vector<8x8xf32> -> vector<8x8xf32>
    %c2_76 = arith.constant 2 : index
    %c0_77 = arith.constant 0 : index
    %c0_78 = arith.constant 0 : index
    %121 = vector.load %arg7[%c2_76, %c0_77, %c0_78] : memref<4x8x32xf32, #tpu.memory_space<vmem>>, vector<1x8x32xf32>
    %122 = vector.shape_cast %121 : vector<1x8x32xf32> to vector<8x32xf32>
    %cst_79 = arith.constant dense<0.000000e+00> : vector<8x32xf32>
    %123 = tpu.matmul %120, %122, %cst_79 {dimension_numbers = #tpu.dot_dimension_numbers<[1], [0], [0], [1], [0, 0, 1, 1], [], []>} : vector<8x8xf32>, vector<8x32xf32>, vector<8x32xf32> -> vector<8x32xf32>
    %124 = arith.addf %85, %123 : vector<8x32xf32>
    %c3 = arith.constant 3 : index
    %c0_80 = arith.constant 0 : index
    %c0_81 = arith.constant 0 : index
    %125 = vector.load %arg3[%c3, %c0_80, %c0_81] : memref<4x32x8xf32, #tpu.memory_space<vmem>>, vector<1x32x8xf32>
    %126 = vector.shape_cast %125 : vector<1x32x8xf32> to vector<32x8xf32>
    %cst_82 = arith.constant dense<0.000000e+00> : vector<8x8xf32>
    %127 = tpu.matmul %1, %126, %cst_82 {dimension_numbers = #tpu.dot_dimension_numbers<[1], [0], [0], [1], [0, 0, 1, 1], [], []>} : vector<8x32xf32>, vector<32x8xf32>, vector<8x8xf32> -> vector<8x8xf32>
    %c3_83 = arith.constant 3 : index
    %c0_84 = arith.constant 0 : index
    %c0_85 = arith.constant 0 : index
    %128 = vector.load %arg4[%c3_83, %c0_84, %c0_85] : memref<4x1x8xf32, #tpu.memory_space<vmem>>, vector<1x1x8xf32>
    %129 = vector.shape_cast %128 : vector<1x1x8xf32> to vector<1x8xf32>
    %130 = vector.broadcast %129 : vector<1x8xf32> to vector<8x8xf32>
    %131 = arith.addf %127, %130 : vector<8x8xf32>
    %c3_86 = arith.constant 3 : index
    %c0_87 = arith.constant 0 : index
    %c0_88 = arith.constant 0 : index
    %132 = vector.load %arg5[%c3_86, %c0_87, %c0_88] : memref<4x32x8xf32, #tpu.memory_space<vmem>>, vector<1x32x8xf32>
    %133 = vector.shape_cast %132 : vector<1x32x8xf32> to vector<32x8xf32>
    %cst_89 = arith.constant dense<0.000000e+00> : vector<8x8xf32>
    %134 = tpu.matmul %3, %133, %cst_89 {dimension_numbers = #tpu.dot_dimension_numbers<[1], [0], [0], [1], [0, 0, 1, 1], [], []>} : vector<8x32xf32>, vector<32x8xf32>, vector<8x8xf32> -> vector<8x8xf32>
    %c3_90 = arith.constant 3 : index
    %c0_91 = arith.constant 0 : index
    %c0_92 = arith.constant 0 : index
    %135 = vector.load %arg6[%c3_90, %c0_91, %c0_92] : memref<4x1x8xf32, #tpu.memory_space<vmem>>, vector<1x1x8xf32>
    %136 = vector.shape_cast %135 : vector<1x1x8xf32> to vector<1x8xf32>
    %137 = vector.broadcast %136 : vector<1x8xf32> to vector<8x8xf32>
    %138 = arith.addf %134, %137 : vector<8x8xf32>
    %cst_93 = arith.constant 0.353553385 : f32
    %139 = vector.broadcast %cst_93 : f32 to vector<8x8xf32>
    %140 = arith.mulf %131, %139 : vector<8x8xf32>
    %141 = tpu.transpose %131, [1, 0] : vector<8x8xf32> -> vector<8x8xf32>
    %cst_94 = arith.constant dense<0.000000e+00> : vector<8x8xf32>
    %142 = tpu.matmul %140, %141, %cst_94 {dimension_numbers = #tpu.dot_dimension_numbers<[1], [0], [0], [1], [0, 0, 1, 1], [], []>} : vector<8x8xf32>, vector<8x8xf32>, vector<8x8xf32> -> vector<8x8xf32>
    %cst_95 = arith.constant -1.000000e+32 : f32
    %143 = vector.broadcast %cst_95 : f32 to vector<8x8xf32>
    %144 = arith.select %6, %142, %143 : vector<8x8xi1>, vector<8x8xf32>
    %cst_96 = arith.constant dense<0xFF800000> : vector<8xf32>
    %145 = vector.multi_reduction <maximumf>, %144, %cst_96 [1] : vector<8x8xf32> to vector<8xf32>
    %146 = vector.shape_cast %145 : vector<8xf32> to vector<8x1xf32>
    %147 = vector.broadcast %146 : vector<8x1xf32> to vector<8x8xf32>
    %148 = arith.subf %144, %147 : vector<8x8xf32>
    %149 = math.exp %148 : vector<8x8xf32>
    %cst_97 = arith.constant dense<0.000000e+00> : vector<8xf32>
    %150 = vector.multi_reduction <add>, %149, %cst_97 [1] : vector<8x8xf32> to vector<8xf32>
    %151 = vector.shape_cast %150 : vector<8xf32> to vector<8x1xf32>
    %152 = tpu.reciprocal %151 {approx = true} : vector<8x1xf32> -> vector<8x1xf32>
    %153 = vector.broadcast %152 : vector<8x1xf32> to vector<8x8xf32>
    %154 = arith.mulf %149, %153 : vector<8x8xf32>
    %c0_i32_98 = arith.constant 0 : i32
    %155 = vector.broadcast %c0_i32_98 : i32 to vector<8x8xi32>
    %156 = arith.cmpi eq, %4, %155 : vector<8x8xi32>
    %cst_99 = arith.constant 0.000000e+00 : f32
    %157 = vector.broadcast %cst_99 : f32 to vector<8x8xf32>
    %158 = arith.select %156, %157, %154 : vector<8x8xi1>, vector<8x8xf32>
    %cst_100 = arith.constant dense<0.000000e+00> : vector<8x8xf32>
    %159 = tpu.matmul %158, %138, %cst_100 {dimension_numbers = #tpu.dot_dimension_numbers<[1], [0], [0], [1], [0, 0, 1, 1], [], []>} : vector<8x8xf32>, vector<8x8xf32>, vector<8x8xf32> -> vector<8x8xf32>
    %c3_101 = arith.constant 3 : index
    %c0_102 = arith.constant 0 : index
    %c0_103 = arith.constant 0 : index
    %160 = vector.load %arg7[%c3_101, %c0_102, %c0_103] : memref<4x8x32xf32, #tpu.memory_space<vmem>>, vector<1x8x32xf32>
    %161 = vector.shape_cast %160 : vector<1x8x32xf32> to vector<8x32xf32>
    %cst_104 = arith.constant dense<0.000000e+00> : vector<8x32xf32>
    %162 = tpu.matmul %159, %161, %cst_104 {dimension_numbers = #tpu.dot_dimension_numbers<[1], [0], [0], [1], [0, 0, 1, 1], [], []>} : vector<8x8xf32>, vector<8x32xf32>, vector<8x32xf32> -> vector<8x32xf32>
    %163 = arith.addf %124, %162 : vector<8x32xf32>
    %c0_105 = arith.constant 0 : index
    %c0_106 = arith.constant 0 : index
    %164 = vector.load %arg8[%c0_105, %c0_106] : memref<1x32xf32, #tpu.memory_space<vmem>>, vector<1x32xf32>
    %165 = vector.broadcast %164 : vector<1x32xf32> to vector<8x32xf32>
    %166 = arith.addf %163, %165 : vector<8x32xf32>
    %167 = arith.addf %1, %166 : vector<8x32xf32>
    %cst_107 = arith.constant dense<0.000000e+00> : vector<8xf32>
    %168 = vector.multi_reduction <add>, %167, %cst_107 [1] : vector<8x32xf32> to vector<8xf32>
    %169 = vector.shape_cast %168 : vector<8xf32> to vector<8x1xf32>
    %cst_108 = arith.constant 3.200000e+01 : f32
    %170 = vector.broadcast %cst_108 : f32 to vector<8x1xf32>
    %171 = arith.divf %169, %170 : vector<8x1xf32>
    %172 = vector.broadcast %171 : vector<8x1xf32> to vector<8x32xf32>
    %173 = arith.subf %167, %172 : vector<8x32xf32>
    %174 = arith.mulf %173, %173 : vector<8x32xf32>
    %cst_109 = arith.constant dense<0.000000e+00> : vector<8xf32>
    %175 = vector.multi_reduction <add>, %174, %cst_109 [1] : vector<8x32xf32> to vector<8xf32>
    %176 = vector.shape_cast %175 : vector<8xf32> to vector<8x1xf32>
    %cst_110 = arith.constant 3.200000e+01 : f32
    %177 = vector.broadcast %cst_110 : f32 to vector<8x1xf32>
    %178 = arith.divf %176, %177 : vector<8x1xf32>
    %179 = vector.broadcast %171 : vector<8x1xf32> to vector<8x32xf32>
    %180 = arith.subf %167, %179 : vector<8x32xf32>
    %cst_111 = arith.constant 9.99999974E-6 : f32
    %181 = vector.broadcast %cst_111 : f32 to vector<8x1xf32>
    %182 = arith.addf %178, %181 : vector<8x1xf32>
    %183 = math.rsqrt %182 : vector<8x1xf32>
    %184 = vector.broadcast %183 : vector<8x1xf32> to vector<8x32xf32>
    %185 = arith.mulf %180, %184 : vector<8x32xf32>
    %c0_112 = arith.constant 0 : index
    %c0_113 = arith.constant 0 : index
    %186 = vector.load %arg9[%c0_112, %c0_113] : memref<1x32xf32, #tpu.memory_space<vmem>>, vector<1x32xf32>
    %187 = vector.broadcast %186 : vector<1x32xf32> to vector<8x32xf32>
    %188 = arith.mulf %185, %187 : vector<8x32xf32>
    %c0_114 = arith.constant 0 : index
    %c0_115 = arith.constant 0 : index
    %189 = vector.load %arg10[%c0_114, %c0_115] : memref<1x32xf32, #tpu.memory_space<vmem>>, vector<1x32xf32>
    %190 = vector.broadcast %189 : vector<1x32xf32> to vector<8x32xf32>
    %191 = arith.addf %188, %190 : vector<8x32xf32>
    %c0_116 = arith.constant 0 : index
    %c0_117 = arith.constant 0 : index
    %192 = vector.load %arg11[%c0_116, %c0_117] : memref<32x64xf32, #tpu.memory_space<vmem>>, vector<32x64xf32>
    %cst_118 = arith.constant dense<0.000000e+00> : vector<8x64xf32>
    %193 = tpu.matmul %191, %192, %cst_118 {dimension_numbers = #tpu.dot_dimension_numbers<[1], [0], [0], [1], [0, 0, 1, 1], [], []>} : vector<8x32xf32>, vector<32x64xf32>, vector<8x64xf32> -> vector<8x64xf32>
    %c0_119 = arith.constant 0 : index
    %c0_120 = arith.constant 0 : index
    %194 = vector.load %arg12[%c0_119, %c0_120] : memref<1x64xf32, #tpu.memory_space<vmem>>, vector<1x64xf32>
    %195 = vector.broadcast %194 : vector<1x64xf32> to vector<8x64xf32>
    %196 = arith.addf %193, %195 : vector<8x64xf32>
    %cst_121 = arith.constant 0.000000e+00 : f32
    %197 = vector.broadcast %cst_121 : f32 to vector<8x64xf32>
    %198 = arith.maximumf %196, %197 : vector<8x64xf32>
    %c0_122 = arith.constant 0 : index
    %c0_123 = arith.constant 0 : index
    %199 = vector.load %arg13[%c0_122, %c0_123] : memref<64x32xf32, #tpu.memory_space<vmem>>, vector<64x32xf32>
    %cst_124 = arith.constant dense<0.000000e+00> : vector<8x32xf32>
    %200 = tpu.matmul %198, %199, %cst_124 {dimension_numbers = #tpu.dot_dimension_numbers<[1], [0], [0], [1], [0, 0, 1, 1], [], []>} : vector<8x64xf32>, vector<64x32xf32>, vector<8x32xf32> -> vector<8x32xf32>
    %c0_125 = arith.constant 0 : index
    %c0_126 = arith.constant 0 : index
    %201 = vector.load %arg14[%c0_125, %c0_126] : memref<1x32xf32, #tpu.memory_space<vmem>>, vector<1x32xf32>
    %202 = vector.broadcast %201 : vector<1x32xf32> to vector<8x32xf32>
    %203 = arith.addf %200, %202 : vector<8x32xf32>
    %204 = arith.addf %191, %203 : vector<8x32xf32>
    %cst_127 = arith.constant dense<0.000000e+00> : vector<8xf32>
    %205 = vector.multi_reduction <add>, %204, %cst_127 [1] : vector<8x32xf32> to vector<8xf32>
    %206 = vector.shape_cast %205 : vector<8xf32> to vector<8x1xf32>
    %cst_128 = arith.constant 3.200000e+01 : f32
    %207 = vector.broadcast %cst_128 : f32 to vector<8x1xf32>
    %208 = arith.divf %206, %207 : vector<8x1xf32>
    %209 = vector.broadcast %208 : vector<8x1xf32> to vector<8x32xf32>
    %210 = arith.subf %204, %209 : vector<8x32xf32>
    %211 = arith.mulf %210, %210 : vector<8x32xf32>
    %cst_129 = arith.constant dense<0.000000e+00> : vector<8xf32>
    %212 = vector.multi_reduction <add>, %211, %cst_129 [1] : vector<8x32xf32> to vector<8xf32>
    %213 = vector.shape_cast %212 : vector<8xf32> to vector<8x1xf32>
    %cst_130 = arith.constant 3.200000e+01 : f32
    %214 = vector.broadcast %cst_130 : f32 to vector<8x1xf32>
    %215 = arith.divf %213, %214 : vector<8x1xf32>
    %216 = vector.broadcast %208 : vector<8x1xf32> to vector<8x32xf32>
    %217 = arith.subf %204, %216 : vector<8x32xf32>
    %cst_131 = arith.constant 9.99999974E-6 : f32
    %218 = vector.broadcast %cst_131 : f32 to vector<8x1xf32>
    %219 = arith.addf %215, %218 : vector<8x1xf32>
    %220 = math.rsqrt %219 : vector<8x1xf32>
    %221 = vector.broadcast %220 : vector<8x1xf32> to vector<8x32xf32>
    %222 = arith.mulf %217, %221 : vector<8x32xf32>
    %c0_132 = arith.constant 0 : index
    %c0_133 = arith.constant 0 : index
    %223 = vector.load %arg15[%c0_132, %c0_133] : memref<1x32xf32, #tpu.memory_space<vmem>>, vector<1x32xf32>
    %224 = vector.broadcast %223 : vector<1x32xf32> to vector<8x32xf32>
    %225 = arith.mulf %222, %224 : vector<8x32xf32>
    %c0_134 = arith.constant 0 : index
    %c0_135 = arith.constant 0 : index
    %226 = vector.load %arg16[%c0_134, %c0_135] : memref<1x32xf32, #tpu.memory_space<vmem>>, vector<1x32xf32>
    %227 = vector.broadcast %226 : vector<1x32xf32> to vector<8x32xf32>
    %228 = arith.addf %225, %227 : vector<8x32xf32>
    %c0_136 = arith.constant 0 : index
    %c0_137 = arith.constant 0 : index
    %c0_138 = arith.constant 0 : index
    %229 = vector.load %arg17[%c0_136, %c0_137, %c0_138] : memref<1x8x32xf32, #tpu.memory_space<vmem>>, vector<1x8x32xf32>
    %230 = vector.shape_cast %229 : vector<1x8x32xf32> to vector<8x32xf32>
    %231 = vector.shape_cast %228 : vector<8x32xf32> to vector<1x8x32xf32>
    tpu.vector_store %arg17[%c0_136, %c0_137, %c0_138], %231 {strides = array<i32>} : memref<1x8x32xf32, #tpu.memory_space<vmem>>, vector<1x8x32xf32>,
    return
  }
  func.func @transform_0(%arg0: i32) -> (i32, i32, i32) {
    %c0_i32 = arith.constant 0 : i32
    %c0_i32_0 = arith.constant 0 : i32
    %c0_i32_1 = arith.constant 0 : i32
    return %arg0, %c0_i32, %c0_i32_0 : i32, i32, i32
  }
  func.func @transform_1(%arg0: i32) -> (i32, i32, i32) {
    %c0_i32 = arith.constant 0 : i32
    %c0_i32_0 = arith.constant 0 : i32
    %c0_i32_1 = arith.constant 0 : i32
    return %arg0, %c0_i32, %c0_i32_0 : i32, i32, i32
  }
  func.func @transform_2(%arg0: i32) -> (i32, i32, i32) {
    %c0_i32 = arith.constant 0 : i32
    %c0_i32_0 = arith.constant 0 : i32
    %c0_i32_1 = arith.constant 0 : i32
    %c0_i32_2 = arith.constant 0 : i32
    return %c0_i32, %c0_i32_0, %c0_i32_1 : i32, i32, i32
  }
  func.func @transform_3(%arg0: i32) -> (i32, i32, i32) {
    %c0_i32 = arith.constant 0 : i32
    %c0_i32_0 = arith.constant 0 : i32
    %c0_i32_1 = arith.constant 0 : i32
    %c0_i32_2 = arith.constant 0 : i32
    return %c0_i32, %c0_i32_0, %c0_i32_1 : i32, i32, i32
  }
  func.func @transform_4(%arg0: i32) -> (i32, i32, i32) {
    %c0_i32 = arith.constant 0 : i32
    %c0_i32_0 = arith.constant 0 : i32
    %c0_i32_1 = arith.constant 0 : i32
    %c0_i32_2 = arith.constant 0 : i32
    return %c0_i32, %c0_i32_0, %c0_i32_1 : i32, i32, i32
  }
  func.func @transform_5(%arg0: i32) -> (i32, i32, i32) {
    %c0_i32 = arith.constant 0 : i32
    %c0_i32_0 = arith.constant 0 : i32
    %c0_i32_1 = arith.constant 0 : i32
    %c0_i32_2 = arith.constant 0 : i32
    return %c0_i32, %c0_i32_0, %c0_i32_1 : i32, i32, i32
  }
  func.func @transform_6(%arg0: i32) -> (i32, i32, i32) {
    %c0_i32 = arith.constant 0 : i32
    %c0_i32_0 = arith.constant 0 : i32
    %c0_i32_1 = arith.constant 0 : i32
    %c0_i32_2 = arith.constant 0 : i32
    return %c0_i32, %c0_i32_0, %c0_i32_1 : i32, i32, i32
  }
  func.func @transform_7(%arg0: i32) -> (i32, i32) {
    %c0_i32 = arith.constant 0 : i32
    %c0_i32_0 = arith.constant 0 : i32
    %c0_i32_1 = arith.constant 0 : i32
    return %c0_i32, %c0_i32_0 : i32, i32
  }
  func.func @transform_8(%arg0: i32) -> (i32, i32) {
    %c0_i32 = arith.constant 0 : i32
    %c0_i32_0 = arith.constant 0 : i32
    %c0_i32_1 = arith.constant 0 : i32
    return %c0_i32, %c0_i32_0 : i32, i32
  }
  func.func @transform_9(%arg0: i32) -> (i32, i32) {
    %c0_i32 = arith.constant 0 : i32
    %c0_i32_0 = arith.constant 0 : i32
    %c0_i32_1 = arith.constant 0 : i32
    return %c0_i32, %c0_i32_0 : i32, i32
  }
  func.func @transform_10(%arg0: i32) -> (i32, i32) {
    %c0_i32 = arith.constant 0 : i32
    %c0_i32_0 = arith.constant 0 : i32
    %c0_i32_1 = arith.constant 0 : i32
    return %c0_i32, %c0_i32_0 : i32, i32
  }
  func.func @transform_11(%arg0: i32) -> (i32, i32) {
    %c0_i32 = arith.constant 0 : i32
    %c0_i32_0 = arith.constant 0 : i32
    %c0_i32_1 = arith.constant 0 : i32
    return %c0_i32, %c0_i32_0 : i32, i32
  }
  func.func @transform_12(%arg0: i32) -> (i32, i32) {
    %c0_i32 = arith.constant 0 : i32
    %c0_i32_0 = arith.constant 0 : i32
    %c0_i32_1 = arith.constant 0 : i32
    return %c0_i32, %c0_i32_0 : i32, i32
  }
  func.func @transform_13(%arg0: i32) -> (i32, i32) {
    %c0_i32 = arith.constant 0 : i32
    %c0_i32_0 = arith.constant 0 : i32
    %c0_i32_1 = arith.constant 0 : i32
    return %c0_i32, %c0_i32_0 : i32, i32
  }
  func.func @transform_14(%arg0: i32) -> (i32, i32) {
    %c0_i32 = arith.constant 0 : i32
    %c0_i32_0 = arith.constant 0 : i32
    %c0_i32_1 = arith.constant 0 : i32
    return %c0_i32, %c0_i32_0 : i32, i32
  }
  func.func @transform_15(%arg0: i32) -> (i32, i32) {
    %c0_i32 = arith.constant 0 : i32
    %c0_i32_0 = arith.constant 0 : i32
    %c0_i32_1 = arith.constant 0 : i32
    return %c0_i32, %c0_i32_0 : i32, i32
  }
  func.func @transform_16(%arg0: i32) -> (i32, i32, i32) {
    %c0_i32 = arith.constant 0 : i32
    %c0_i32_0 = arith.constant 0 : i32
    %c0_i32_1 = arith.constant 0 : i32
    return %arg0, %c0_i32, %c0_i32_0 : i32, i32, i32
  }
}

module attributes {stable_mosaic.version = 11 : i64} {
  func.func @_out_mlp_kernel(%arg0: i32, %arg1: memref<8x64xf32, #tpu.memory_space<vmem>>, %arg2: memref<64x64xf32, #tpu.memory_space<vmem>>, %arg3: memref<1x64xf32, #tpu.memory_space<vmem>>, %arg4: memref<64x128xf32, #tpu.memory_space<vmem>>, %arg5: memref<1x128xf32, #tpu.memory_space<vmem>>, %arg6: memref<8x128xf32, #tpu.memory_space<vmem>>) attributes {dimension_semantics = [#tpu.dimension_semantics<parallel>], iteration_bounds = array<i64: 1>, scalar_prefetch = 0 : i64, scratch_operands = 0 : i64, tpu.core_type = #tpu.core_type<tc>, window_params = [{transform_indices = @transform_0, window_bounds = array<i64: 8, 64>}, {pipeline_mode = #tpu.pipeline_mode<synchronous>, transform_indices = @transform_1, window_bounds = array<i64: 64, 64>}, {pipeline_mode = #tpu.pipeline_mode<synchronous>, transform_indices = @transform_2, window_bounds = array<i64: 1, 64>}, {pipeline_mode = #tpu.pipeline_mode<synchronous>, transform_indices = @transform_3, window_bounds = array<i64: 64, 128>}, {pipeline_mode = #tpu.pipeline_mode<synchronous>, transform_indices = @transform_4, window_bounds = array<i64: 1, 128>}, {transform_indices = @transform_5, window_bounds = array<i64: 8, 128>}]} {
    %c0 = arith.constant 0 : index
    %c0_0 = arith.constant 0 : index
    %0 = vector.load %arg1[%c0, %c0_0] : memref<8x64xf32, #tpu.memory_space<vmem>>, vector<8x64xf32>
    %c0_1 = arith.constant 0 : index
    %c0_2 = arith.constant 0 : index
    %1 = vector.load %arg2[%c0_1, %c0_2] : memref<64x64xf32, #tpu.memory_space<vmem>>, vector<64x64xf32>
    %cst = arith.constant dense<0.000000e+00> : vector<8x64xf32>
    %2 = tpu.matmul %0, %1, %cst {dimension_numbers = #tpu.dot_dimension_numbers<[1], [0], [0], [1], [0, 0, 1, 1], [], []>} : vector<8x64xf32>, vector<64x64xf32>, vector<8x64xf32> -> vector<8x64xf32>
    %c0_3 = arith.constant 0 : index
    %c0_4 = arith.constant 0 : index
    %3 = vector.load %arg3[%c0_3, %c0_4] : memref<1x64xf32, #tpu.memory_space<vmem>>, vector<1x64xf32>
    %4 = vector.broadcast %3 : vector<1x64xf32> to vector<8x64xf32>
    %5 = arith.addf %2, %4 : vector<8x64xf32>
    %cst_5 = arith.constant 0.000000e+00 : f32
    %6 = vector.broadcast %cst_5 : f32 to vector<8x64xf32>
    %7 = arith.maximumf %5, %6 : vector<8x64xf32>
    %c0_6 = arith.constant 0 : index
    %c0_7 = arith.constant 0 : index
    %8 = vector.load %arg4[%c0_6, %c0_7] : memref<64x128xf32, #tpu.memory_space<vmem>>, vector<64x128xf32>
    %cst_8 = arith.constant dense<0.000000e+00> : vector<8x128xf32>
    %9 = tpu.matmul %7, %8, %cst_8 {dimension_numbers = #tpu.dot_dimension_numbers<[1], [0], [0], [1], [0, 0, 1, 1], [], []>} : vector<8x64xf32>, vector<64x128xf32>, vector<8x128xf32> -> vector<8x128xf32>
    %c0_9 = arith.constant 0 : index
    %c0_10 = arith.constant 0 : index
    %10 = vector.load %arg5[%c0_9, %c0_10] : memref<1x128xf32, #tpu.memory_space<vmem>>, vector<1x128xf32>
    %11 = vector.broadcast %10 : vector<1x128xf32> to vector<8x128xf32>
    %12 = arith.addf %9, %11 : vector<8x128xf32>
    %13 = arith.negf %12 : vector<8x128xf32>
    %14 = math.exp %13 : vector<8x128xf32>
    %cst_11 = arith.constant 1.000000e+00 : f32
    %15 = vector.broadcast %cst_11 : f32 to vector<8x128xf32>
    %16 = arith.addf %15, %14 : vector<8x128xf32>
    %17 = arith.divf %15, %16 : vector<8x128xf32>
    %c0_12 = arith.constant 0 : index
    %c0_13 = arith.constant 0 : index
    %18 = vector.load %arg6[%c0_12, %c0_13] : memref<8x128xf32, #tpu.memory_space<vmem>>, vector<8x128xf32>
    tpu.vector_store %arg6[%c0_12, %c0_13], %17 {strides = array<i32>} : memref<8x128xf32, #tpu.memory_space<vmem>>, vector<8x128xf32>,
    return
  }
  func.func @transform_0(%arg0: i32) -> (i32, i32) {
    %c0_i32 = arith.constant 0 : i32
    %c0_i32_0 = arith.constant 0 : i32
    return %arg0, %c0_i32 : i32, i32
  }
  func.func @transform_1(%arg0: i32) -> (i32, i32) {
    %c0_i32 = arith.constant 0 : i32
    %c0_i32_0 = arith.constant 0 : i32
    %c0_i32_1 = arith.constant 0 : i32
    return %c0_i32, %c0_i32_0 : i32, i32
  }
  func.func @transform_2(%arg0: i32) -> (i32, i32) {
    %c0_i32 = arith.constant 0 : i32
    %c0_i32_0 = arith.constant 0 : i32
    %c0_i32_1 = arith.constant 0 : i32
    return %c0_i32, %c0_i32_0 : i32, i32
  }
  func.func @transform_3(%arg0: i32) -> (i32, i32) {
    %c0_i32 = arith.constant 0 : i32
    %c0_i32_0 = arith.constant 0 : i32
    %c0_i32_1 = arith.constant 0 : i32
    return %c0_i32, %c0_i32_0 : i32, i32
  }
  func.func @transform_4(%arg0: i32) -> (i32, i32) {
    %c0_i32 = arith.constant 0 : i32
    %c0_i32_0 = arith.constant 0 : i32
    %c0_i32_1 = arith.constant 0 : i32
    return %c0_i32, %c0_i32_0 : i32, i32
  }
  func.func @transform_5(%arg0: i32) -> (i32, i32) {
    %c0_i32 = arith.constant 0 : i32
    %c0_i32_0 = arith.constant 0 : i32
    return %arg0, %c0_i32 : i32, i32
  }
}

</mosaic_0001>

<bundles_post_ra>
// kernel: _rigl_device.7
= control target key start
LH: loop header
LB: loop body
LE: loop exit
PB: predicated region body
PF: predicated region fallthrough
CT: control target
= control target key end

     0   :  { %v382_v0 = vmov 0.0|0.0   ;;  %vm383_vm0 = vmmov 0   ;;  %v384_v4 = vmov 0.0   ;;  %vm38_vm1 = vcmask 523264   ;;  %s505_s1 = inlined_call_operand.vmem [shape: f32[64,64], index: 1, kind: input, shape index: {}]   ;;  %s506_s3 = inlined_call_operand.vmem [shape: f32[64,128], index: 3, kind: input, shape index: {}]   ;;  %s507_s0 = inlined_call_operand.vmem [shape: f32[24,64], index: 0, kind: input, shape index: {}]   ;;  %s508_s2 = inlined_call_operand.vmem [shape: f32[1,64], index: 2, kind: input, shape index: {}]   ;;  %s509_s4 = inlined_call_operand.vmem [shape: f32[1,128], index: 4, kind: input, shape index: {}]   ;;  %s510_s5 = inlined_call_operand.vmem [shape: f32[24,128], index: 5, kind: output, shape index: {}]  }
   0x1   :  { %343 = vmatprep.subr.bf16.mxu0 %v382_v0  ;;  %v23_v1 = vld [vmem:[%s505_s1] sm:$0xff]  ;;  %v24_v2 = vld [vmem:[%s505_s1 + $0x8] sm:$0xff]  ;;  %v25_v3 = vld [vmem:[%s505_s1 + $0x10] sm:$0xff]  ;;  %309 = vmatprep.mubr.msk.f32.mxu0 %vm383_vm0, %v384_v4 }
   0x2   :  { %v344_v5 = vpack.c.bf16 %v24_v2, %v23_v1  ;;  %v26_v6 = vld [vmem:[%s505_s1 + $0x18] sm:$0xff]  ;;  %355 = vmatprep.subr.bf16.mxu1 %v382_v0  ;;  %334 = vmatprep.mubr.msk.f32.mxu1 %vm383_vm0, %v384_v4  ;;  %v27_v8 = vld [vmem:[%s505_s1 + $0x20] sm:$0xff]  ;;  %v28_v9 = vld [vmem:[%s505_s1 + $0x28] sm:$0xff] }
   0x3   :  { %v347_v7 = vpack.c.bf16 %v26_v6, %v25_v3  ;;  %v131_v10 = vld [vmem:[%s506_s3] sm:$0xff]  ;;  %v132_v11 = vld [vmem:[%s506_s3 + $0x8] sm:$0xff]  ;;  %v133_v12 = vld [vmem:[%s506_s3 + $0x10] sm:$0xff]  ;;  %v350_v15 = vpack.c.bf16 %v28_v9, %v27_v8 }
   0x4   :  { %345 = vmatpush3.bf16.msra.mxu0 %v344_v5  ;;  %v134_v13 = vld [vmem:[%s506_s3 + $0x18] sm:$0xff]  ;;  %v356_v14 = vpack.c.bf16 %v132_v11, %v131_v10  ;;  %v29_v16 = vld [vmem:[%s505_s1 + $0x30] sm:$0xff]  ;;  %v135_v19 = vld [vmem:[%s506_s3 + $0x20] sm:$0xff] }
   0x5   :  { %346 = vmatprep.subr.bf16.mxu0 %v382_v0  ;;  %v359_v17 = vpack.c.bf16 %v134_v13, %v133_v12  ;;  %v30_v18 = vld [vmem:[%s505_s1 + $0x38] sm:$0xff]  ;;  %v136_v20 = vld [vmem:[%s506_s3 + $0x28] sm:$0xff]  ;;  %v20_v23 = vld [vmem:[%s507_s0] sm:$0xff] }
   0x6   :  { %357 = vmatpush3.bf16.msra.mxu1 %v356_v14  ;;  %v353_v21 = vpack.c.bf16 %v30_v18, %v29_v16  ;;  %v362_v22 = vpack.c.bf16 %v136_v20, %v135_v19  ;;  %v21_v24 = vld [vmem:[%s507_s0 + $0x8] sm:$0xff]  ;;  %v22_v25 = vld [vmem:[%s507_s0 + $0x10] sm:$0xff]  ;;  %v138_v27 = vld [vmem:[%s506_s3 + $0x38] sm:$0xff] }
   0x7   :  { %358 = vmatprep.subr.bf16.mxu1 %v382_v0  ;;  %v137_v26 = vld [vmem:[%s506_s3 + $0x30] sm:$0xff]  ;;  %v260_v29 = vld [vmem:[%s508_s2] ss:$0 sm:$0xff] }
   0x8   :  { %348 = vmatpush3.bf16.msra.mxu0 %v347_v7  ;;  %v365_v28 = vpack.c.bf16 %v138_v27, %v137_v26  ;;  %v264_v42 = vld [vmem:[%s509_s4] ss:$0 sm:$0xff] }
   0x9   :  { %349 = vmatprep.subr.bf16.mxu0 %v382_v0 }
   0xa   :  { %360 = vmatpush3.bf16.msra.mxu1 %v359_v17 }
   0xb   :  { %361 = vmatprep.subr.bf16.mxu1 %v382_v0 }
   0xc   :  { %351 = vmatpush3.bf16.msra.mxu0 %v350_v15 }
   0xd   :  { %352 = vmatprep.subr.bf16.mxu0 %v382_v0 }
   0xe   :  { %363 = vmatpush3.bf16.msra.mxu1 %v362_v22 }
   0xf   :  { %364 = vmatprep.subr.bf16.mxu1 %v382_v0 }
  0x10   :  { %354 = vmatpush3.bf16.msra.mxu0 %v353_v21 }
  0x12   :  { %366 = vmatpush3.bf16.msra.mxu1 %v365_v28 }
  0x13   :  { %310 = vmatmul.mubr.msk.f32.vlgmr.msra.gmra.mrb[0].mxu0 %vm38_vm1, %v20_v23 }
  0x14   :  { %312 = vmatprep.mubr.msk.f32.mxu0 %vm383_vm0, %v384_v4 }
  0x17   :  { %313 = vmatmul.mubr.msk.f32.gmra.mrb[2].mxu0 %vm38_vm1, %v21_v24 }
  0x18   :  { %315 = vmatprep.mubr.msk.f32.mxu0 %vm383_vm0, %v384_v4 }
  0x1b   :  { %316 = vmatmul.mubr.msk.f32.gmra.mrb[4].mxu0 %vm38_vm1, %v22_v25 }
  0xe6   :  { %v114_v30 = vpop.f32.mrb[0].mxu0 }
  0xe7   :  { %v115_v31 = vadd.f32 %v260_v29, %v114_v30  ;;  %v311_v32 = vpop.f32.mrb[1].mxu0 }
  0xe9   :  { %v128_v33 = vmax.f32 %v115_v31, 0.0 }
  0xea   :  { %v119_v34 = vpop.f32.mrb[2].mxu0 }
  0xeb   :  { %v120_v35 = vadd.f32 %v260_v29, %v119_v34  ;;  %v314_v36 = vpop.f32.mrb[3].mxu0  ;;  %335 = vmatmul.mubr.msk.f32.vlgmr.msra.gmra.mrb[0].mxu1 %vm38_vm1, %v128_v33 }
  0xec   :  { %337 = vmatprep.mubr.msk.f32.mxu1 %vm383_vm0, %v384_v4 }
  0xed   :  { %v129_v37 = vmax.f32 %v120_v35, 0.0 }
  0xee   :  { %v124_v38 = vpop.f32.mrb[4].mxu0 }
  0xef   :  { %v125_v39 = vadd.f32 %v260_v29, %v124_v38  ;;  %v317_v40 = vpop.f32.mrb[5].mxu0  ;;  %338 = vmatmul.mubr.msk.f32.gmra.mrb[2].mxu1 %vm38_vm1, %v129_v37 }
  0xf0   :  { %340 = vmatprep.mubr.msk.f32.mxu1 %vm383_vm0, %v384_v4 }
  0xf1   :  { %v130_v41 = vmax.f32 %v125_v39, 0.0 }
  0xf3   :  { %341 = vmatmul.mubr.msk.f32.gmra.mrb[4].mxu1 %vm38_vm1, %v130_v41 }
 0x1be   :  { %v221_v43 = vpop.f32.mrb[0].mxu1 }
 0x1bf   :  { %v222_v44 = vadd.f32 %v264_v42, %v221_v43  ;;  %v336_v45 = vpop.f32.mrb[1].mxu1 }
 0x1c1   :  { %v268_v46 = vmul.f32 -1.442695, %v222_v44 }
 0x1c2   :  { %v226_v47 = vpop.f32.mrb[2].mxu1 }
 0x1c3   :  { %370 = vpow2.f32 %v268_v46  ;;  %v227_v48 = vadd.f32 %v264_v42, %v226_v47  ;;  %v339_v49 = vpop.f32.mrb[3].mxu1 }
 0x1c5   :  { %v269_v50 = vmul.f32 -1.442695, %v227_v48 }
 0x1c6   :  { %v231_v51 = vpop.f32.mrb[4].mxu1 }
 0x1c7   :  { %372 = vpow2.f32 %v269_v50  ;;  %v232_v52 = vadd.f32 %v264_v42, %v231_v51  ;;  %v342_v53 = vpop.f32.mrb[5].mxu1 }
 0x1c9   :  { %v270_v54 = vmul.f32 -1.442695, %v232_v52 }
 0x1cb   :  { %374 = vpow2.f32 %v270_v54 }
 0x1cd   :  { %v371_v55 = vpop.eup %370 }
 0x1ce   :  { %v244_v56 = vadd.f32 1.0, %v371_v55 }
 0x1d0   :  { %376 = vrcp.f32 %v244_v56 }
 0x1d1   :  { %v373_v57 = vpop.eup %372 }
 0x1d2   :  { %v245_v58 = vadd.f32 1.0, %v373_v57 }
 0x1d4   :  { %378 = vrcp.f32 %v245_v58 }
 0x1d5   :  { %v375_v59 = vpop.eup %374 }
 0x1d6   :  { %v246_v60 = vadd.f32 1.0, %v375_v59 }
 0x1d8   :  { %380 = vrcp.f32 %v246_v60 }
 0x1da   :  { %v377_v61 = vpop.eup %376 }
 0x1db   :  { %253 = vst [vmem:[%s510_s5] sm:$0xff] %v377_v61 }
 0x1de   :  { %v379_v62 = vpop.eup %378 }
 0x1df   :  { %254 = vst [vmem:[%s510_s5 + $0x8] sm:$0xff] %v379_v62 }
 0x1e2   :  { %v381_v63 = vpop.eup %380 }
 0x1e3   :  { %255 = vst [vmem:[%s510_s5 + $0x10] sm:$0xff] %v381_v63 }

// kernel: _rigl_device.6
= control target key start
LH: loop header
LB: loop body
LE: loop exit
PB: predicated region body
PF: predicated region fallthrough
CT: control target
= control target key end

     0   :  { %v302_v0 = vmov 0.0|0.0   ;;  %vm303_vm0 = vmmov 0   ;;  %v304_v4 = vmov 0.0   ;;  %vm36_vm1 = vcmask 523264   ;;  %s395_s1 = inlined_call_operand.vmem [shape: f32[64,64], index: 1, kind: input, shape index: {}]   ;;  %s396_s3 = inlined_call_operand.vmem [shape: f32[64,128], index: 3, kind: input, shape index: {}]   ;;  %s397_s0 = inlined_call_operand.vmem [shape: f32[8,64], index: 0, kind: input, shape index: {}]   ;;  %s398_s2 = inlined_call_operand.vmem [shape: f32[1,64], index: 2, kind: input, shape index: {}]   ;;  %s399_s4 = inlined_call_operand.vmem [shape: f32[1,128], index: 4, kind: input, shape index: {}]   ;;  %s400_s5 = inlined_call_operand.vmem [shape: f32[8,128], index: 5, kind: output, shape index: {}]  }
   0x1   :  { %271 = vmatprep.subr.bf16.mxu0 %v302_v0  ;;  %v21_v1 = vld [vmem:[%s395_s1] sm:$0xff]  ;;  %v22_v2 = vld [vmem:[%s395_s1 + $0x8] sm:$0xff]  ;;  %v23_v3 = vld [vmem:[%s395_s1 + $0x10] sm:$0xff]  ;;  %249 = vmatprep.mubr.msk.f32.mxu0 %vm303_vm0, %v304_v4 }
   0x2   :  { %v272_v5 = vpack.c.bf16 %v22_v2, %v21_v1  ;;  %v24_v6 = vld [vmem:[%s395_s1 + $0x18] sm:$0xff]  ;;  %283 = vmatprep.subr.bf16.mxu1 %v302_v0  ;;  %268 = vmatprep.mubr.msk.f32.mxu1 %vm303_vm0, %v304_v4  ;;  %v111_v8 = vld [vmem:[%s396_s3] sm:$0xff]  ;;  %v112_v9 = vld [vmem:[%s396_s3 + $0x8] sm:$0xff] }
   0x3   :  { %v275_v7 = vpack.c.bf16 %v24_v6, %v23_v3  ;;  %v113_v10 = vld [vmem:[%s396_s3 + $0x10] sm:$0xff]  ;;  %v25_v11 = vld [vmem:[%s395_s1 + $0x20] sm:$0xff]  ;;  %v26_v12 = vld [vmem:[%s395_s1 + $0x28] sm:$0xff]  ;;  %v284_v13 = vpack.c.bf16 %v112_v9, %v111_v8 }
   0x4   :  { %273 = vmatpush3.bf16.msra.mxu0 %v272_v5  ;;  %v114_v14 = vld [vmem:[%s396_s3 + $0x18] sm:$0xff]  ;;  %v278_v16 = vpack.c.bf16 %v26_v12, %v25_v11  ;;  %v115_v17 = vld [vmem:[%s396_s3 + $0x20] sm:$0xff]  ;;  %v116_v18 = vld [vmem:[%s396_s3 + $0x28] sm:$0xff] }
   0x5   :  { %274 = vmatprep.subr.bf16.mxu0 %v302_v0  ;;  %285 = vmatpush3.bf16.msra.mxu1 %v284_v13  ;;  %v287_v15 = vpack.c.bf16 %v114_v14, %v113_v10  ;;  %v27_v19 = vld [vmem:[%s395_s1 + $0x30] sm:$0xff]  ;;  %v28_v20 = vld [vmem:[%s395_s1 + $0x38] sm:$0xff]  ;;  %v290_v21 = vpack.c.bf16 %v116_v18, %v115_v17  ;;  %v20_v23 = vld [vmem:[%s397_s0] sm:$0xff] }
   0x6   :  { %286 = vmatprep.subr.bf16.mxu1 %v302_v0  ;;  %v281_v22 = vpack.c.bf16 %v28_v20, %v27_v19  ;;  %v117_v24 = vld [vmem:[%s396_s3 + $0x30] sm:$0xff]  ;;  %v118_v25 = vld [vmem:[%s396_s3 + $0x38] sm:$0xff]  ;;  %v210_v27 = vld [vmem:[%s398_s2] ss:$0 sm:$0xff] }
   0x7   :  { %v293_v26 = vpack.c.bf16 %v118_v25, %v117_v24  ;;  %v212_v32 = vld [vmem:[%s399_s4] ss:$0 sm:$0xff] }
   0x8   :  { %276 = vmatpush3.bf16.msra.mxu0 %v275_v7 }
   0x9   :  { %277 = vmatprep.subr.bf16.mxu0 %v302_v0  ;;  %288 = vmatpush3.bf16.msra.mxu1 %v287_v15 }
   0xa   :  { %289 = vmatprep.subr.bf16.mxu1 %v302_v0 }
   0xc   :  { %279 = vmatpush3.bf16.msra.mxu0 %v278_v16 }
   0xd   :  { %280 = vmatprep.subr.bf16.mxu0 %v302_v0  ;;  %291 = vmatpush3.bf16.msra.mxu1 %v290_v21 }
   0xe   :  { %292 = vmatprep.subr.bf16.mxu1 %v302_v0 }
  0x10   :  { %282 = vmatpush3.bf16.msra.mxu0 %v281_v22 }
  0x11   :  { %294 = vmatpush3.bf16.msra.mxu1 %v293_v26 }
  0x13   :  { %250 = vmatmul.mubr.msk.f32.vlgmr.msra.gmra.mrb[0].mxu0 %vm36_vm1, %v20_v23 }
  0xe6   :  { %v106_v28 = vpop.f32.mrb[0].mxu0 }
  0xe7   :  { %v107_v29 = vadd.f32 %v210_v27, %v106_v28  ;;  %v251_v30 = vpop.f32.mrb[1].mxu0 }
  0xe9   :  { %v110_v31 = vmax.f32 %v107_v29, 0.0 }
  0xeb   :  { %269 = vmatmul.mubr.msk.f32.vlgmr.msra.gmra.mrb[0].mxu1 %vm36_vm1, %v110_v31 }
 0x1be   :  { %v195_v33 = vpop.f32.mrb[0].mxu1 }
 0x1bf   :  { %v196_v34 = vadd.f32 %v212_v32, %v195_v33  ;;  %v270_v35 = vpop.f32.mrb[1].mxu1 }
 0x1c1   :  { %v214_v36 = vmul.f32 -1.442695, %v196_v34 }
 0x1c3   :  { %298 = vpow2.f32 %v214_v36 }
 0x1cd   :  { %v299_v37 = vpop.eup %298 }
 0x1ce   :  { %v202_v38 = vadd.f32 1.0, %v299_v37 }
 0x1d0   :  { %300 = vrcp.f32 %v202_v38 }
 0x1da   :  { %v301_v39 = vpop.eup %300 }
 0x1db   :  { %205 = vst [vmem:[%s400_s5] sm:$0xff] %v301_v39 }

// kernel: _rigl_device.4
= control target key start
LH: loop header
LB: loop body
LE: loop exit
PB: predicated region body
PF: predicated region fallthrough
CT: control target
= control target key end

     0   :  { %s3005_s21 = smov 0   ;;  %s3378_s0 = inlined_call_operand.vmem [shape: f32[3,8,32], index: 0, kind: input, shape index: {}]   ;;  %s3379_s1 = inlined_call_operand.vmem [shape: f32[3,8,32], index: 1, kind: input, shape index: {}]   ;;  %s3380_s2 = inlined_call_operand.vmem [shape: f32[4,32,8], index: 2, kind: input, shape index: {}]   ;;  %s3381_s3 = inlined_call_operand.vmem [shape: f32[4,1,8], index: 3, kind: input, shape index: {}]   ;;  %s3382_s4 = inlined_call_operand.vmem [shape: f32[4,32,8], index: 4, kind: input, shape index: {}]   ;;  %s3383_s5 = inlined_call_operand.vmem [shape: f32[4,1,8], index: 5, kind: input, shape index: {}]   ;;  %s3384_s6 = inlined_call_operand.vmem [shape: f32[4,8,32], index: 6, kind: input, shape index: {}]   ;;  %s3385_s7 = inlined_call_operand.vmem [shape: f32[1,32], index: 7, kind: input, shape index: {}]   ;;  %s3386_s8 = inlined_call_operand.vmem [shape: f32[1,32], index: 8, kind: input, shape index: {}]   ;;  %s3387_s9 = inlined_call_operand.vmem [shape: f32[1,32], index: 9, kind: input, shape index: {}]   ;;  %s3388_s10 = inlined_call_operand.vmem [shape: f32[32,64], index: 10, kind: input, shape index: {}]   ;;  %s3389_s11 = inlined_call_operand.vmem [shape: f32[1,64], index: 11, kind: input, shape index: {}]   ;;  %s3390_s12 = inlined_call_operand.vmem [shape: f32[64,32], index: 12, kind: input, shape index: {}]   ;;  %s3391_s13 = inlined_call_operand.vmem [shape: f32[1,32], index: 13, kind: input, shape index: {}]   ;;  %s3392_s14 = inlined_call_operand.vmem [shape: f32[1,32], index: 14, kind: input, shape index: {}]   ;;  %s3393_s15 = inlined_call_operand.vmem [shape: f32[1,32], index: 15, kind: input, shape index: {}]   ;;  %s3394_s16 = inlined_call_operand.vmem [shape: f32[3,8,32], index: 16, kind: output, shape index: {}]  }
   0x1   :  { %3395 = sst [smem:[#allocation2_spill]] %s3378_s0 }
   0x2 LB: > { %s2472_s22 = sadd.s32 4294967295, %s2915_s21   ;;  %p2476_p0 = scmp.ge.s32.totalorder %s2915_s21, 1  ;;  %s2915_s21 = sphi %s3005_s21, %s26_s21  }
   0x3   : > { %p470_p1 = scmp.lt.s32.totalorder %s2915_s21, 4 }
   0x5   : > { %p471_p2 = pnand %p2476_p0, %p470_p1 }
   0x6   : > { %v541_v0 = vld [vmem:[%s3380_s2] sm:$0xff] (!%p471_p2)  ;;  %v542_v1 = vld [vmem:[%s3380_s2 + $0x8] sm:$0xff] (!%p471_p2)  ;;  %v543_v2 = vld [vmem:[%s3380_s2 + $0x10] sm:$0xff] (!%p471_p2)  ;;  %v2917_v3 = vmov (!%p471_p2), 0.0|0.0   ;;  %vm2918_vm0 = vmmov (!%p471_p2), 0   ;;  %v2919_v6 = vmov (!%p471_p2), 0.0   ;;  %v536_v21 = vlaneseq (!%p471_p2) }
   0x7   : > { %474 = sbr.rel (%p471_p2) target bundleno = 4723 (0x1273), region = 84  ;;  %2812 = vmatprep.subr.bf16.mxu0 (!%p471_p2), %v2917_v3  ;;  %v2813_v4 = vpack.c.bf16 (!%p471_p2), %v542_v1, %v541_v0  ;;  %v544_v5 = vld [vmem:[%s3380_s2 + $0x18] sm:$0xff] (!%p471_p2)  ;;  %2642 = vmatprep.mubr.msk.f32.mxu0 (!%p471_p2), %vm2918_vm0, %v2919_v6  ;;  %p522_p3 = scmp.lt.s32.totalorder (!%p471_p2), %s2472_s22, 2  ;;  %vm552_vm1 = vcmask (!%p471_p2), 261120   ;;  %v2480_v9 = vld [vmem:[%s3381_s3] ss:$0 sm:$0xff] (!%p471_p2) }
   0x8   : > { %2818 = vmatprep.subr.bf16.mxu1 (!%p471_p2), %v2917_v3  ;;  %2653 = vmatprep.mubr.msk.f32.mxu1 (!%p471_p2), %vm2918_vm0, %v2919_v6  ;;  %v2816_v7 = vpack.c.bf16 (!%p471_p2), %v544_v5, %v543_v2  ;;  %s3396_s19 = sld [smem:[#allocation2_spill]] (!%p471_p2)  ;;  %vm711_vm2 = vcmask (!%p471_p2), 64512   ;;  %v626_v14 = vld [vmem:[%s3382_s4] sm:$0xff] (!%p471_p2)  ;;  %v627_v15 = vld [vmem:[%s3382_s4 + $0x8] sm:$0xff] (!%p471_p2)  ;;  %v628_v16 = vld [vmem:[%s3382_s4 + $0x10] sm:$0xff] (!%p471_p2)  ;;  %v3077_v22 = vshrl.u32 (!%p471_p2), %v536_v21, 7 }
   0x9   : > { %2814 = vmatpush3.bf16.msra.mxu0 (!%p471_p2), %v2813_v4  ;;  %v2819_v17 = vpack.c.bf16 (!%p471_p2), %v627_v15, %v626_v14  ;;  %v629_v18 = vld [vmem:[%s3382_s4 + $0x18] sm:$0xff] (!%p471_p2)  ;;  %v3079_v23 = vand.u32 (!%p471_p2), 127, %v536_v21  ;;  %v2482_v33 = vld [vmem:[%s3383_s5] ss:$0 sm:$0xff] (!%p471_p2)  ;;  %v2488_v39 = vld [vmem:[%s3380_s2 + $0x28] sm:$0xff] (!%p471_p2)  ;;  %vm2302_vm5 = vcmask (!%p471_p2), 523264  }
   0xa   : > { %2815 = vmatprep.subr.bf16.mxu0 (!%p471_p2), %v2917_v3  ;;  %v2822_v19 = vpack.c.bf16 (!%p471_p2), %v629_v18, %v628_v16  ;;  %v2487_v38 = vld [vmem:[%s3380_s2 + $0x20] sm:$0xff] (!%p471_p2)  ;;  %vm800_vm4 = vcmp.eq.s32.totalorder (!%p471_p2), %v3077_v22, 0  ;;  %v2489_v43 = vld [vmem:[%s3380_s2 + $0x30] sm:$0xff] (!%p471_p2)  ;;  %v2490_v44 = vld [vmem:[%s3380_s2 + $0x38] sm:$0xff] (!%p471_p2) }
   0xb   : > { %2820 = vmatpush3.bf16.msra.mxu1 (!%p471_p2), %v2819_v17  ;;  %vm540_vm3 = vcmp.lt.s32.totalorder (!%p471_p2), %v3079_v23, %v3077_v22  ;;  %v2825_v42 = vpack.c.bf16 (!%p471_p2), %v2488_v39, %v2487_v38  ;;  %v2828_v46 = vpack.c.bf16 (!%p471_p2), %v2490_v44, %v2489_v43  ;;  %v2492_v49 = vld [vmem:[%s3381_s3 + $0x1] ss:$0 sm:$0xff] (!%p471_p2)  ;;  %v2495_v55 = vld [vmem:[%s3382_s4 + $0x28] sm:$0xff] (!%p471_p2)  ;;  %v2496_v56 = vld [vmem:[%s3382_s4 + $0x30] sm:$0xff] (!%p471_p2) }
   0xc   : > { %2821 = vmatprep.subr.bf16.mxu1 (!%p471_p2), %v2917_v3  ;;  %v2494_v54 = vld [vmem:[%s3382_s4 + $0x20] sm:$0xff] (!%p471_p2)  ;;  %v2497_v58 = vld [vmem:[%s3382_s4 + $0x38] sm:$0xff] (!%p471_p2) }
   0xd   : > { %2817 = vmatpush3.bf16.msra.mxu0 (!%p471_p2), %v2816_v7  ;;  %v2831_v57 = vpack.c.bf16 (!%p471_p2), %v2495_v55, %v2494_v54  ;;  %v2834_v59 = vpack.c.bf16 (!%p471_p2), %v2497_v58, %v2496_v56  ;;  %v2499_v7 = vld [vmem:[%s3383_s5 + $0x1] ss:$0 sm:$0xff] (!%p471_p2)  ;;  %v2517_v43 = vld [vmem:[%s3382_s4 + $0x58] sm:$0xff] (!%p471_p2)  ;;  %v2519_v54 = vld [vmem:[%s3383_s5 + $0x2] ss:$0 sm:$0xff] (!%p471_p2) }
   0xe   : > { %s3398_s22 = smov (!%p522_p3, %s2472_s22), 2  ;;  %2656 = vmatprep.subr.mxu0 %v2919_v6  ;;  %v875_v16 = vld [vmem:[%s3384_s6] sm:$0xff] }
   0xf   : > { %s3032_s0 = sshll.u32 %s3398_s22, 3  ;;  %2823 = vmatpush3.bf16.msra.mxu1 %v2822_v19  ;;  %v2507_v18 = vld [vmem:[%s3380_s2 + $0x40] sm:$0xff]  ;;  %v2508_v19 = vld [vmem:[%s3380_s2 + $0x48] sm:$0xff] }
  0x10   : > { %s525_s20 = scalar_lea.vmem %s3396_s19, %s3032_s0  ;;  %2830 = vmatprep.subr.bf16.mxu1 %v2917_v3  ;;  %v2837_v21 = vpack.c.bf16 %v2508_v19, %v2507_v18  ;;  %v2514_v39 = vld [vmem:[%s3382_s4 + $0x40] sm:$0xff]  ;;  %v2536_v19 = vld [vmem:[%s3382_s4 + $0x78] sm:$0xff]  ;;  %s533_s28 = scalar_lea.vmem %s3394_s16, %s3032_s0 }
  0x11   : > { %v3038_v8 = vld [vmem:[%s525_s20] sm:$0xff]  ;;  %s529_s20 = scalar_lea.vmem %s3379_s1, %s3032_s0 }
  0x12   : > { %2643 = vmatmul.mubr.msk.f32.vlgmr.msra.gmra.mrb[0].mxu0 %vm552_vm1, %v3038_v8  ;;  %v3070_v20 = vld [vmem:[%s529_s20] sm:$0xff] }
  0x13   : > { %2658 = vmatprep.mubr.msk.f32.mxu0 %vm2918_vm0, %v2919_v6  ;;  %2654 = vmatmul.mubr.msk.f32.vlgmr.msra.gmra.mrb[0].mxu1 %vm552_vm1, %v3070_v20 }
  0x14   : > { %2685 = vmatprep.mubr.msk.f32.mxu1 %vm2918_vm0, %v2919_v6  ;;  %2832 = vmatpush3.bf16.msra.mxu1 %v2831_v57 }
  0x15   : > { %2833 = vmatprep.subr.bf16.mxu1 %v2917_v3 }
  0x18   : > { %2835 = vmatpush3.bf16.msra.mxu1 %v2834_v59  ;;  %v2526_v59 = vld [vmem:[%s3380_s2 + $0x60] sm:$0xff] }
  0x19   : > { %2693 = vmatprep.subr.mxu1 %v2919_v6 }
  0x1b   : > { %2686 = vmatmul.mubr.msk.f32.vlgmr.msra.gmra.mrb[2].mxu1 %vm552_vm1, %v3070_v20 }
  0x1c   : > { %2695 = vmatprep.mubr.msk.f32.mxu1 %vm2918_vm0, %v2919_v6 }
  0xe5   : > { %v622_v10 = vpop.f32.mrb[0].mxu0 }
  0xe6   : > { %v623_v11 = vadd.f32 %v2480_v9, %v622_v10  ;;  %v2644_v12 = vpop.f32.mrb[1].mxu0  ;;  %v706_v34 = vpop.f32.mrb[0].mxu1 }
  0xe7   : > { %v707_v35 = vadd.f32 %v2482_v33, %v706_v34  ;;  %v2655_v36 = vpop.f32.mrb[1].mxu1  ;;  %v2504_v12 = vld [vmem:[%s3384_s6 + $0x8] sm:$0xff]  ;;  %v2512_v34 = vld [vmem:[%s3381_s3 + $0x2] ss:$0 sm:$0xff] }
  0xe8   : > { %v710_v13 = vmul.f32 0.35355338, %v623_v11  ;;  %2657 = vmatpush3.xpose.msk.msra.mxu0 %vm711_vm2, %v623_v11 }
  0xe9   : > { %2661 = vmatprep.subr.mxu0 %v2919_v6 }
  0xeb   : > { %2659 = vmatmul.mubr.msk.f32.vlgmr.msra.gmra.mrb[2].mxu0 %vm711_vm2, %v710_v13 }
  0xec   : > { %2663 = vmatprep.mubr.msk.f32.mxu0 %vm2918_vm0, %v2919_v6  ;;  %2662 = vmatpush3.msra.mxu0 %v707_v35 }
  0xed   : > { %2824 = vmatprep.subr.bf16.mxu0 %v2917_v3 }
  0xee   : > { %v1038_v9 = vpop.f32.mrb[2].mxu1 }
  0xef   : > { %v1039_v10 = vadd.f32 %v2499_v7, %v1038_v9  ;;  %v2687_v11 = vpop.f32.mrb[3].mxu1 }
  0xf1   : > { %2694 = vmatpush3.msra.mxu1 %v1039_v10  ;;  %v2531_v10 = vld [vmem:[%s3381_s3 + $0x3] ss:$0 sm:$0xff] }
  0xf2   : > { %2703 = vmatprep.subr.mxu1 %v2919_v6 }
 0x1be   : > { %v784_v24 = vpop.f32.mrb[2].mxu0 }
 0x1bf   : > { %v788_v25 = vsel %vm540_vm3, %v784_v24, -1e+32  ;;  %v2660_v26 = vpop.f32.mrb[3].mxu0  ;;  %v2509_v24 = vld [vmem:[%s3380_s2 + $0x50] sm:$0xff] }
 0x1c0   : > { %v789_v27 = vsel %vm711_vm2, %v788_v25, -inf }
 0x1c1   : > { %790 = vmax.xlane.f32.xlu0 %v789_v27 }
 0x24e   : > { %v791_v28 = vpop.xlane.xlu0 %790 }
 0x24f   : > { %v792_v29 = vsub.f32 %v788_v25, %v791_v28  ;;  %v2510_v25 = vld [vmem:[%s3380_s2 + $0x58] sm:$0xff] }
 0x250   : > { %v2840_v28 = vpack.c.bf16 %v2510_v25, %v2509_v24 }
 0x251   : > { %v793_v30 = vmul.f32 1.442695, %v792_v29 }
 0x253   : > { %2889 = vpow2.f32 %v793_v30 }
 0x25d   : > { %v2890_v31 = vpop.eup %2889 }
 0x25e   : > { %v795_v32 = vsel %vm711_vm2, %v2890_v31, 0.0 }
 0x25f   : > { %796 = vadd.xlane.f32.xlu0 %v795_v32 }
 0x2ec   : > { %v797_v37 = vpop.xlane.xlu0 %796 }
 0x2ed   : > { %2891 = vrcp.f32 %v797_v37 }
 0x2f7   : > { %v2892_v40 = vpop.eup %2891 }
 0x2f8   : > { %v799_v41 = vmul.f32 %v2892_v40, %v2890_v31  ;;  %v2515_v40 = vld [vmem:[%s3382_s4 + $0x48] sm:$0xff] }
 0x2fa   : > { %v801_v45 = vsel %vm800_vm4, 0.0, %v799_v41  ;;  %v2516_v41 = vld [vmem:[%s3382_s4 + $0x50] sm:$0xff] }
 0x2fb   : > { %2664 = vmatmul.mubr.msk.f32.vlgmr.msra.gmra.mrb[4].mxu0 %vm711_vm2, %v801_v45  ;;  %v2846_v44 = vpack.c.bf16 %v2517_v43, %v2516_v41 }
 0x2fc   : > { %2826 = vmatpush3.bf16.msra.mxu0 %v2825_v42  ;;  %2674 = vmatprep.mubr.msk.f32.mxu0 %vm2918_vm0, %v2919_v6  ;;  %v2843_v42 = vpack.c.bf16 %v2515_v40, %v2514_v39 }
 0x2fd   : > { %2827 = vmatprep.subr.bf16.mxu0 %v2917_v3 }
 0x300   : > { %2829 = vmatpush3.bf16.msra.mxu0 %v2828_v46 }
 0x301   : > { %2688 = vmatprep.subr.mxu0 %v2919_v6 }
 0x303   : > { %2675 = vmatmul.mubr.msk.f32.vlgmr.msra.gmra.mrb[6].mxu0 %vm552_vm1, %v3038_v8 }
 0x304   : > { %2690 = vmatprep.mubr.msk.f32.mxu0 %vm2918_vm0, %v2919_v6 }
 0x3ce   : > { %v871_v47 = vpop.f32.mrb[4].mxu0 }
 0x3cf   : > { %v2665_v48 = vpop.f32.mrb[5].mxu0 }
 0x3d6   : > { %v955_v50 = vpop.f32.mrb[6].mxu0 }
 0x3d7   : > { %v956_v51 = vadd.f32 %v2492_v49, %v955_v50  ;;  %v2676_v52 = vpop.f32.mrb[7].mxu0 }
 0x3d9   : > { %v1042_v53 = vmul.f32 0.35355338, %v956_v51  ;;  %2689 = vmatpush3.xpose.msk.msra.mxu0 %vm711_vm2, %v956_v51 }
 0x3da   : > { %2698 = vmatprep.subr.mxu0 %v2919_v6 }
 0x3dc   : > { %2691 = vmatmul.mubr.msk.f32.vlgmr.msra.gmra.mrb[8].mxu0 %vm711_vm2, %v1042_v53 }
 0x3dd   : > { %2700 = vmatprep.mubr.msk.f32.mxu0 %vm2918_vm0, %v2919_v6  ;;  %2699 = vmatpush3.msra.mxu0 %v2504_v12 }
 0x3de   : > { %2836 = vmatprep.subr.bf16.mxu0 %v2917_v3 }
 0x4af   : > { %v1115_v60 = vpop.f32.mrb[8].mxu0 }
 0x4b0   : > { %v1119_v61 = vsel %vm540_vm3, %v1115_v60, -1e+32  ;;  %v2692_v62 = vpop.f32.mrb[9].mxu0  ;;  %v2527_v60 = vld [vmem:[%s3380_s2 + $0x68] sm:$0xff] }
 0x4b1   : > { %v1120_v63 = vsel %vm711_vm2, %v1119_v61, -inf }
 0x4b2   : > { %1121 = vmax.xlane.f32.xlu1 %v1120_v63  ;;  %v2849_v63 = vpack.c.bf16 %v2527_v60, %v2526_v59  ;;  %v2287_v60 = vld [vmem:[%s3390_s12] sm:$0xff] }
 0x53f   : > { %v1122_v0 = vpop.xlane.xlu1 %1121 }
 0x540   : > { %v1123_v1 = vsub.f32 %v1119_v61, %v1122_v0  ;;  %v2528_v0 = vld [vmem:[%s3380_s2 + $0x70] sm:$0xff] }
 0x542   : > { %v1124_v2 = vmul.f32 1.442695, %v1123_v1  ;;  %v2529_v1 = vld [vmem:[%s3380_s2 + $0x78] sm:$0xff] }
 0x544   : > { %2893 = vpow2.f32 %v1124_v2 }
 0x54e   : > { %v2894_v4 = vpop.eup %2893 }
 0x54f   : > { %v1126_v5 = vsel %vm711_vm2, %v2894_v4, 0.0 }
 0x550   : > { %1127 = vadd.xlane.f32.xlu1 %v1126_v5  ;;  %v2524_v5 = vld [vmem:[%s3384_s6 + $0x10] sm:$0xff] }
 0x5dd   : > { %v1128_v13 = vpop.xlane.xlu1 %1127 }
 0x5de   : > { %2895 = vrcp.f32 %v1128_v13 }
 0x5e8   : > { %v2896_v14 = vpop.eup %2895 }
 0x5e9   : > { %v1130_v15 = vmul.f32 %v2896_v14, %v2894_v4  ;;  %v2852_v4 = vpack.c.bf16 %v2529_v1, %v2528_v0  ;;  %v2290_v0 = vld [vmem:[%s3390_s12 + $0x18] sm:$0xff] }
 0x5eb   : > { %v1131_v17 = vsel %vm800_vm4, 0.0, %v1130_v15  ;;  %v2533_v15 = vld [vmem:[%s3382_s4 + $0x60] sm:$0xff] }
 0x5ec   : > { %2696 = vmatmul.mubr.msk.f32.vlgmr.msra.gmra.mrb[4].mxu1 %vm711_vm2, %v1131_v17  ;;  %v2535_v17 = vld [vmem:[%s3382_s4 + $0x70] sm:$0xff] }
 0x5ed   : > { %2704 = vmatpush3.msra.mxu1 %v875_v16  ;;  %2705 = vmatprep.mubr.msk.f32.mxu1 %vm2918_vm0, %v2919_v6  ;;  %v2534_v16 = vld [vmem:[%s3382_s4 + $0x68] sm:$0xff] }
 0x5ee   : > { %2842 = vmatprep.subr.bf16.mxu1 %v2917_v3  ;;  %v2855_v18 = vpack.c.bf16 %v2534_v16, %v2533_v15 }
 0x5f0   : > { %2706 = vmatmul.mubr.msk.f32.vlgmr.msra.gmra.mrb[6].mxu1 %vm711_vm2, %v871_v47 }
 0x5f1   : > { %2727 = vmatprep.mubr.msk.f32.mxu1 %vm2918_vm0, %v2919_v6  ;;  %2844 = vmatpush3.bf16.msra.mxu1 %v2843_v42 }
 0x5f2   : > { %2845 = vmatprep.subr.bf16.mxu1 %v2917_v3 }
 0x5f5   : > { %2847 = vmatpush3.bf16.msra.mxu1 %v2846_v44 }
 0x5f6   : > { %2735 = vmatprep.subr.mxu1 %v2919_v6 }
 0x5f8   : > { %2728 = vmatmul.mubr.msk.f32.vlgmr.msra.gmra.mrb[8].mxu1 %vm552_vm1, %v3070_v20 }
 0x5f9   : > { %2737 = vmatprep.mubr.msk.f32.mxu1 %vm2918_vm0, %v2919_v6 }
 0x6bf   : > { %v1201_v26 = vpop.f32.mrb[4].mxu1 }
 0x6c0   : > { %v2697_v27 = vpop.f32.mrb[5].mxu1  ;;  %2701 = vmatmul.mubr.msk.f32.vlgmr.msra.gmra.mrb[10].mxu0 %vm711_vm2, %v1201_v26 }
 0x6c1   : > { %2838 = vmatpush3.bf16.msra.mxu0 %v2837_v21  ;;  %2716 = vmatprep.mubr.msk.f32.mxu0 %vm2918_vm0, %v2919_v6  ;;  %v2858_v21 = vpack.c.bf16 %v2536_v19, %v2535_v17  ;;  %v2294_v17 = vld [vmem:[%s3390_s12 + $0x38] sm:$0xff]  ;;  %v2548_v19 = vld [vmem:[%s3389_s11] ss:$0 sm:$0xff] }
 0x6c2   : > { %2839 = vmatprep.subr.bf16.mxu0 %v2917_v3 }
 0x6c3   : > { %v1349_v29 = vpop.f32.mrb[6].mxu1 }
 0x6c4   : > { %v2707_v30 = vpop.f32.mrb[7].mxu1 }
 0x6c5   : > { %2841 = vmatpush3.bf16.msra.mxu0 %v2840_v28 }
 0x6c6   : > { %2730 = vmatprep.subr.mxu0 %v2919_v6 }
 0x6c8   : > { %2717 = vmatmul.mubr.msk.f32.vlgmr.msra.gmra.mrb[12].mxu0 %vm552_vm1, %v3038_v8 }
 0x6c9   : > { %2732 = vmatprep.mubr.msk.f32.mxu0 %vm2918_vm0, %v2919_v6 }
 0x6cb   : > { %v1515_v55 = vpop.f32.mrb[8].mxu1 }
 0x6cc   : > { %v1516_v56 = vadd.f32 %v2519_v54, %v1515_v55  ;;  %v2729_v57 = vpop.f32.mrb[9].mxu1 }
 0x6ce   : > { %2736 = vmatpush3.msra.mxu1 %v1516_v56  ;;  %v2203_v56 = vld [vmem:[%s3388_s10 + $0x8] sm:$0xff] }
 0x6cf   : > { %2848 = vmatprep.subr.bf16.mxu1 %v2917_v3 }
 0x793   : > { %v1276_v31 = vpop.f32.mrb[10].mxu0 }
 0x794   : > { %v3188_v32 = vadd.f32 %v1349_v29, %v1276_v31  ;;  %v2702_v33 = vpop.f32.mrb[11].mxu0 }
 0x79b   : > { %v1432_v35 = vpop.f32.mrb[12].mxu0 }
 0x79c   : > { %v1433_v36 = vadd.f32 %v2512_v34, %v1432_v35  ;;  %v2718_v37 = vpop.f32.mrb[13].mxu0 }
 0x79e   : > { %v1519_v38 = vmul.f32 0.35355338, %v1433_v36  ;;  %2731 = vmatpush3.xpose.msk.msra.mxu0 %vm711_vm2, %v1433_v36 }
 0x79f   : > { %2740 = vmatprep.subr.mxu0 %v2919_v6 }
 0x7a1   : > { %2733 = vmatmul.mubr.msk.f32.vlgmr.msra.gmra.mrb[14].mxu0 %vm711_vm2, %v1519_v38  ;;  %v2543_v38 = vld [vmem:[%s3384_s6 + $0x18] sm:$0xff] }
 0x7a2   : > { %2742 = vmatprep.mubr.msk.f32.mxu0 %vm2918_vm0, %v2919_v6  ;;  %2741 = vmatpush3.msra.mxu0 %v2524_v5 }
 0x7a3   : > { %2854 = vmatprep.subr.bf16.mxu0 %v2917_v3 }
 0x874   : > { %v1592_v45 = vpop.f32.mrb[14].mxu0 }
 0x875   : > { %v1596_v46 = vsel %vm540_vm3, %v1592_v45, -1e+32  ;;  %v2734_v47 = vpop.f32.mrb[15].mxu0 }
 0x876   : > { %v1597_v48 = vsel %vm711_vm2, %v1596_v46, -inf }
 0x877   : > { %1598 = vmax.xlane.f32.xlu0 %v1597_v48 }
 0x904   : > { %v1599_v49 = vpop.xlane.xlu0 %1598 }
 0x905   : > { %v1600_v50 = vsub.f32 %v1596_v46, %v1599_v49  ;;  %v2545_v46 = vld [vmem:[%s3385_s7] ss:$0 sm:$0xff] }
 0x907   : > { %v1601_v51 = vmul.f32 1.442695, %v1600_v50 }
 0x909   : > { %2897 = vpow2.f32 %v1601_v51 }
 0x913   : > { %v2898_v52 = vpop.eup %2897 }
 0x914   : > { %v1603_v53 = vsel %vm711_vm2, %v2898_v52, 0.0 }
 0x915   : > { %1604 = vadd.xlane.f32.xlu1 %v1603_v53 }
 0x9a2   : > { %v1605_v58 = vpop.xlane.xlu1 %1604 }
 0x9a3   : > { %2899 = vrcp.f32 %v1605_v58  ;;  %v2205_v58 = vld [vmem:[%s3388_s10 + $0x18] sm:$0xff] }
 0x9ad   : > { %v2900_v61 = vpop.eup %2899 }
 0x9ae   : > { %v1607_v62 = vmul.f32 %v2900_v61, %v2898_v52  ;;  %v2288_v61 = vld [vmem:[%s3390_s12 + $0x8] sm:$0xff] }
 0x9b0   : > { %v1608_v2 = vsel %vm800_vm4, 0.0, %v1607_v62  ;;  %v2289_v62 = vld [vmem:[%s3390_s12 + $0x10] sm:$0xff] }
 0x9b1   : > { %2738 = vmatmul.mubr.msk.f32.vlgmr.msra.gmra.mrb[10].mxu1 %vm711_vm2, %v1608_v2  ;;  %v2870_v1 = vpack.c.bf16 %v2290_v0, %v2289_v62  ;;  %v2291_v2 = vld [vmem:[%s3390_s12 + $0x20] sm:$0xff] }
 0x9b2   : > { %2850 = vmatpush3.bf16.msra.mxu1 %v2849_v63  ;;  %2753 = vmatprep.mubr.msk.f32.mxu1 %vm2918_vm0, %v2919_v6  ;;  %v2867_v63 = vpack.c.bf16 %v2288_v61, %v2287_v60 }
 0x9b3   : > { %2851 = vmatprep.subr.bf16.mxu1 %v2917_v3 }
 0x9b6   : > { %2853 = vmatpush3.bf16.msra.mxu1 %v2852_v4  ;;  %v2292_v4 = vld [vmem:[%s3390_s12 + $0x28] sm:$0xff] }
 0x9b7   : > { %2767 = vmatprep.subr.mxu1 %v2919_v6  ;;  %v2873_v5 = vpack.c.bf16 %v2292_v4, %v2291_v2 }
 0x9b9   : > { %2754 = vmatmul.mubr.msk.f32.vlgmr.msra.gmra.mrb[12].mxu1 %vm552_vm1, %v3038_v8 }
 0x9ba   : > { %2769 = vmatprep.mubr.msk.f32.mxu1 %vm2918_vm0, %v2919_v6 }
 0xa84   : > { %v1678_v7 = vpop.f32.mrb[10].mxu1 }
 0xa85   : > { %v2739_v9 = vpop.f32.mrb[11].mxu1  ;;  %2743 = vmatmul.mubr.msk.f32.vlgmr.msra.gmra.mrb[16].mxu0 %vm711_vm2, %v1678_v7 }
 0xa86   : > { %2764 = vmatprep.mubr.msk.f32.mxu0 %vm2918_vm0, %v2919_v6  ;;  %2856 = vmatpush3.bf16.msra.mxu0 %v2855_v18 }
 0xa87   : > { %2857 = vmatprep.subr.bf16.mxu0 %v2917_v3 }
 0xa8a   : > { %2859 = vmatpush3.bf16.msra.mxu0 %v2858_v21 }
 0xa8b   : > { %2772 = vmatprep.subr.mxu0 %v2919_v6 }
 0xa8c   : > { %v1837_v11 = vpop.f32.mrb[12].mxu1 }
 0xa8d   : > { %v1838_v12 = vadd.f32 %v2531_v10, %v1837_v11  ;;  %v2755_v13 = vpop.f32.mrb[13].mxu1  ;;  %2765 = vmatmul.mubr.msk.f32.vlgmr.msra.gmra.mrb[18].mxu0 %vm552_vm1, %v3070_v20 }
 0xa8e   : > { %2774 = vmatprep.mubr.msk.f32.mxu0 %vm2918_vm0, %v2919_v6 }
 0xa8f   : > { %v1924_v14 = vmul.f32 0.35355338, %v1838_v12  ;;  %2768 = vmatpush3.xpose.msk.msra.mxu1 %vm711_vm2, %v1838_v12  ;;  %v2546_v12 = vld [vmem:[%s3386_s8] ss:$0 sm:$0xff] }
 0xa90   : > { %2777 = vmatprep.subr.mxu1 %v2919_v6 }
 0xa92   : > { %2770 = vmatmul.mubr.msk.f32.vlgmr.msra.gmra.mrb[14].mxu1 %vm711_vm2, %v1924_v14  ;;  %v2547_v14 = vld [vmem:[%s3387_s9] ss:$0 sm:$0xff] }
 0xa93   : > { %2779 = vmatprep.mubr.msk.f32.mxu1 %vm2918_vm0, %v2919_v6  ;;  %2778 = vmatpush3.msra.mxu1 %v2543_v38 }
 0xa94   : > { %2866 = vmatprep.subr.bf16.mxu1 %v2917_v3 }
 0xb58   : > { %v1753_v24 = vpop.f32.mrb[16].mxu0 }
 0xb59   : > { %v1757_v25 = vadd.f32 %v1753_v24, %v3188_v32  ;;  %v2744_v26 = vpop.f32.mrb[17].mxu0  ;;  %v2538_v32 = vld [vmem:[%s3383_s5 + $0x3] ss:$0 sm:$0xff] }
 0xb60   : > { %v1920_v36 = vpop.f32.mrb[18].mxu0 }
 0xb61   : > { %v1921_v37 = vadd.f32 %v2538_v32, %v1920_v36  ;;  %v2766_v23 = vpop.f32.mrb[19].mxu0 }
 0xb63   : > { %2773 = vmatpush3.msra.mxu0 %v1921_v37 }
 0xb64   : > { %2860 = vmatprep.subr.bf16.mxu0 %v2917_v3 }
 0xb65   : > { %v1997_v27 = vpop.f32.mrb[14].mxu1 }
 0xb66   : > { %v2001_v28 = vsel %vm540_vm3, %v1997_v27, -1e+32  ;;  %v2771_v29 = vpop.f32.mrb[15].mxu1  ;;  %v2550_v27 = vld [vmem:[%s3391_s13] ss:$0 sm:$0xff] }
 0xb67   : > { %v2002_v30 = vsel %vm711_vm2, %v2001_v28, -inf }
 0xb68   : > { %2003 = vmax.xlane.f32.xlu0 %v2002_v30 }
 0xbf5   : > { %v2004_v31 = vpop.xlane.xlu0 %2003 }
 0xbf6   : > { %v2005_v33 = vsub.f32 %v2001_v28, %v2004_v31 }
 0xbf8   : > { %v2006_v34 = vmul.f32 1.442695, %v2005_v33 }
 0xbfa   : > { %2901 = vpow2.f32 %v2006_v34 }
 0xc04   : > { %v2902_v20 = vpop.eup %2901 }
 0xc05   : > { %v2008_v35 = vsel %vm711_vm2, %v2902_v20, 0.0 }
 0xc06   : > { %2009 = vadd.xlane.f32.xlu1 %v2008_v35 }
 0xc93   : > { %v2010_v39 = vpop.xlane.xlu1 %2009 }
 0xc94   : > { %2903 = vrcp.f32 %v2010_v39 }
 0xc9e   : > { %v2904_v40 = vpop.eup %2903 }
 0xc9f   : > { %v2012_v41 = vmul.f32 %v2904_v40, %v2902_v20  ;;  %v2552_v40 = vld [vmem:[%s3392_s14] ss:$0 sm:$0xff] }
 0xca1   : > { %v2013_v42 = vsel %vm800_vm4, 0.0, %v2012_v41 }
 0xca2   : > { %2775 = vmatmul.mubr.msk.f32.vlgmr.msra.gmra.mrb[20].mxu0 %vm711_vm2, %v2013_v42  ;;  %v2553_v42 = vld [vmem:[%s3393_s15] ss:$0 sm:$0xff] }
 0xca3   : > { %2790 = vmatprep.mubr.msk.f32.mxu0 %vm2918_vm0, %v2919_v6 }
 0xd75   : > { %v2083_v43 = vpop.f32.mrb[20].mxu0 }
 0xd76   : > { %v2776_v44 = vpop.f32.mrb[21].mxu0  ;;  %2780 = vmatmul.mubr.msk.f32.vlgmr.msra.gmra.mrb[16].mxu1 %vm711_vm2, %v2083_v43 }
 0xd77   : > { %2809 = vmatprep.mubr.msk.f32.mxu1 %vm2918_vm0, %v2919_v6  ;;  %v2202_v6 = vld [vmem:[%s3388_s10] sm:$0xff]  ;;  %2868 = vmatpush3.bf16.msra.mxu1 %v2867_v63 }
 0xd78   : > { %v2861_v57 = vpack.c.bf16 %v2203_v56, %v2202_v6  ;;  %2869 = vmatprep.subr.bf16.mxu1 %v2917_v3 }
 0xd7a   : > { %2862 = vmatpush3.bf16.msra.mxu0 %v2861_v57 }
 0xd7b   : > { %2863 = vmatprep.subr.bf16.mxu0 %v2917_v3  ;;  %2871 = vmatpush3.bf16.msra.mxu1 %v2870_v1 }
 0xd7c   : > { %2872 = vmatprep.subr.bf16.mxu1 %v2917_v3 }
 0xd7f   : > { %2874 = vmatpush3.bf16.msra.mxu1 %v2873_v5 }
 0xd80   : > { %2875 = vmatprep.subr.bf16.mxu1 %v2917_v3  ;;  %v2293_v3 = vld [vmem:[%s3390_s12 + $0x30] sm:$0xff] }
 0xd81   : > { %v2876_v18 = vpack.c.bf16 %v2294_v17, %v2293_v3 }
 0xd83   : > { %2877 = vmatpush3.bf16.msra.mxu1 %v2876_v18 }
 0xe49   : > { %v2158_v45 = vpop.f32.mrb[16].mxu1 }
 0xe4a   : > { %v2162_v47 = vadd.f32 %v2158_v45, %v1757_v25  ;;  %v2781_v22 = vpop.f32.mrb[17].mxu1 }
 0xe4c   : > { %v2170_v48 = vadd.f32 %v2545_v46, %v2162_v47 }
 0xe4e   : > { %v2171_v49 = vadd.f32 %v2170_v48, %v3038_v8  ;;  %v2204_v8 = vld [vmem:[%s3388_s10 + $0x10] sm:$0xff] }
 0xe4f   : > { %v2864_v59 = vpack.c.bf16 %v2205_v58, %v2204_v8 }
 0xe50   : > { %v2172_v50 = vsel %vm552_vm1, %v2171_v49, 0.0 }
 0xe51   : > { %2173 = vadd.xlane.f32.xlu0 %v2172_v50  ;;  %2865 = vmatpush3.bf16.msra.mxu0 %v2864_v59 }
 0xede   : > { %v2174_v51 = vpop.xlane.xlu0 %2173 }
 0xedf   : > { %v2176_v52 = vmul.f32 0.03125, %v2174_v51 }
 0xee1   : > { %v2177_v53 = vsub.f32 %v2171_v49, %v2176_v52 }
 0xee3   : > { %v2178_v54 = vmul.f32 %v2177_v53, %v2177_v53 }
 0xee5   : > { %v2179_v55 = vsel %vm552_vm1, %v2178_v54, 0.0 }
 0xee6   : > { %2180 = vadd.xlane.f32.xlu1 %v2179_v55 }
 0xf73   : > { %v2181_v7 = vpop.xlane.xlu1 %2180 }
 0xf74   : > { %v2182_v9 = vmul.f32 0.03125, %v2181_v7 }
 0xf76   : > { %v2183_v10 = vadd.f32 1e-05, %v2182_v9 }
 0xf78   : > { %2905 = vrsqrt.f32 %v2183_v10 }
 0xf82   : > { %v2906_v11 = vpop.eup %2905 }
 0xf83   : > { %v2185_v13 = vmul.f32 %v2906_v11, %v2177_v53 }
 0xf85   : > { %v2193_v15 = vmul.f32 %v2546_v12, %v2185_v13 }
 0xf87   : > { %v2201_v16 = vadd.f32 %v2547_v14, %v2193_v15 }
 0xf89   : > { %2791 = vmatmul.mubr.msk.f32.vlgmr.msra.gmra.mrb[22].mxu0 %vm552_vm1, %v2201_v16 }
0x105c   : > { %v2282_v21 = vpop.f32.mrb[22].mxu0 }
0x105d   : > { %v2283_v24 = vadd.f32 %v2548_v19, %v2282_v21  ;;  %v2792_v25 = vpop.f32.mrb[23].mxu0 }
0x105f   : > { %v2286_v26 = vmax.f32 %v2283_v24, 0.0 }
0x1061   : > { %2810 = vmatmul.mubr.msk.f32.vlgmr.msra.gmra.mrb[18].mxu1 %vm2302_vm5, %v2286_v26 }
0x1134   : > { %v2372_v28 = vpop.f32.mrb[18].mxu1 }
0x1135   : > { %v2373_v29 = vadd.f32 %v2550_v27, %v2372_v28  ;;  %v2811_v30 = vpop.f32.mrb[19].mxu1 }
0x1137   : > { %v2376_v31 = vadd.f32 %v2373_v29, %v2201_v16 }
0x1139   : > { %v2377_v33 = vsel %vm552_vm1, %v2376_v31, 0.0 }
0x113a   : > { %2378 = vadd.xlane.f32.xlu0 %v2377_v33 }
0x11c7   : > { %v2379_v34 = vpop.xlane.xlu0 %2378 }
0x11c8   : > { %v2380_v20 = vmul.f32 0.03125, %v2379_v34 }
0x11ca   : > { %v2381_v35 = vsub.f32 %v2376_v31, %v2380_v20 }
0x11cc   : > { %v2382_v32 = vmul.f32 %v2381_v35, %v2381_v35 }
0x11ce   : > { %v2383_v36 = vsel %vm552_vm1, %v2382_v32, 0.0 }
0x11cf   : > { %2384 = vadd.xlane.f32.xlu1 %v2383_v36 }
0x125c   : > { %v2385_v37 = vpop.xlane.xlu1 %2384 }
0x125d   : > { %v2386_v23 = vmul.f32 0.03125, %v2385_v37 }
0x125f   : > { %v2387_v38 = vadd.f32 1e-05, %v2386_v23 }
0x1261   : > { %2907 = vrsqrt.f32 %v2387_v38 }
0x126b   : > { %v2908_v39 = vpop.eup %2907 }
0x126c   : > { %v2389_v41 = vmul.f32 %v2908_v39, %v2381_v35 }
0x126e   : > { %v2397_v43 = vmul.f32 %v2552_v40, %v2389_v41 }
0x1270   : > { %v2405_v44 = vadd.f32 %v2553_v42, %v2397_v43 }
0x1272   : > { %2406 = vst.msk [vmem:[%s533_s28] sm:$0xff] %vm552_vm1, %v2405_v44 }
0x1273 PF: > { %s26_s21 = sadd.s32 1, %s2915_s21  }
0x1274   : > { %p23_p4 = scmp.ge.s32.totalorder %s26_s21, 5  }
0x1276   :  { %25 = sbr.rel (!%p23_p4) target bundleno = 2 (0x2), region = 132 }

// kernel: _rigl_device.5
= control target key start
LH: loop header
LB: loop body
LE: loop exit
PB: predicated region body
PF: predicated region fallthrough
CT: control target
= control target key end

     0   :  { %v2349_v0 = vmov 0.0|0.0   ;;  %vm2350_vm0 = vmmov 0   ;;  %v2351_v4 = vmov 0.0   ;;  %vm71_vm1 = vcmask 261120   ;;  %s2794_s2 = inlined_call_operand.vmem [shape: f32[4,32,8], index: 2, kind: input, shape index: {}]   ;;  %s2795_s0 = inlined_call_operand.vmem [shape: f32[1,8,32], index: 0, kind: input, shape index: {}]   ;;  %s2796_s3 = inlined_call_operand.vmem [shape: f32[4,1,8], index: 3, kind: input, shape index: {}]   ;;  %s2797_s4 = inlined_call_operand.vmem [shape: f32[4,32,8], index: 4, kind: input, shape index: {}]   ;;  %s2798_s1 = inlined_call_operand.vmem [shape: f32[1,8,32], index: 1, kind: input, shape index: {}]   ;;  %s2799_s5 = inlined_call_operand.vmem [shape: f32[4,1,8], index: 5, kind: input, shape index: {}]   ;;  %s2800_s6 = inlined_call_operand.vmem [shape: f32[4,8,32], index: 6, kind: input, shape index: {}]   ;;  %s2801_s7 = inlined_call_operand.vmem [shape: f32[1,32], index: 7, kind: input, shape index: {}]   ;;  %s2802_s10 = inlined_call_operand.vmem [shape: f32[32,64], index: 10, kind: input, shape index: {}]   ;;  %s2803_s12 = inlined_call_operand.vmem [shape: f32[64,32], index: 12, kind: input, shape index: {}]   ;;  %s2804_s8 = inlined_call_operand.vmem [shape: f32[1,32], index: 8, kind: input, shape index: {}]   ;;  %s2805_s9 = inlined_call_operand.vmem [shape: f32[1,32], index: 9, kind: input, shape index: {}]   ;;  %s2806_s11 = inlined_call_operand.vmem [shape: f32[1,64], index: 11, kind: input, shape index: {}]   ;;  %s2807_s13 = inlined_call_operand.vmem [shape: f32[1,32], index: 13, kind: input, shape index: {}]   ;;  %s2808_s14 = inlined_call_operand.vmem [shape: f32[1,32], index: 14, kind: input, shape index: {}]   ;;  %s2809_s15 = inlined_call_operand.vmem [shape: f32[1,32], index: 15, kind: input, shape index: {}]   ;;  %s2810_s16 = inlined_call_operand.vmem [shape: f32[1,8,32], index: 16, kind: output, shape index: {}]  }
   0x1   :  { %2812 = sst [smem:[#allocation2_spill]] %s2794_s2  ;;  %2260 = vmatprep.subr.bf16.mxu0 %v2349_v0  ;;  %2090 = vmatprep.mubr.msk.f32.mxu0 %vm2350_vm0, %v2351_v4  ;;  %v2459_v8 = vld [vmem:[%s2795_s0] sm:$0xff]  ;;  %vm230_vm2 = vcmask 64512   ;;  %v146_v15 = vld [vmem:[%s2797_s4 + $0x8] sm:$0xff]  ;;  %v147_v16 = vld [vmem:[%s2797_s4 + $0x10] sm:$0xff]  ;;  %v55_v21 = vlaneseq  ;;  %vm1821_vm5 = vcmask 523264  }
   0x2   :  { %s2813_s23 = sld [smem:[#allocation2_spill]]  ;;  %2266 = vmatprep.subr.bf16.mxu1 %v2349_v0  ;;  %2101 = vmatprep.mubr.msk.f32.mxu1 %vm2350_vm0, %v2351_v4  ;;  %v1930_v9 = vld [vmem:[%s2796_s3] ss:$0 sm:$0xff]  ;;  %v148_v18 = vld [vmem:[%s2797_s4 + $0x18] sm:$0xff]  ;;  %v1942_v49 = vld [vmem:[%s2796_s3 + $0x1] ss:$0 sm:$0xff] }
   0x3   :  { %v145_v14 = vld [vmem:[%s2797_s4] sm:$0xff]  ;;  %v2270_v19 = vpack.c.bf16 %v148_v18, %v147_v16  ;;  %v2497_v22 = vshrl.u32 %v55_v21, 7  ;;  %v2499_v23 = vand.u32 127, %v55_v21  ;;  %v1945_v55 = vld [vmem:[%s2797_s4 + $0x28] sm:$0xff]  ;;  %v1946_v56 = vld [vmem:[%s2797_s4 + $0x30] sm:$0xff] }
   0x4   :  { %v2267_v17 = vpack.c.bf16 %v146_v15, %v145_v14  ;;  %v2490_v20 = vld [vmem:[%s2798_s1] sm:$0xff]  ;;  %v1947_v58 = vld [vmem:[%s2797_s4 + $0x38] sm:$0xff] }
   0x5   :  { %vm59_vm3 = vcmp.lt.s32.totalorder %v2499_v23, %v2497_v22  ;;  %v1932_v34 = vld [vmem:[%s2799_s5] ss:$0 sm:$0xff]  ;;  %vm319_vm4 = vcmp.eq.s32.totalorder %v2497_v22, 0  ;;  %v2282_v59 = vpack.c.bf16 %v1947_v58, %v1946_v56 }
   0x6   :  { %2268 = vmatpush3.bf16.msra.mxu1 %v2267_v17  ;;  %v1944_v54 = vld [vmem:[%s2797_s4 + $0x20] sm:$0xff] }
   0x7   :  { %2269 = vmatprep.subr.bf16.mxu1 %v2349_v0  ;;  %v2279_v57 = vpack.c.bf16 %v1945_v55, %v1944_v54  ;;  %v394_v16 = vld [vmem:[%s2800_s6] sm:$0xff] }
   0x8   :  { %v60_v1 = vld [vmem:[%s2813_s23] sm:$0xff]  ;;  %v61_v2 = vld [vmem:[%s2813_s23 + $0x8] sm:$0xff]  ;;  %v62_v3 = vld [vmem:[%s2813_s23 + $0x10] sm:$0xff] }
   0x9   :  { %v2261_v5 = vpack.c.bf16 %v61_v2, %v60_v1  ;;  %v63_v6 = vld [vmem:[%s2813_s23 + $0x18] sm:$0xff]  ;;  %v1937_v38 = vld [vmem:[%s2813_s23 + $0x20] sm:$0xff]  ;;  %v1938_v39 = vld [vmem:[%s2813_s23 + $0x28] sm:$0xff] }
   0xa   :  { %v2264_v7 = vpack.c.bf16 %v63_v6, %v62_v3  ;;  %2271 = vmatpush3.bf16.msra.mxu1 %v2270_v19  ;;  %v2273_v42 = vpack.c.bf16 %v1938_v39, %v1937_v38  ;;  %v1939_v43 = vld [vmem:[%s2813_s23 + $0x30] sm:$0xff]  ;;  %v1940_v44 = vld [vmem:[%s2813_s23 + $0x38] sm:$0xff]  ;;  %v1957_v18 = vld [vmem:[%s2813_s23 + $0x40] sm:$0xff] }
   0xb   :  { %2262 = vmatpush3.bf16.msra.mxu0 %v2261_v5  ;;  %2278 = vmatprep.subr.bf16.mxu1 %v2349_v0  ;;  %v2276_v46 = vpack.c.bf16 %v1940_v44, %v1939_v43  ;;  %v1958_v19 = vld [vmem:[%s2813_s23 + $0x48] sm:$0xff]  ;;  %v1964_v39 = vld [vmem:[%s2797_s4 + $0x40] sm:$0xff]  ;;  %v1967_v43 = vld [vmem:[%s2797_s4 + $0x58] sm:$0xff] }
   0xc   :  { %2263 = vmatprep.subr.bf16.mxu0 %v2349_v0  ;;  %v2285_v21 = vpack.c.bf16 %v1958_v19, %v1957_v18  ;;  %v1969_v54 = vld [vmem:[%s2799_s5 + $0x2] ss:$0 sm:$0xff]  ;;  %v1986_v19 = vld [vmem:[%s2797_s4 + $0x78] sm:$0xff] }
   0xd   :  { %2102 = vmatmul.mubr.msk.f32.vlgmr.msra.gmra.mrb[0].mxu1 %vm71_vm1, %v2490_v20 }
   0xe   :  { %2133 = vmatprep.mubr.msk.f32.mxu1 %vm2350_vm0, %v2351_v4  ;;  %2280 = vmatpush3.bf16.msra.mxu1 %v2279_v57 }
   0xf   :  { %2265 = vmatpush3.bf16.msra.mxu0 %v2264_v7  ;;  %2281 = vmatprep.subr.bf16.mxu1 %v2349_v0  ;;  %v1949_v7 = vld [vmem:[%s2799_s5 + $0x1] ss:$0 sm:$0xff] }
  0x10   :  { %2104 = vmatprep.subr.mxu0 %v2351_v4 }
  0x12   :  { %2091 = vmatmul.mubr.msk.f32.vlgmr.msra.gmra.mrb[0].mxu0 %vm71_vm1, %v2459_v8  ;;  %2283 = vmatpush3.bf16.msra.mxu1 %v2282_v59  ;;  %v1976_v59 = vld [vmem:[%s2813_s23 + $0x60] sm:$0xff] }
  0x13   :  { %2106 = vmatprep.mubr.msk.f32.mxu0 %vm2350_vm0, %v2351_v4  ;;  %2141 = vmatprep.subr.mxu1 %v2351_v4 }
  0x15   :  { %2134 = vmatmul.mubr.msk.f32.vlgmr.msra.gmra.mrb[2].mxu1 %vm71_vm1, %v2490_v20 }
  0x16   :  { %2143 = vmatprep.mubr.msk.f32.mxu1 %vm2350_vm0, %v2351_v4 }
  0xe0   :  { %v225_v33 = vpop.f32.mrb[0].mxu1 }
  0xe1   :  { %v2103_v35 = vpop.f32.mrb[1].mxu1  ;;  %v226_v36 = vadd.f32 %v1932_v34, %v225_v33  ;;  %v1962_v34 = vld [vmem:[%s2796_s3 + $0x2] ss:$0 sm:$0xff] }
  0xe5   :  { %v141_v10 = vpop.f32.mrb[0].mxu0 }
  0xe6   :  { %v142_v11 = vadd.f32 %v1930_v9, %v141_v10  ;;  %v2092_v12 = vpop.f32.mrb[1].mxu0 }
  0xe7   :  { %v1954_v12 = vld [vmem:[%s2800_s6 + $0x8] sm:$0xff] }
  0xe8   :  { %v229_v13 = vmul.f32 0.35355338, %v142_v11  ;;  %2105 = vmatpush3.xpose.msk.msra.mxu0 %vm230_vm2, %v142_v11  ;;  %v557_v9 = vpop.f32.mrb[2].mxu1 }
  0xe9   :  { %2109 = vmatprep.subr.mxu0 %v2351_v4  ;;  %v558_v10 = vadd.f32 %v1949_v7, %v557_v9  ;;  %v2135_v11 = vpop.f32.mrb[3].mxu1 }
  0xeb   :  { %2107 = vmatmul.mubr.msk.f32.vlgmr.msra.gmra.mrb[2].mxu0 %vm230_vm2, %v229_v13  ;;  %2142 = vmatpush3.msra.mxu1 %v558_v10  ;;  %v1981_v10 = vld [vmem:[%s2796_s3 + $0x3] ss:$0 sm:$0xff] }
  0xec   :  { %2111 = vmatprep.mubr.msk.f32.mxu0 %vm2350_vm0, %v2351_v4  ;;  %2110 = vmatpush3.msra.mxu0 %v226_v36 }
  0xed   :  { %2272 = vmatprep.subr.bf16.mxu0 %v2349_v0  ;;  %2151 = vmatprep.subr.mxu1 %v2351_v4 }
 0x1be   :  { %v303_v24 = vpop.f32.mrb[2].mxu0 }
 0x1bf   :  { %v307_v25 = vsel %vm59_vm3, %v303_v24, -1e+32  ;;  %v2108_v26 = vpop.f32.mrb[3].mxu0  ;;  %v1959_v24 = vld [vmem:[%s2813_s23 + $0x50] sm:$0xff] }
 0x1c0   :  { %v308_v27 = vsel %vm230_vm2, %v307_v25, -inf }
 0x1c1   :  { %309 = vmax.xlane.f32.xlu0 %v308_v27 }
 0x24e   :  { %v310_v28 = vpop.xlane.xlu0 %309 }
 0x24f   :  { %v311_v29 = vsub.f32 %v307_v25, %v310_v28  ;;  %v1960_v25 = vld [vmem:[%s2813_s23 + $0x58] sm:$0xff] }
 0x250   :  { %v2288_v28 = vpack.c.bf16 %v1960_v25, %v1959_v24 }
 0x251   :  { %v312_v30 = vmul.f32 1.442695, %v311_v29 }
 0x253   :  { %2329 = vpow2.f32 %v312_v30 }
 0x25d   :  { %v2330_v31 = vpop.eup %2329 }
 0x25e   :  { %v314_v32 = vsel %vm230_vm2, %v2330_v31, 0.0 }
 0x25f   :  { %315 = vadd.xlane.f32.xlu0 %v314_v32 }
 0x2ec   :  { %v316_v37 = vpop.xlane.xlu0 %315 }
 0x2ed   :  { %2331 = vrcp.f32 %v316_v37 }
 0x2f7   :  { %v2332_v40 = vpop.eup %2331 }
 0x2f8   :  { %v318_v41 = vmul.f32 %v2332_v40, %v2330_v31  ;;  %v1965_v40 = vld [vmem:[%s2797_s4 + $0x48] sm:$0xff] }
 0x2fa   :  { %v320_v45 = vsel %vm319_vm4, 0.0, %v318_v41  ;;  %v1966_v41 = vld [vmem:[%s2797_s4 + $0x50] sm:$0xff] }
 0x2fb   :  { %2112 = vmatmul.mubr.msk.f32.vlgmr.msra.gmra.mrb[4].mxu0 %vm230_vm2, %v320_v45  ;;  %v2294_v44 = vpack.c.bf16 %v1967_v43, %v1966_v41 }
 0x2fc   :  { %2274 = vmatpush3.bf16.msra.mxu0 %v2273_v42  ;;  %2122 = vmatprep.mubr.msk.f32.mxu0 %vm2350_vm0, %v2351_v4  ;;  %v2291_v42 = vpack.c.bf16 %v1965_v40, %v1964_v39 }
 0x2fd   :  { %2275 = vmatprep.subr.bf16.mxu0 %v2349_v0 }
 0x300   :  { %2277 = vmatpush3.bf16.msra.mxu0 %v2276_v46 }
 0x301   :  { %2136 = vmatprep.subr.mxu0 %v2351_v4 }
 0x303   :  { %2123 = vmatmul.mubr.msk.f32.vlgmr.msra.gmra.mrb[6].mxu0 %vm71_vm1, %v2459_v8 }
 0x304   :  { %2138 = vmatprep.mubr.msk.f32.mxu0 %vm2350_vm0, %v2351_v4 }
 0x3ce   :  { %v390_v47 = vpop.f32.mrb[4].mxu0 }
 0x3cf   :  { %v2113_v48 = vpop.f32.mrb[5].mxu0 }
 0x3d6   :  { %v474_v50 = vpop.f32.mrb[6].mxu0 }
 0x3d7   :  { %v475_v51 = vadd.f32 %v1942_v49, %v474_v50  ;;  %v2124_v52 = vpop.f32.mrb[7].mxu0 }
 0x3d9   :  { %v561_v53 = vmul.f32 0.35355338, %v475_v51  ;;  %2137 = vmatpush3.xpose.msk.msra.mxu0 %vm230_vm2, %v475_v51 }
 0x3da   :  { %2146 = vmatprep.subr.mxu0 %v2351_v4 }
 0x3dc   :  { %2139 = vmatmul.mubr.msk.f32.vlgmr.msra.gmra.mrb[8].mxu0 %vm230_vm2, %v561_v53 }
 0x3dd   :  { %2148 = vmatprep.mubr.msk.f32.mxu0 %vm2350_vm0, %v2351_v4  ;;  %2147 = vmatpush3.msra.mxu0 %v1954_v12 }
 0x3de   :  { %2284 = vmatprep.subr.bf16.mxu0 %v2349_v0 }
 0x4af   :  { %v634_v60 = vpop.f32.mrb[8].mxu0 }
 0x4b0   :  { %v638_v61 = vsel %vm59_vm3, %v634_v60, -1e+32  ;;  %v2140_v62 = vpop.f32.mrb[9].mxu0  ;;  %v1977_v60 = vld [vmem:[%s2813_s23 + $0x68] sm:$0xff] }
 0x4b1   :  { %v639_v63 = vsel %vm230_vm2, %v638_v61, -inf }
 0x4b2   :  { %640 = vmax.xlane.f32.xlu1 %v639_v63  ;;  %v2297_v63 = vpack.c.bf16 %v1977_v60, %v1976_v59  ;;  %v1806_v60 = vld [vmem:[%s2803_s12] sm:$0xff] }
 0x53f   :  { %v641_v1 = vpop.xlane.xlu1 %640 }
 0x540   :  { %v642_v2 = vsub.f32 %v638_v61, %v641_v1  ;;  %v1978_v1 = vld [vmem:[%s2813_s23 + $0x70] sm:$0xff] }
 0x542   :  { %v643_v3 = vmul.f32 1.442695, %v642_v2  ;;  %v1979_v2 = vld [vmem:[%s2813_s23 + $0x78] sm:$0xff] }
 0x544   :  { %2333 = vpow2.f32 %v643_v3 }
 0x54e   :  { %v2334_v5 = vpop.eup %2333 }
 0x54f   :  { %v645_v6 = vsel %vm230_vm2, %v2334_v5, 0.0 }
 0x550   :  { %646 = vadd.xlane.f32.xlu1 %v645_v6  ;;  %v1974_v6 = vld [vmem:[%s2800_s6 + $0x10] sm:$0xff] }
 0x5dd   :  { %v647_v13 = vpop.xlane.xlu1 %646 }
 0x5de   :  { %2335 = vrcp.f32 %v647_v13 }
 0x5e8   :  { %v2336_v14 = vpop.eup %2335 }
 0x5e9   :  { %v649_v15 = vmul.f32 %v2336_v14, %v2334_v5  ;;  %v2300_v5 = vpack.c.bf16 %v1979_v2, %v1978_v1  ;;  %v1809_v1 = vld [vmem:[%s2803_s12 + $0x18] sm:$0xff] }
 0x5eb   :  { %v650_v17 = vsel %vm319_vm4, 0.0, %v649_v15  ;;  %v1983_v15 = vld [vmem:[%s2797_s4 + $0x60] sm:$0xff] }
 0x5ec   :  { %2144 = vmatmul.mubr.msk.f32.vlgmr.msra.gmra.mrb[4].mxu1 %vm230_vm2, %v650_v17  ;;  %v1985_v17 = vld [vmem:[%s2797_s4 + $0x70] sm:$0xff] }
 0x5ed   :  { %2152 = vmatpush3.msra.mxu1 %v394_v16  ;;  %2153 = vmatprep.mubr.msk.f32.mxu1 %vm2350_vm0, %v2351_v4  ;;  %v1984_v16 = vld [vmem:[%s2797_s4 + $0x68] sm:$0xff] }
 0x5ee   :  { %2290 = vmatprep.subr.bf16.mxu1 %v2349_v0  ;;  %v2303_v18 = vpack.c.bf16 %v1984_v16, %v1983_v15 }
 0x5f0   :  { %2154 = vmatmul.mubr.msk.f32.vlgmr.msra.gmra.mrb[6].mxu1 %vm230_vm2, %v390_v47 }
 0x5f1   :  { %2175 = vmatprep.mubr.msk.f32.mxu1 %vm2350_vm0, %v2351_v4  ;;  %2292 = vmatpush3.bf16.msra.mxu1 %v2291_v42 }
 0x5f2   :  { %2293 = vmatprep.subr.bf16.mxu1 %v2349_v0 }
 0x5f5   :  { %2295 = vmatpush3.bf16.msra.mxu1 %v2294_v44 }
 0x5f6   :  { %2183 = vmatprep.subr.mxu1 %v2351_v4 }
 0x5f8   :  { %2176 = vmatmul.mubr.msk.f32.vlgmr.msra.gmra.mrb[8].mxu1 %vm71_vm1, %v2490_v20 }
 0x5f9   :  { %2185 = vmatprep.mubr.msk.f32.mxu1 %vm2350_vm0, %v2351_v4 }
 0x6bf   :  { %v720_v26 = vpop.f32.mrb[4].mxu1 }
 0x6c0   :  { %v2145_v27 = vpop.f32.mrb[5].mxu1  ;;  %2149 = vmatmul.mubr.msk.f32.vlgmr.msra.gmra.mrb[10].mxu0 %vm230_vm2, %v720_v26 }
 0x6c1   :  { %2286 = vmatpush3.bf16.msra.mxu0 %v2285_v21  ;;  %2164 = vmatprep.mubr.msk.f32.mxu0 %vm2350_vm0, %v2351_v4  ;;  %v2306_v21 = vpack.c.bf16 %v1986_v19, %v1985_v17  ;;  %v1813_v17 = vld [vmem:[%s2803_s12 + $0x38] sm:$0xff]  ;;  %v1998_v19 = vld [vmem:[%s2806_s11] ss:$0 sm:$0xff] }
 0x6c2   :  { %2287 = vmatprep.subr.bf16.mxu0 %v2349_v0 }
 0x6c3   :  { %v868_v29 = vpop.f32.mrb[6].mxu1 }
 0x6c4   :  { %v2155_v30 = vpop.f32.mrb[7].mxu1 }
 0x6c5   :  { %2289 = vmatpush3.bf16.msra.mxu0 %v2288_v28 }
 0x6c6   :  { %2178 = vmatprep.subr.mxu0 %v2351_v4 }
 0x6c8   :  { %2165 = vmatmul.mubr.msk.f32.vlgmr.msra.gmra.mrb[12].mxu0 %vm71_vm1, %v2459_v8 }
 0x6c9   :  { %2180 = vmatprep.mubr.msk.f32.mxu0 %vm2350_vm0, %v2351_v4 }
 0x6cb   :  { %v1034_v55 = vpop.f32.mrb[8].mxu1 }
 0x6cc   :  { %v1035_v56 = vadd.f32 %v1969_v54, %v1034_v55  ;;  %v2177_v57 = vpop.f32.mrb[9].mxu1 }
 0x6ce   :  { %2184 = vmatpush3.msra.mxu1 %v1035_v56  ;;  %v1722_v56 = vld [vmem:[%s2802_s10 + $0x8] sm:$0xff] }
 0x6cf   :  { %2296 = vmatprep.subr.bf16.mxu1 %v2349_v0 }
 0x793   :  { %v795_v31 = vpop.f32.mrb[10].mxu0 }
 0x794   :  { %v2608_v32 = vadd.f32 %v868_v29, %v795_v31  ;;  %v2150_v33 = vpop.f32.mrb[11].mxu0 }
 0x79b   :  { %v951_v35 = vpop.f32.mrb[12].mxu0 }
 0x79c   :  { %v952_v36 = vadd.f32 %v1962_v34, %v951_v35  ;;  %v2166_v37 = vpop.f32.mrb[13].mxu0 }
 0x79e   :  { %v1038_v38 = vmul.f32 0.35355338, %v952_v36  ;;  %2179 = vmatpush3.xpose.msk.msra.mxu0 %vm230_vm2, %v952_v36 }
 0x79f   :  { %2188 = vmatprep.subr.mxu0 %v2351_v4 }
 0x7a1   :  { %2181 = vmatmul.mubr.msk.f32.vlgmr.msra.gmra.mrb[14].mxu0 %vm230_vm2, %v1038_v38  ;;  %v1993_v38 = vld [vmem:[%s2800_s6 + $0x18] sm:$0xff] }
 0x7a2   :  { %2190 = vmatprep.mubr.msk.f32.mxu0 %vm2350_vm0, %v2351_v4  ;;  %2189 = vmatpush3.msra.mxu0 %v1974_v6 }
 0x7a3   :  { %2302 = vmatprep.subr.bf16.mxu0 %v2349_v0 }
 0x874   :  { %v1111_v45 = vpop.f32.mrb[14].mxu0 }
 0x875   :  { %v1115_v46 = vsel %vm59_vm3, %v1111_v45, -1e+32  ;;  %v2182_v47 = vpop.f32.mrb[15].mxu0 }
 0x876   :  { %v1116_v48 = vsel %vm230_vm2, %v1115_v46, -inf }
 0x877   :  { %1117 = vmax.xlane.f32.xlu0 %v1116_v48 }
 0x904   :  { %v1118_v49 = vpop.xlane.xlu0 %1117 }
 0x905   :  { %v1119_v50 = vsub.f32 %v1115_v46, %v1118_v49  ;;  %v1995_v46 = vld [vmem:[%s2801_s7] ss:$0 sm:$0xff] }
 0x907   :  { %v1120_v51 = vmul.f32 1.442695, %v1119_v50 }
 0x909   :  { %2337 = vpow2.f32 %v1120_v51 }
 0x913   :  { %v2338_v52 = vpop.eup %2337 }
 0x914   :  { %v1122_v53 = vsel %vm230_vm2, %v2338_v52, 0.0 }
 0x915   :  { %1123 = vadd.xlane.f32.xlu1 %v1122_v53 }
 0x9a2   :  { %v1124_v58 = vpop.xlane.xlu1 %1123 }
 0x9a3   :  { %2339 = vrcp.f32 %v1124_v58  ;;  %v1724_v58 = vld [vmem:[%s2802_s10 + $0x18] sm:$0xff] }
 0x9ad   :  { %v2340_v61 = vpop.eup %2339 }
 0x9ae   :  { %v1126_v62 = vmul.f32 %v2340_v61, %v2338_v52  ;;  %v1807_v61 = vld [vmem:[%s2803_s12 + $0x8] sm:$0xff] }
 0x9b0   :  { %v1127_v3 = vsel %vm319_vm4, 0.0, %v1126_v62  ;;  %v1808_v62 = vld [vmem:[%s2803_s12 + $0x10] sm:$0xff] }
 0x9b1   :  { %2186 = vmatmul.mubr.msk.f32.vlgmr.msra.gmra.mrb[10].mxu1 %vm230_vm2, %v1127_v3  ;;  %v2318_v2 = vpack.c.bf16 %v1809_v1, %v1808_v62  ;;  %v1810_v3 = vld [vmem:[%s2803_s12 + $0x20] sm:$0xff] }
 0x9b2   :  { %2298 = vmatpush3.bf16.msra.mxu1 %v2297_v63  ;;  %2201 = vmatprep.mubr.msk.f32.mxu1 %vm2350_vm0, %v2351_v4  ;;  %v2315_v63 = vpack.c.bf16 %v1807_v61, %v1806_v60 }
 0x9b3   :  { %2299 = vmatprep.subr.bf16.mxu1 %v2349_v0 }
 0x9b6   :  { %2301 = vmatpush3.bf16.msra.mxu1 %v2300_v5  ;;  %v1811_v5 = vld [vmem:[%s2803_s12 + $0x28] sm:$0xff] }
 0x9b7   :  { %2215 = vmatprep.subr.mxu1 %v2351_v4  ;;  %v2321_v6 = vpack.c.bf16 %v1811_v5, %v1810_v3 }
 0x9b9   :  { %2202 = vmatmul.mubr.msk.f32.vlgmr.msra.gmra.mrb[12].mxu1 %vm71_vm1, %v2459_v8 }
 0x9ba   :  { %2217 = vmatprep.mubr.msk.f32.mxu1 %vm2350_vm0, %v2351_v4 }
 0xa84   :  { %v1197_v7 = vpop.f32.mrb[10].mxu1 }
 0xa85   :  { %v2187_v9 = vpop.f32.mrb[11].mxu1  ;;  %2191 = vmatmul.mubr.msk.f32.vlgmr.msra.gmra.mrb[16].mxu0 %vm230_vm2, %v1197_v7 }
 0xa86   :  { %2212 = vmatprep.mubr.msk.f32.mxu0 %vm2350_vm0, %v2351_v4  ;;  %2304 = vmatpush3.bf16.msra.mxu0 %v2303_v18 }
 0xa87   :  { %2305 = vmatprep.subr.bf16.mxu0 %v2349_v0 }
 0xa8a   :  { %2307 = vmatpush3.bf16.msra.mxu0 %v2306_v21 }
 0xa8b   :  { %2220 = vmatprep.subr.mxu0 %v2351_v4 }
 0xa8c   :  { %v1356_v11 = vpop.f32.mrb[12].mxu1 }
 0xa8d   :  { %v1357_v12 = vadd.f32 %v1981_v10, %v1356_v11  ;;  %v2203_v13 = vpop.f32.mrb[13].mxu1  ;;  %2213 = vmatmul.mubr.msk.f32.vlgmr.msra.gmra.mrb[18].mxu0 %vm71_vm1, %v2490_v20 }
 0xa8e   :  { %2222 = vmatprep.mubr.msk.f32.mxu0 %vm2350_vm0, %v2351_v4 }
 0xa8f   :  { %v1443_v14 = vmul.f32 0.35355338, %v1357_v12  ;;  %2216 = vmatpush3.xpose.msk.msra.mxu1 %vm230_vm2, %v1357_v12  ;;  %v1996_v12 = vld [vmem:[%s2804_s8] ss:$0 sm:$0xff] }
 0xa90   :  { %2225 = vmatprep.subr.mxu1 %v2351_v4 }
 0xa92   :  { %2218 = vmatmul.mubr.msk.f32.vlgmr.msra.gmra.mrb[14].mxu1 %vm230_vm2, %v1443_v14  ;;  %v1997_v14 = vld [vmem:[%s2805_s9] ss:$0 sm:$0xff] }
 0xa93   :  { %2227 = vmatprep.mubr.msk.f32.mxu1 %vm2350_vm0, %v2351_v4  ;;  %2226 = vmatpush3.msra.mxu1 %v1993_v38 }
 0xa94   :  { %2314 = vmatprep.subr.bf16.mxu1 %v2349_v0 }
 0xb58   :  { %v1272_v24 = vpop.f32.mrb[16].mxu0 }
 0xb59   :  { %v1276_v25 = vadd.f32 %v1272_v24, %v2608_v32  ;;  %v2192_v26 = vpop.f32.mrb[17].mxu0  ;;  %v1988_v32 = vld [vmem:[%s2799_s5 + $0x3] ss:$0 sm:$0xff] }
 0xb60   :  { %v1439_v36 = vpop.f32.mrb[18].mxu0 }
 0xb61   :  { %v1440_v37 = vadd.f32 %v1988_v32, %v1439_v36  ;;  %v2214_v23 = vpop.f32.mrb[19].mxu0 }
 0xb63   :  { %2221 = vmatpush3.msra.mxu0 %v1440_v37 }
 0xb64   :  { %2308 = vmatprep.subr.bf16.mxu0 %v2349_v0 }
 0xb65   :  { %v1516_v27 = vpop.f32.mrb[14].mxu1 }
 0xb66   :  { %v1520_v28 = vsel %vm59_vm3, %v1516_v27, -1e+32  ;;  %v2219_v29 = vpop.f32.mrb[15].mxu1  ;;  %v2000_v27 = vld [vmem:[%s2807_s13] ss:$0 sm:$0xff] }
 0xb67   :  { %v1521_v30 = vsel %vm230_vm2, %v1520_v28, -inf }
 0xb68   :  { %1522 = vmax.xlane.f32.xlu0 %v1521_v30 }
 0xbf5   :  { %v1523_v31 = vpop.xlane.xlu0 %1522 }
 0xbf6   :  { %v1524_v33 = vsub.f32 %v1520_v28, %v1523_v31 }
 0xbf8   :  { %v1525_v34 = vmul.f32 1.442695, %v1524_v33 }
 0xbfa   :  { %2341 = vpow2.f32 %v1525_v34 }
 0xc04   :  { %v2342_v20 = vpop.eup %2341 }
 0xc05   :  { %v1527_v35 = vsel %vm230_vm2, %v2342_v20, 0.0 }
 0xc06   :  { %1528 = vadd.xlane.f32.xlu1 %v1527_v35 }
 0xc93   :  { %v1529_v39 = vpop.xlane.xlu1 %1528 }
 0xc94   :  { %2343 = vrcp.f32 %v1529_v39 }
 0xc9e   :  { %v2344_v40 = vpop.eup %2343 }
 0xc9f   :  { %v1531_v41 = vmul.f32 %v2344_v40, %v2342_v20  ;;  %v2002_v40 = vld [vmem:[%s2808_s14] ss:$0 sm:$0xff] }
 0xca1   :  { %v1532_v42 = vsel %vm319_vm4, 0.0, %v1531_v41 }
 0xca2   :  { %2223 = vmatmul.mubr.msk.f32.vlgmr.msra.gmra.mrb[20].mxu0 %vm230_vm2, %v1532_v42  ;;  %v2003_v42 = vld [vmem:[%s2809_s15] ss:$0 sm:$0xff] }
 0xca3   :  { %2238 = vmatprep.mubr.msk.f32.mxu0 %vm2350_vm0, %v2351_v4 }
 0xd75   :  { %v1602_v43 = vpop.f32.mrb[20].mxu0 }
 0xd76   :  { %v2224_v44 = vpop.f32.mrb[21].mxu0  ;;  %2228 = vmatmul.mubr.msk.f32.vlgmr.msra.gmra.mrb[16].mxu1 %vm230_vm2, %v1602_v43 }
 0xd77   :  { %2257 = vmatprep.mubr.msk.f32.mxu1 %vm2350_vm0, %v2351_v4  ;;  %v1721_v4 = vld [vmem:[%s2802_s10] sm:$0xff]  ;;  %2316 = vmatpush3.bf16.msra.mxu1 %v2315_v63 }
 0xd78   :  { %v2309_v57 = vpack.c.bf16 %v1722_v56, %v1721_v4  ;;  %2317 = vmatprep.subr.bf16.mxu1 %v2349_v0 }
 0xd7a   :  { %2310 = vmatpush3.bf16.msra.mxu0 %v2309_v57 }
 0xd7b   :  { %2311 = vmatprep.subr.bf16.mxu0 %v2349_v0  ;;  %2319 = vmatpush3.bf16.msra.mxu1 %v2318_v2 }
 0xd7c   :  { %2320 = vmatprep.subr.bf16.mxu1 %v2349_v0 }
 0xd7f   :  { %2322 = vmatpush3.bf16.msra.mxu1 %v2321_v6 }
 0xd80   :  { %2323 = vmatprep.subr.bf16.mxu1 %v2349_v0  ;;  %v1812_v0 = vld [vmem:[%s2803_s12 + $0x30] sm:$0xff] }
 0xd81   :  { %v2324_v18 = vpack.c.bf16 %v1813_v17, %v1812_v0 }
 0xd83   :  { %2325 = vmatpush3.bf16.msra.mxu1 %v2324_v18 }
 0xe49   :  { %v1677_v45 = vpop.f32.mrb[16].mxu1 }
 0xe4a   :  { %v1681_v47 = vadd.f32 %v1677_v45, %v1276_v25  ;;  %v2229_v22 = vpop.f32.mrb[17].mxu1 }
 0xe4c   :  { %v1689_v48 = vadd.f32 %v1995_v46, %v1681_v47 }
 0xe4e   :  { %v1690_v49 = vadd.f32 %v1689_v48, %v2459_v8  ;;  %v1723_v8 = vld [vmem:[%s2802_s10 + $0x10] sm:$0xff] }
 0xe4f   :  { %v2312_v59 = vpack.c.bf16 %v1724_v58, %v1723_v8 }
 0xe50   :  { %v1691_v50 = vsel %vm71_vm1, %v1690_v49, 0.0 }
 0xe51   :  { %1692 = vadd.xlane.f32.xlu0 %v1691_v50  ;;  %2313 = vmatpush3.bf16.msra.mxu0 %v2312_v59 }
 0xede   :  { %v1693_v51 = vpop.xlane.xlu0 %1692 }
 0xedf   :  { %v1695_v52 = vmul.f32 0.03125, %v1693_v51 }
 0xee1   :  { %v1696_v53 = vsub.f32 %v1690_v49, %v1695_v52 }
 0xee3   :  { %v1697_v54 = vmul.f32 %v1696_v53, %v1696_v53 }
 0xee5   :  { %v1698_v55 = vsel %vm71_vm1, %v1697_v54, 0.0 }
 0xee6   :  { %1699 = vadd.xlane.f32.xlu1 %v1698_v55 }
 0xf73   :  { %v1700_v7 = vpop.xlane.xlu1 %1699 }
 0xf74   :  { %v1701_v9 = vmul.f32 0.03125, %v1700_v7 }
 0xf76   :  { %v1702_v10 = vadd.f32 1e-05, %v1701_v9 }
 0xf78   :  { %2345 = vrsqrt.f32 %v1702_v10 }
 0xf82   :  { %v2346_v11 = vpop.eup %2345 }
 0xf83   :  { %v1704_v13 = vmul.f32 %v2346_v11, %v1696_v53 }
 0xf85   :  { %v1712_v15 = vmul.f32 %v1996_v12, %v1704_v13 }
 0xf87   :  { %v1720_v16 = vadd.f32 %v1997_v14, %v1712_v15 }
 0xf89   :  { %2239 = vmatmul.mubr.msk.f32.vlgmr.msra.gmra.mrb[22].mxu0 %vm71_vm1, %v1720_v16 }
0x105c   :  { %v1801_v21 = vpop.f32.mrb[22].mxu0 }
0x105d   :  { %v1802_v24 = vadd.f32 %v1998_v19, %v1801_v21  ;;  %v2240_v25 = vpop.f32.mrb[23].mxu0 }
0x105f   :  { %v1805_v26 = vmax.f32 %v1802_v24, 0.0 }
0x1061   :  { %2258 = vmatmul.mubr.msk.f32.vlgmr.msra.gmra.mrb[18].mxu1 %vm1821_vm5, %v1805_v26 }
0x1134   :  { %v1891_v28 = vpop.f32.mrb[18].mxu1 }
0x1135   :  { %v1892_v29 = vadd.f32 %v2000_v27, %v1891_v28  ;;  %v2259_v30 = vpop.f32.mrb[19].mxu1 }
0x1137   :  { %v1895_v31 = vadd.f32 %v1892_v29, %v1720_v16 }
0x1139   :  { %v1896_v33 = vsel %vm71_vm1, %v1895_v31, 0.0 }
0x113a   :  { %1897 = vadd.xlane.f32.xlu0 %v1896_v33 }
0x11c7   :  { %v1898_v34 = vpop.xlane.xlu0 %1897 }
0x11c8   :  { %v1899_v20 = vmul.f32 0.03125, %v1898_v34 }
0x11ca   :  { %v1900_v35 = vsub.f32 %v1895_v31, %v1899_v20 }
0x11cc   :  { %v1901_v32 = vmul.f32 %v1900_v35, %v1900_v35 }
0x11ce   :  { %v1902_v36 = vsel %vm71_vm1, %v1901_v32, 0.0 }
0x11cf   :  { %1903 = vadd.xlane.f32.xlu1 %v1902_v36 }
0x125c   :  { %v1904_v37 = vpop.xlane.xlu1 %1903 }
0x125d   :  { %v1905_v23 = vmul.f32 0.03125, %v1904_v37 }
0x125f   :  { %v1906_v38 = vadd.f32 1e-05, %v1905_v23 }
0x1261   :  { %2347 = vrsqrt.f32 %v1906_v38 }
0x126b   :  { %v2348_v39 = vpop.eup %2347 }
0x126c   :  { %v1908_v41 = vmul.f32 %v2348_v39, %v1900_v35 }
0x126e   :  { %v1916_v43 = vmul.f32 %v2002_v40, %v1908_v41 }
0x1270   :  { %v1924_v44 = vadd.f32 %v2003_v42, %v1916_v43 }
0x1272   :  { %1925 = vst.msk [vmem:[%s2810_s16] sm:$0xff] %vm71_vm1, %v1924_v44 }

</bundles_post_ra>
